<compile_context>
chip_gen: v7x
topology: tpu7x:2x2x1
jax: 0.10.0
libtpu: 0.0.40
codegen_flags: <defaults>
</compile_context>

<pallas_src>
import functools

import jax
import jax.numpy as jnp
from jax.experimental import pallas as pl
from jax.experimental.pallas import tpu as pltpu


# ------------------------------------------------------------------ GELU (exact)
def _erf_approx(x):
    # Abramowitz & Stegun 7.1.26, |err| < 1.5e-7 -- matches nn.GELU() (exact erf)
    # to fp32 noise without relying on an erf lowering inside Mosaic.
    a1, a2, a3, a4, a5 = 0.254829592, -0.284496736, 1.421413741, -1.453152027, 1.061405429
    p = 0.3275911
    ax = jnp.abs(x)
    # Divide goes to the EUP (its own VLIW slot) instead of burning VALU cycles.
    t = pl.reciprocal(1.0 + p * ax, approx=True)
    poly = ((((a5 * t + a4) * t + a3) * t + a2) * t + a1) * t
    y = 1.0 - poly * jnp.exp(-ax * ax)
    return jnp.where(x < 0, -y, y)


def _gelu_exact(x):
    return 0.5 * x * (1.0 + _erf_approx(x * 0.7071067811865475))


# ------------------------------------------------------------------ fc1 + GELU
def _fc1_gelu_kernel(x_ref, w_ref, b_ref, o_ref):
    # bf16 MXU operands (same as default-precision XLA), f32 accumulation.
    acc = jnp.dot(x_ref[...].astype(jnp.bfloat16), w_ref[...],
                  preferred_element_type=jnp.float32)
    acc = acc + b_ref[...]
    o_ref[...] = _gelu_exact(acc).astype(o_ref.dtype)


def pallas_fc1_gelu(x2d, w_bf16, b, *, max_tile_m=512, out_dtype=jnp.bfloat16):
    """(M, Cin) @ (Cin, hidden) + b -> GELU; output stored in bf16."""
    M, K = x2d.shape
    Kw, N = w_bf16.shape
    assert Kw == K
    tm = min(max_tile_m, ((M + 7) // 8) * 8)          # big tile, multiple of 8
    Mp = ((M + tm - 1) // tm) * tm                    # pad rows instead of asserting
    if Mp != M:
        x2d = jnp.pad(x2d, ((0, Mp - M), (0, 0)))
    # TODO(synk): add an N (and K) grid axis with 256-lane weight tiles for large
    # hidden widths on v7x; raise max_tile_m to ~1024 on v5e/v6e (128 MiB VMEM).
    out = pl.pallas_call(
        _fc1_gelu_kernel,
        out_shape=jax.ShapeDtypeStruct((Mp, N), out_dtype),
        grid_spec=pltpu.PrefetchScalarGridSpec(
            num_scalar_prefetch=0,
            grid=(Mp // tm,),
            in_specs=[
                pl.BlockSpec((tm, K), lambda i: (i, 0)),
                pl.BlockSpec((K, N), lambda i: (0, 0)),   # weight stays resident
                pl.BlockSpec((1, N), lambda i: (0, 0)),
            ],
            out_specs=pl.BlockSpec((tm, N), lambda i: (i, 0)),
        ),
        compiler_params=pltpu.CompilerParams(
            dimension_semantics=("parallel",),
            vmem_limit_bytes=48 * 1024 * 1024,
        ),
    )(x2d, w_bf16, b.reshape(1, N))
    return out[:M] if Mp != M else out


# -------------------------- fused dwconv3d + GELU + residual + fc2 (depth-tiled)
def _fused_dwconv_fc2_kernel(hc_ref, h_hbm_ref, wdw_ref, bdw_ref, w2_ref, b2_ref,
                             o_ref, xpad_ref, dma_sem, *, td, H, W, conv_dtype):
    b = pl.program_id(0)
    t = pl.program_id(1)
    nd = pl.num_programs(1)
    d0 = t * td
    C = xpad_ref.shape[-1]
    dt = xpad_ref.dtype
    Cout = w2_ref.shape[-1]

    def _fwd_halo_copy():
        # First depth plane of the NEXT tile -> local padded depth index td+1.
        return pltpu.make_async_copy(
            h_hbm_ref.at[b, pl.ds(d0 + td, 1)],
            xpad_ref.at[pl.ds(td + 1, 1), pl.ds(1, H), pl.ds(1, W), :],
            dma_sem)

    # ---- 1) forward depth-halo DMA: start as early as possible.  It only writes
    #         plane td+1's interior, disjoint from every store below; its latency
    #         hides under the slab assembly.  Waited in step 5.
    @pl.when(t < nd - 1)
    def _start_fwd():
        _fwd_halo_copy().start()

    # ---- 2) depth-(-1) halo: carried from the previous depth tile (its last centre
    #         plane sits at xpad[td], borders already zero).  No backward HBM DMA.
    #         Must precede the centre copy, which overwrites plane td.
    @pl.when(t > 0)
    def _carry():
        xpad_ref[0:1, :, :, :] = xpad_ref[td:td + 1, :, :, :]

    # ---- 3) constant zero regions written once per (batch, core).  Guarding on
    #         t == 0 is megacore-safe: any core running (b, t>0) ran (b, 0) first,
    #         and interior writes below never touch these regions.
    @pl.when(t == 0)
    def _init_zeros():
        xpad_ref[0:1, :, :, :] = jnp.zeros((1, H + 2, W + 2, C), dt)            # -1 halo
        xpad_ref[:, 0:1, :, :] = jnp.zeros((td + 2, 1, W + 2, C), dt)           # H borders
        xpad_ref[:, H + 1:H + 2, :, :] = jnp.zeros((td + 2, 1, W + 2, C), dt)
        xpad_ref[:, :, 0:1, :] = jnp.zeros((td + 2, H + 2, 1, C), dt)           # W borders
        xpad_ref[:, :, W + 1:W + 2, :] = jnp.zeros((td + 2, H + 2, 1, C), dt)

    @pl.when(t == nd - 1)
    def _zero_fwd_halo():
        xpad_ref[td + 1:td + 2, 1:H + 1, 1:W + 1, :] = jnp.zeros((1, H, W, C), dt)

    # ---- 4) centre depth slab (auto-pipelined BlockSpec tile) -> interior.
    xpad_ref[1:td + 1, 1:H + 1, 1:W + 1, :] = hc_ref[...].reshape(td, H, W, C)

    # Conv weights read once per step (not 27 separate ref slices), while the
    # halo DMA is still in flight.
    w_all = wdw_ref[...].astype(conv_dtype)            # (3, 3, 3, C)

    # ---- 5) halo must be resident before the tap loop touches plane td+1.
    @pl.when(t < nd - 1)
    def _wait_fwd():
        _fwd_halo_copy().wait()

    # ---- 6) depthwise 3x3x3 conv (cross-correlation, matches nn.Conv3d).  Tap MACs
    #         in conv_dtype (bf16 on v6e/v7x); each (kd,kh) 3-tap partial sum is
    #         upcast into the f32 accumulator.
    acc = jnp.zeros((td, H, W, C), jnp.float32)
    for kd in range(3):
        for kh in range(3):
            part = None
            for kw in range(3):
                patch = xpad_ref[kd:kd + td, kh:kh + H, kw:kw + W, :].astype(conv_dtype)
                term = patch * w_all[kd, kh, kw]
                part = term if part is None else part + term
            acc = acc + part.astype(jnp.float32)
    acc = acc + bdw_ref[...].astype(jnp.float32)                        # conv bias
    y = _gelu_exact(acc)                                                # GELU in dwconv3d
    res = xpad_ref[1:td + 1, 1:H + 1, 1:W + 1, :].astype(jnp.float32)   # residual
    z = res + y

    # ---- 7) fused fc2 on the tile: hidden activation never goes back to HBM.
    #         bf16 MXU operands, f32 accumulation.
    z2 = z.reshape(td * H * W, C).astype(jnp.bfloat16)
    out = jnp.dot(z2, w2_ref[...], preferred_element_type=jnp.float32)
    out = out + b2_ref[...]
    o_ref[...] = out.reshape(1, td, H, W, Cout).astype(o_ref.dtype)


def _pick_depth_tile(D, max_td):
    for cand in range(min(D, max_td), 0, -1):
        if D % cand == 0:
            return cand
    return 1


def pallas_dwconv_gelu_res_fc2(h, x_size, w_dw, b_dw, w2_bf16, b2, *,
                               out_dtype, max_td=4, conv_dtype=jnp.bfloat16):
    """h: (B, L, hidden) bf16 = GELU(fc1(x)); returns fc2(h + GELU(dwconv3d(h)))."""
    B, L, C = h.shape
    D, H, W = x_size
    assert L == D * H * W
    Cout = w2_bf16.shape[1]
    # max_td: 4 default; raise (~8) on v5e/v6e (128 MiB VMEM), drop to 2 on v7x (64 MiB).
    td = _pick_depth_tile(D, max_td)
    nd = D // td
    h5 = h.reshape(B, D, H, W, C)

    kernel = functools.partial(_fused_dwconv_fc2_kernel, td=td, H=H, W=W,
                               conv_dtype=conv_dtype)
    out = pl.pallas_call(
        kernel,
        out_shape=jax.ShapeDtypeStruct((B, D, H, W, Cout), out_dtype),
        grid_spec=pltpu.PrefetchScalarGridSpec(
            num_scalar_prefetch=0,
            grid=(B, nd),
            in_specs=[
                # centre depth slab, auto-pipelined HBM->VMEM (bf16)
                pl.BlockSpec((1, td, H, W, C), lambda b, t: (b, t, 0, 0, 0)),
                # same activation kept in HBM for the forward depth-halo DMA
                pl.BlockSpec(memory_space=pl.ANY),
                pl.BlockSpec((3, 3, 3, C), lambda b, t: (0, 0, 0, 0)),
                pl.BlockSpec((1, C), lambda b, t: (0, 0)),
                pl.BlockSpec((C, Cout), lambda b, t: (0, 0)),
                pl.BlockSpec((1, Cout), lambda b, t: (0, 0)),
            ],
            out_specs=pl.BlockSpec((1, td, H, W, Cout), lambda b, t: (b, t, 0, 0, 0)),
            scratch_shapes=[
                pltpu.VMEM((td + 2, H + 2, W + 2, C), h.dtype),   # bf16 padded slab
                pltpu.SemaphoreType.DMA(()),
            ],
        ),
        # Depth axis is "arbitrary": the carried -1 halo requires in-order depth
        # tiles.  Batch stays "parallel" for v7x megacore (keep B >= 2).
        compiler_params=pltpu.CompilerParams(
            dimension_semantics=("parallel", "arbitrary"),
            vmem_limit_bytes=48 * 1024 * 1024,
        ),
    )(h5, h5, w_dw, b_dw.reshape(1, C), w2_bf16, b2.reshape(1, Cout))
    return out.reshape(B, L, Cout)


# ------------------------------------------------------------------ full module
def conv_ffn3d(x, x_size, params, *, max_td=4, conv_dtype=jnp.bfloat16):
    """x: (B, L, C_in), x_size = (D, H, W) with L == D*H*W.
    conv_dtype: use jnp.float32 on v5e (no bf16 VALU there)."""
    B, L, Cin = x.shape
    hidden = params["w1"].shape[1]
    w1 = params["w1"].astype(jnp.bfloat16)    # MXU multiplies in bf16 anyway
    w2 = params["w2"].astype(jnp.bfloat16)
    h = pallas_fc1_gelu(x.reshape(B * L, Cin), w1, params["b1"])
    h = h.reshape(B, L, hidden)
    out = pallas_dwconv_gelu_res_fc2(h, x_size, params["w_dw"], params["b_dw"],
                                     w2, params["b2"], out_dtype=x.dtype,
                                     max_td=max_td, conv_dtype=conv_dtype)
    return out


# ------------------------------------------------------------------ pure-JAX ref
def conv_ffn3d_ref(x, x_size, params):
    B, L, Cin = x.shape
    D, H, W = x_size
    hidden = params["w1"].shape[1]
    h = jnp.einsum("blc,cd->bld", x, params["w1"]) + params["b1"]
    h = jax.nn.gelu(h, approximate=False)
    h5 = h.reshape(B, D, H, W, hidden)
    dw = jax.lax.conv_general_dilated(
        h5,
        params["w_dw"].reshape(3, 3, 3, 1, hidden),
        window_strides=(1, 1, 1),
        padding="SAME",
        dimension_numbers=("NDHWC", "DHWIO", "NDHWC"),
        feature_group_count=hidden,
    )
    dw = jax.nn.gelu(dw + params["b_dw"], approximate=False).reshape(B, L, hidden)
    h = h + dw
    out = jnp.einsum("blc,cd->bld", h, params["w2"]) + params["b2"]
    return out


if __name__ == "__main__":
    B = 2
    in_features = 16
    hidden_features = 32
    out_features = in_features
    x_size = (8, 8, 8)                      # D=8 -> two depth tiles: carry + halo paths
    L = x_size[0] * x_size[1] * x_size[2]

    key = jax.random.PRNGKey(0)
    k1, k2, k3, k4, k5, k6, k7 = jax.random.split(key, 7)
    params = {
        # fc1: (in, hidden)   [PyTorch stores (hidden, in); we keep the transposed layout]
        "w1": 0.1 * jax.random.normal(k1, (in_features, hidden_features), jnp.float32),
        "b1": 0.01 * jax.random.normal(k2, (hidden_features,), jnp.float32),
        # depthwise conv weight: (3,3,3,C) == torch weight (C,1,3,3,3) permuted to (kd,kh,kw,c)
        "w_dw": 0.1 * jax.random.normal(k3, (3, 3, 3, hidden_features), jnp.float32),
        "b_dw": 0.01 * jax.random.normal(k4, (hidden_features,), jnp.float32),
        # fc2: (hidden, out)
        "w2": 0.1 * jax.random.normal(k5, (hidden_features, out_features), jnp.float32),
        "b2": 0.01 * jax.random.normal(k6, (out_features,), jnp.float32),
    }
    x = jax.random.normal(k7, (B, L, in_features), jnp.float32)

    out = jax.block_until_ready(conv_ffn3d(x, x_size, params))
    ref = jax.block_until_ready(conv_ffn3d_ref(x, x_size, params))

    assert out.shape == (B, L, out_features)
    max_err = float(jnp.max(jnp.abs(out - ref)))
    # Kernel stores the hidden activation and matmul operands in bf16 and uses the
    # erf polynomial + EUP approx-reciprocal; residual difference vs the f32
    # reference is bf16-rounding / accumulation-order noise.
    assert jnp.allclose(out, ref, rtol=1e-2, atol=1e-2), max_err

    print("KERNEL_OK")
</pallas_src>

<mosaic_0001>
module attributes {stable_mosaic.version = 11 : i64} {
  func.func @_fc1_gelu_kernel(%arg0: i32, %arg1: memref<512x16xf32, #tpu.memory_space<vmem>>, %arg2: memref<16x32xbf16, #tpu.memory_space<vmem>>, %arg3: memref<1x32xf32, #tpu.memory_space<vmem>>, %arg4: memref<512x32xbf16, #tpu.memory_space<vmem>>) attributes {dimension_semantics = [#tpu.dimension_semantics<parallel>], iteration_bounds = array<i64: 2>, scalar_prefetch = 0 : i64, scratch_operands = 0 : i64, tpu.core_type = #tpu.core_type<tc>, window_params = [{transform_indices = @transform_0, window_bounds = array<i64: 512, 16>}, {pipeline_mode = #tpu.pipeline_mode<synchronous>, transform_indices = @transform_1, window_bounds = array<i64: 16, 32>}, {pipeline_mode = #tpu.pipeline_mode<synchronous>, transform_indices = @transform_2, window_bounds = array<i64: 1, 32>}, {transform_indices = @transform_3, window_bounds = array<i64: 512, 32>}]} {
    %c0 = arith.constant 0 : index
    %c0_0 = arith.constant 0 : index
    %0 = vector.load %arg1[%c0, %c0_0] : memref<512x16xf32, #tpu.memory_space<vmem>>, vector<512x16xf32>
    %1 = arith.truncf %0 : vector<512x16xf32> to vector<512x16xbf16>
    %c0_1 = arith.constant 0 : index
    %c0_2 = arith.constant 0 : index
    %2 = vector.load %arg2[%c0_1, %c0_2] : memref<16x32xbf16, #tpu.memory_space<vmem>>, vector<16x32xbf16>
    %cst = arith.constant dense<0.000000e+00> : vector<512x32xf32>
    %3 = tpu.matmul %1, %2, %cst {dimension_numbers = #tpu.dot_dimension_numbers<[1], [0], [0], [1], [0, 0, 1, 1], [], []>} : vector<512x16xbf16>, vector<16x32xbf16>, vector<512x32xf32> -> vector<512x32xf32>
    %c0_3 = arith.constant 0 : index
    %c0_4 = arith.constant 0 : index
    %4 = vector.load %arg3[%c0_3, %c0_4] : memref<1x32xf32, #tpu.memory_space<vmem>>, vector<1x32xf32>
    %5 = vector.broadcast %4 : vector<1x32xf32> to vector<512x32xf32>
    %6 = arith.addf %3, %5 : vector<512x32xf32>
    %cst_5 = arith.constant 5.000000e-01 : f32
    %7 = vector.broadcast %cst_5 : f32 to vector<512x32xf32>
    %8 = arith.mulf %7, %6 : vector<512x32xf32>
    %cst_6 = arith.constant 0.707106769 : f32
    %9 = vector.broadcast %cst_6 : f32 to vector<512x32xf32>
    %10 = arith.mulf %6, %9 : vector<512x32xf32>
    %11 = math.absf %10 : vector<512x32xf32>
    %cst_7 = arith.constant 0.327591091 : f32
    %12 = vector.broadcast %cst_7 : f32 to vector<512x32xf32>
    %13 = arith.mulf %12, %11 : vector<512x32xf32>
    %cst_8 = arith.constant 1.000000e+00 : f32
    %14 = vector.broadcast %cst_8 : f32 to vector<512x32xf32>
    %15 = arith.addf %14, %13 : vector<512x32xf32>
    %16 = tpu.reciprocal %15 {approx = true} : vector<512x32xf32> -> vector<512x32xf32>
    %cst_9 = arith.constant 1.06140542 : f32
    %17 = vector.broadcast %cst_9 : f32 to vector<512x32xf32>
    %18 = arith.mulf %17, %16 : vector<512x32xf32>
    %cst_10 = arith.constant -1.45315206 : f32
    %19 = vector.broadcast %cst_10 : f32 to vector<512x32xf32>
    %20 = arith.addf %18, %19 : vector<512x32xf32>
    %21 = arith.mulf %20, %16 : vector<512x32xf32>
    %cst_11 = arith.constant 1.42141378 : f32
    %22 = vector.broadcast %cst_11 : f32 to vector<512x32xf32>
    %23 = arith.addf %21, %22 : vector<512x32xf32>
    %24 = arith.mulf %23, %16 : vector<512x32xf32>
    %cst_12 = arith.constant -0.284496725 : f32
    %25 = vector.broadcast %cst_12 : f32 to vector<512x32xf32>
    %26 = arith.addf %24, %25 : vector<512x32xf32>
    %27 = arith.mulf %26, %16 : vector<512x32xf32>
    %cst_13 = arith.constant 0.254829586 : f32
    %28 = vector.broadcast %cst_13 : f32 to vector<512x32xf32>
    %29 = arith.addf %27, %28 : vector<512x32xf32>
    %30 = arith.mulf %29, %16 : vector<512x32xf32>
    %cst_14 = arith.constant 0.000000e+00 : f32
    %31 = vector.broadcast %cst_14 : f32 to vector<512x32xf32>
    %32 = arith.subf %31, %11 : vector<512x32xf32>
    %33 = arith.mulf %32, %11 : vector<512x32xf32>
    %34 = math.exp %33 : vector<512x32xf32>
    %35 = arith.mulf %30, %34 : vector<512x32xf32>
    %cst_15 = arith.constant 1.000000e+00 : f32
    %36 = vector.broadcast %cst_15 : f32 to vector<512x32xf32>
    %37 = arith.subf %36, %35 : vector<512x32xf32>
    %cst_16 = arith.constant 0.000000e+00 : f32
    %38 = vector.broadcast %cst_16 : f32 to vector<512x32xf32>
    %39 = arith.cmpf olt, %10, %38 : vector<512x32xf32>
    %cst_17 = arith.constant 0.000000e+00 : f32
    %40 = vector.broadcast %cst_17 : f32 to vector<512x32xf32>
    %41 = arith.subf %40, %37 : vector<512x32xf32>
    %42 = arith.select %39, %41, %37 : vector<512x32xi1>, vector<512x32xf32>
    %cst_18 = arith.constant 1.000000e+00 : f32
    %43 = vector.broadcast %cst_18 : f32 to vector<512x32xf32>
    %44 = arith.addf %43, %42 : vector<512x32xf32>
    %45 = arith.mulf %8, %44 : vector<512x32xf32>
    %46 = arith.truncf %45 : vector<512x32xf32> to vector<512x32xbf16>
    %c0_19 = arith.constant 0 : index
    %c0_20 = arith.constant 0 : index
    %47 = vector.load %arg4[%c0_19, %c0_20] : memref<512x32xbf16, #tpu.memory_space<vmem>>, vector<512x32xbf16>
    tpu.vector_store %arg4[%c0_19, %c0_20], %46 {strides = array<i32>} : memref<512x32xbf16, #tpu.memory_space<vmem>>, vector<512x32xbf16>,
    return
  }
  func.func @transform_0(%arg0: i32) -> (i32, i32) {
    %c0_i32 = arith.constant 0 : i32
    %c0_i32_0 = arith.constant 0 : i32
    return %arg0, %c0_i32 : i32, i32
  }
  func.func @transform_1(%arg0: i32) -> (i32, i32) {
    %c0_i32 = arith.constant 0 : i32
    %c0_i32_0 = arith.constant 0 : i32
    %c0_i32_1 = arith.constant 0 : i32
    return %c0_i32, %c0_i32_0 : i32, i32
  }
  func.func @transform_2(%arg0: i32) -> (i32, i32) {
    %c0_i32 = arith.constant 0 : i32
    %c0_i32_0 = arith.constant 0 : i32
    %c0_i32_1 = arith.constant 0 : i32
    return %c0_i32, %c0_i32_0 : i32, i32
  }
  func.func @transform_3(%arg0: i32) -> (i32, i32) {
    %c0_i32 = arith.constant 0 : i32
    %c0_i32_0 = arith.constant 0 : i32
    return %arg0, %c0_i32 : i32, i32
  }
}

</mosaic_0001>

<bundles_post_ra>
// kernel: tpu_custom_call.1
= control target key start
LH: loop header
LB: loop body
LE: loop exit
PB: predicated region body
PF: predicated region fallthrough
CT: control target
= control target key end

     0   :  { %s3283_s12 = smov 0   ;;  %s4963_s0 = inlined_call_operand.vmem [shape: f32[1024,16], index: 0, kind: input, shape index: {}]   ;;  %s4964_s1 = inlined_call_operand.vmem [shape: bf16[16,32], index: 1, kind: input, shape index: {}]   ;;  %s4965_s2 = inlined_call_operand.vmem [shape: f32[1,32], index: 2, kind: input, shape index: {}]   ;;  %s4966_s3 = inlined_call_operand.vmem [shape: bf16[1024,32], index: 3, kind: output, shape index: {}]  }
   0x1 LB: > { %s2713_s13 = sadd.s32 4294967295, %s3261_s12   ;;  %p2717_p0 = scmp.ge.s32.totalorder %s3261_s12, 1  ;;  %s3261_s12 = sphi %s3283_s12, %s13_s12  }
   0x2   : > { %p138_p1 = scmp.lt.s32.totalorder %s3261_s12, 3 }
   0x4   : > { %p139_p2 = pnand %p2717_p0, %p138_p1 }
   0x6   : > { %142 = sbr.rel (%p139_p2) target bundleno = 711 (0x2c7), region = 32 }
   0xd   : > { %v2995_v0 = vld [vmem:[%s4964_s1] sm:$0xff]   ;;  %s2718_s16 = sshll.u32 %s2713_s13, 6  ;;  %vm286_vm0 = vcmask 130048   ;;  %vm2592_vm4 = vcmask 257024  }
   0xe   : > { %p163_p3 = scmp.lt.s32.totalorder %s2718_s16, 127  ;;  %2919 = vmatprep.subr.bf16.mxu0 %v2995_v0  ;;  %2985 = vmatprep.subr.bf16.mxu1 %v2995_v0 }
   0xf   : > { %2920 = vmatpush3.bf16.msra.mxu0 %v2995_v0  ;;  %2986 = vmatpush3.bf16.msra.mxu1 %v2995_v0 }
  0x10   : > { %s4984_s16 = smov (!%p163_p3, %s2718_s16), 127 }
  0x11   : > { %s2719_s17 = sshll.u32 %s4984_s16, 3  ;;  %s2721_s23 = sshll.u32 %s4984_s16, 2 }
  0x12   : > { %s3300_s20 = scalar_lea.vmem %s4963_s0, %s2719_s17  ;;  %s3594_s26 = scalar_lea.vmem %s4966_s3, %s2721_s23 }
  0x13   : > { %v175_v1 = vld [vmem:[%s3300_s20] sm:$0xff]  ;;  %v176_v2 = vld [vmem:[%s3300_s20 + $0x8] sm:$0xff]  ;;  %v177_v6 = vld [vmem:[%s3300_s20 + $0x10] sm:$0xff] }
  0x14   : > { %v207_v3 = vld [vmem:[%s3300_s20 + $0x100] sm:$0xff]  ;;  %v239_v4 = vpack.c.bf16 %v176_v2, %v175_v1  ;;  %v208_v5 = vld [vmem:[%s3300_s20 + $0x108] sm:$0xff]  ;;  %v178_v7 = vld [vmem:[%s3300_s20 + $0x18] sm:$0xff] }
  0x15   : > { %v255_v8 = vpack.c.bf16 %v208_v5, %v207_v3  ;;  %v240_v9 = vpack.c.bf16 %v178_v7, %v177_v6  ;;  %v209_v10 = vld [vmem:[%s3300_s20 + $0x110] sm:$0xff]  ;;  %v210_v11 = vld [vmem:[%s3300_s20 + $0x118] sm:$0xff]  ;;  %v179_v12 = vld [vmem:[%s3300_s20 + $0x20] sm:$0xff] }
  0x16   : > { %2921 = vmatprep.mubr.msk.bf16.mxu0 %vm286_vm0, %v239_v4  ;;  %v256_v13 = vpack.c.bf16 %v210_v11, %v209_v10  ;;  %v180_v14 = vld [vmem:[%s3300_s20 + $0x28] sm:$0xff]  ;;  %v211_v15 = vld [vmem:[%s3300_s20 + $0x120] sm:$0xff]  ;;  %v181_v19 = vld [vmem:[%s3300_s20 + $0x30] sm:$0xff] }
  0x17   : > { %v212_v16 = vld [vmem:[%s3300_s20 + $0x128] sm:$0xff]  ;;  %2953 = vmatprep.mubr.msk.bf16.mxu1 %vm286_vm0, %v255_v8  ;;  %2922 = vmatmul.mubr.msk.bf16.vlgmr.msra.gmra.mrb[0].mxu0 %vm286_vm0, %v240_v9  ;;  %v241_v17 = vpack.c.bf16 %v180_v14, %v179_v12  ;;  %v182_v20 = vld [vmem:[%s3300_s20 + $0x38] sm:$0xff]  ;;  %v213_v21 = vld [vmem:[%s3300_s20 + $0x130] sm:$0xff] }
  0x18   : > { %v257_v18 = vpack.c.bf16 %v212_v16, %v211_v15  ;;  %2954 = vmatmul.mubr.msk.bf16.vlgmr.msra.gmra.mrb[0].mxu1 %vm286_vm0, %v256_v13  ;;  %v214_v22 = vld [vmem:[%s3300_s20 + $0x138] sm:$0xff]  ;;  %v183_v23 = vld [vmem:[%s3300_s20 + $0x40] sm:$0xff]  ;;  %v184_v24 = vld [vmem:[%s3300_s20 + $0x48] sm:$0xff]  ;;  %v242_v27 = vpack.c.bf16 %v182_v20, %v181_v19 }
  0x19   : > { %2925 = vmatprep.mubr.msk.bf16.mxu0 %vm286_vm0, %v241_v17  ;;  %v215_v25 = vld [vmem:[%s3300_s20 + $0x140] sm:$0xff]  ;;  %v216_v26 = vld [vmem:[%s3300_s20 + $0x148] sm:$0xff]  ;;  %v258_v28 = vpack.c.bf16 %v214_v22, %v213_v21  ;;  %v243_v29 = vpack.c.bf16 %v184_v24, %v183_v23  ;;  %v185_v31 = vld [vmem:[%s3300_s20 + $0x50] sm:$0xff] }
  0x1a   : > { %2957 = vmatprep.mubr.msk.bf16.mxu1 %vm286_vm0, %v257_v18  ;;  %v259_v30 = vpack.c.bf16 %v216_v26, %v215_v25  ;;  %v186_v32 = vld [vmem:[%s3300_s20 + $0x58] sm:$0xff]  ;;  %v217_v33 = vld [vmem:[%s3300_s20 + $0x150] sm:$0xff]  ;;  %v187_v35 = vld [vmem:[%s3300_s20 + $0x60] sm:$0xff] }
  0x1b   : > { %v218_v34 = vld [vmem:[%s3300_s20 + $0x158] sm:$0xff]  ;;  %v188_v36 = vld [vmem:[%s3300_s20 + $0x68] sm:$0xff]  ;;  %v219_v37 = vld [vmem:[%s3300_s20 + $0x160] sm:$0xff]  ;;  %v244_v39 = vpack.c.bf16 %v186_v32, %v185_v31 }
  0x1c   : > { %v220_v38 = vld [vmem:[%s3300_s20 + $0x168] sm:$0xff]  ;;  %v260_v40 = vpack.c.bf16 %v218_v34, %v217_v33  ;;  %v245_v41 = vpack.c.bf16 %v188_v36, %v187_v35  ;;  %v189_v43 = vld [vmem:[%s3300_s20 + $0x70] sm:$0xff]  ;;  %v190_v44 = vld [vmem:[%s3300_s20 + $0x78] sm:$0xff] }
  0x1d   : > { %v261_v42 = vpack.c.bf16 %v220_v38, %v219_v37  ;;  %v221_v45 = vld [vmem:[%s3300_s20 + $0x170] sm:$0xff]  ;;  %v222_v46 = vld [vmem:[%s3300_s20 + $0x178] sm:$0xff]  ;;  %v191_v47 = vld [vmem:[%s3300_s20 + $0x80] sm:$0xff]  ;;  %v246_v51 = vpack.c.bf16 %v190_v44, %v189_v43 }
  0x1e   : > { %v192_v48 = vld [vmem:[%s3300_s20 + $0x88] sm:$0xff]  ;;  %v223_v49 = vld [vmem:[%s3300_s20 + $0x180] sm:$0xff]  ;;  %v262_v52 = vpack.c.bf16 %v222_v46, %v221_v45  ;;  %v193_v55 = vld [vmem:[%s3300_s20 + $0x90] sm:$0xff] }
  0x1f   : > { %2926 = vmatmul.mubr.msk.bf16.gmra.mrb[4].mxu0 %vm286_vm0, %v242_v27  ;;  %v224_v50 = vld [vmem:[%s3300_s20 + $0x188] sm:$0xff]  ;;  %v247_v53 = vpack.c.bf16 %v192_v48, %v191_v47  ;;  %v194_v56 = vld [vmem:[%s3300_s20 + $0x98] sm:$0xff]  ;;  %v225_v57 = vld [vmem:[%s3300_s20 + $0x190] sm:$0xff] }
  0x20   : > { %2958 = vmatmul.mubr.msk.bf16.gmra.mrb[4].mxu1 %vm286_vm0, %v258_v28  ;;  %2929 = vmatprep.mubr.msk.bf16.mxu0 %vm286_vm0, %v243_v29  ;;  %v263_v54 = vpack.c.bf16 %v224_v50, %v223_v49  ;;  %v226_v58 = vld [vmem:[%s3300_s20 + $0x198] sm:$0xff]  ;;  %v195_v59 = vld [vmem:[%s3300_s20 + $0xa0] sm:$0xff]  ;;  %v196_v60 = vld [vmem:[%s3300_s20 + $0xa8] sm:$0xff]  ;;  %v248_v63 = vpack.c.bf16 %v194_v56, %v193_v55 }
  0x21   : > { %2961 = vmatprep.mubr.msk.bf16.mxu1 %vm286_vm0, %v259_v30  ;;  %v227_v61 = vld [vmem:[%s3300_s20 + $0x1a0] sm:$0xff]  ;;  %v228_v62 = vld [vmem:[%s3300_s20 + $0x1a8] sm:$0xff]  ;;  %v264_v0 = vpack.c.bf16 %v226_v58, %v225_v57  ;;  %v249_v1 = vpack.c.bf16 %v196_v60, %v195_v59  ;;  %v197_v3 = vld [vmem:[%s3300_s20 + $0xb0] sm:$0xff] }
  0x22   : > { %v265_v2 = vpack.c.bf16 %v228_v62, %v227_v61  ;;  %v198_v4 = vld [vmem:[%s3300_s20 + $0xb8] sm:$0xff]  ;;  %v229_v5 = vld [vmem:[%s3300_s20 + $0x1b0] sm:$0xff]  ;;  %v199_v7 = vld [vmem:[%s3300_s20 + $0xc0] sm:$0xff] }
  0x23   : > { %v230_v6 = vld [vmem:[%s3300_s20 + $0x1b8] sm:$0xff]  ;;  %v200_v8 = vld [vmem:[%s3300_s20 + $0xc8] sm:$0xff]  ;;  %v231_v9 = vld [vmem:[%s3300_s20 + $0x1c0] sm:$0xff]  ;;  %v250_v11 = vpack.c.bf16 %v198_v4, %v197_v3 }
  0x24   : > { %v232_v10 = vld [vmem:[%s3300_s20 + $0x1c8] sm:$0xff]  ;;  %v266_v12 = vpack.c.bf16 %v230_v6, %v229_v5  ;;  %v251_v13 = vpack.c.bf16 %v200_v8, %v199_v7  ;;  %v201_v15 = vld [vmem:[%s3300_s20 + $0xd0] sm:$0xff]  ;;  %v202_v16 = vld [vmem:[%s3300_s20 + $0xd8] sm:$0xff] }
  0x25   : > { %v267_v14 = vpack.c.bf16 %v232_v10, %v231_v9  ;;  %v233_v17 = vld [vmem:[%s3300_s20 + $0x1d0] sm:$0xff]  ;;  %v234_v18 = vld [vmem:[%s3300_s20 + $0x1d8] sm:$0xff]  ;;  %v203_v19 = vld [vmem:[%s3300_s20 + $0xe0] sm:$0xff]  ;;  %v252_v23 = vpack.c.bf16 %v202_v16, %v201_v15 }
  0x26   : > { %v204_v20 = vld [vmem:[%s3300_s20 + $0xe8] sm:$0xff]  ;;  %v235_v21 = vld [vmem:[%s3300_s20 + $0x1e0] sm:$0xff]  ;;  %v268_v24 = vpack.c.bf16 %v234_v18, %v233_v17  ;;  %v205_v27 = vld [vmem:[%s3300_s20 + $0xf0] sm:$0xff] }
  0x27   : > { %2930 = vmatmul.mubr.msk.bf16.gmra.mrb[8].mxu0 %vm286_vm0, %v244_v39  ;;  %v236_v22 = vld [vmem:[%s3300_s20 + $0x1e8] sm:$0xff]  ;;  %v253_v25 = vpack.c.bf16 %v204_v20, %v203_v19  ;;  %v206_v28 = vld [vmem:[%s3300_s20 + $0xf8] sm:$0xff]  ;;  %v237_v29 = vld [vmem:[%s3300_s20 + $0x1f0] sm:$0xff] }
  0x28   : > { %2962 = vmatmul.mubr.msk.bf16.gmra.mrb[8].mxu1 %vm286_vm0, %v260_v40  ;;  %2933 = vmatprep.mubr.msk.bf16.mxu0 %vm286_vm0, %v245_v41  ;;  %v269_v26 = vpack.c.bf16 %v236_v22, %v235_v21  ;;  %v238_v30 = vld [vmem:[%s3300_s20 + $0x1f8] sm:$0xff]  ;;  %v254_v31 = vpack.c.bf16 %v206_v28, %v205_v27  ;;  %v3401_v33 = vld [vmem:[%s4965_s2] ss:$0 sm:$0xff] }
  0x29   : > { %2965 = vmatprep.mubr.msk.bf16.mxu1 %vm286_vm0, %v261_v42  ;;  %v270_v32 = vpack.c.bf16 %v238_v30, %v237_v29 }
  0x2f   : > { %2934 = vmatmul.mubr.msk.bf16.gmra.mrb[12].mxu0 %vm286_vm0, %v246_v51 }
  0x30   : > { %2966 = vmatmul.mubr.msk.bf16.gmra.mrb[12].mxu1 %vm286_vm0, %v262_v52  ;;  %2937 = vmatprep.mubr.msk.bf16.mxu0 %vm286_vm0, %v247_v53 }
  0x31   : > { %2969 = vmatprep.mubr.msk.bf16.mxu1 %vm286_vm0, %v263_v54 }
  0x37   : > { %2938 = vmatmul.mubr.msk.bf16.gmra.mrb[16].mxu0 %vm286_vm0, %v248_v63 }
  0x38   : > { %2970 = vmatmul.mubr.msk.bf16.gmra.mrb[16].mxu1 %vm286_vm0, %v264_v0  ;;  %2941 = vmatprep.mubr.msk.bf16.mxu0 %vm286_vm0, %v249_v1 }
  0x39   : > { %2973 = vmatprep.mubr.msk.bf16.mxu1 %vm286_vm0, %v265_v2 }
  0x3f   : > { %2942 = vmatmul.mubr.msk.bf16.gmra.mrb[20].mxu0 %vm286_vm0, %v250_v11 }
  0x40   : > { %2974 = vmatmul.mubr.msk.bf16.gmra.mrb[20].mxu1 %vm286_vm0, %v266_v12  ;;  %2945 = vmatprep.mubr.msk.bf16.mxu0 %vm286_vm0, %v251_v13 }
  0x41   : > { %2977 = vmatprep.mubr.msk.bf16.mxu1 %vm286_vm0, %v267_v14 }
  0x47   : > { %2946 = vmatmul.mubr.msk.bf16.gmra.mrb[24].mxu0 %vm286_vm0, %v252_v23 }
  0x48   : > { %2978 = vmatmul.mubr.msk.bf16.gmra.mrb[24].mxu1 %vm286_vm0, %v268_v24  ;;  %2949 = vmatprep.mubr.msk.bf16.mxu0 %vm286_vm0, %v253_v25 }
  0x49   : > { %2981 = vmatprep.mubr.msk.bf16.mxu1 %vm286_vm0, %v269_v26 }
  0x4f   : > { %2950 = vmatmul.mubr.msk.bf16.gmra.mrb[28].mxu0 %vm286_vm0, %v254_v31 }
  0x50   : > { %2982 = vmatmul.mubr.msk.bf16.gmra.mrb[28].mxu1 %vm286_vm0, %v270_v32 }
  0xea   : > { %v2923_v34 = vpop.f32.mrb[0].mxu0 }
  0xeb   : > { %v426_v35 = vadd.f32 %v2923_v34, %v3401_v33  ;;  %v2955_v36 = vpop.f32.mrb[0].mxu1  ;;  %v417_v37 = vpop.f32.mrb[1].mxu0 }
  0xec   : > { %v554_v38 = vadd.f32 %v2955_v36, %v3401_v33  ;;  %v418_v39 = vadd.f32 %v3401_v33, %v417_v37  ;;  %v545_v40 = vpop.f32.mrb[1].mxu1  ;;  %v2924_v41 = vpop.f32.mrb[2].mxu0 }
  0xed   : > { %v3406_v42 = vmul.f32 0.70710677, %v426_v35  ;;  %v546_v43 = vadd.f32 %v3401_v33, %v545_v40  ;;  %v2956_v44 = vpop.f32.mrb[2].mxu1  ;;  %v420_v45 = vpop.f32.mrb[3].mxu0  ;;  %v429_v62 = vadd.f32 %v2924_v41, %v3401_v33  ;;  %v3428_v9 = vmul.f32 0.5, %v426_v35 }
  0xee   : > { %v3409_v46 = vmul.f32 0.70710677, %v554_v38  ;;  %v3411_v47 = vmul.f32 0.70710677, %v418_v39  ;;  %v548_v63 = vpop.f32.mrb[3].mxu1  ;;  %v557_v15 = vadd.f32 %v2956_v44, %v3401_v33  ;;  %v3439_v18 = vmul.f32 0.5, %v554_v38 }
  0xef   : > { %v802_v48 = vand.u32 2147483647, %v3406_v42  ;;  %v3414_v49 = vmul.f32 0.70710677, %v546_v43  ;;  %v3432_v14 = vmul.f32 0.70710677, %v429_v62  ;;  %v3444_v21 = vadd.f32 %v3401_v33, %v420_v45 }
  0xf0   : > { %v834_v50 = vand.u32 2147483647, %v3409_v46  ;;  %v800_v51 = vand.u32 2147483647, %v3411_v47  ;;  %v3441_v20 = vmul.f32 0.5, %v418_v39  ;;  %v3448_v24 = vadd.f32 %v3401_v33, %v548_v63 }
  0xf1   : > { %v866_v52 = vmul.f32 0.3275911, %v802_v48  ;;  %v1634_v53 = vsub.f32 0.0, %v802_v48  ;;  %v832_v54 = vand.u32 2147483647, %v3414_v49  ;;  %v3450_v25 = vmul.f32 0.5, %v546_v43 }
  0xf2   : > { %v898_v55 = vmul.f32 0.3275911, %v834_v50  ;;  %v1666_v56 = vsub.f32 0.0, %v834_v50  ;;  %v864_v57 = vmul.f32 0.3275911, %v800_v51  ;;  %v1632_v58 = vsub.f32 0.0, %v800_v51 }
  0xf3   : > { %v930_v59 = vadd.f32 1.0, %v866_v52  ;;  %v1698_v60 = vmul.f32 %v1634_v53, %v802_v48  ;;  %v896_v61 = vmul.f32 0.3275911, %v832_v54  ;;  %v2927_v0 = vpop.f32.mrb[4].mxu0  ;;  %v3420_v3 = vpop.f32.mrb[4].mxu1  ;;  %v1664_v13 = vsub.f32 0.0, %v832_v54 }
  0xf4   : > { %v962_v1 = vadd.f32 1.0, %v898_v55  ;;  %v1730_v2 = vmul.f32 %v1666_v56, %v834_v50  ;;  %v3422_v4 = vpop.f32.mrb[5].mxu0  ;;  %v928_v5 = vadd.f32 1.0, %v864_v57  ;;  %v1696_v6 = vmul.f32 %v1632_v58, %v800_v51  ;;  %v3424_v7 = vpop.f32.mrb[5].mxu1 }
  0xf5   : > { %2996 = vrcp.f32 %v930_v59  ;;  %v3426_v8 = vpop.f32.mrb[6].mxu0  ;;  %v1764_v10 = vmul.f32 1.442695, %v1698_v60  ;;  %v3430_v11 = vpop.f32.mrb[6].mxu1  ;;  %v960_v12 = vadd.f32 1.0, %v896_v61  ;;  %v1728_v29 = vmul.f32 %v1664_v13, %v832_v54 }
  0xf6   : > { %2998 = vrcp.f32 %v962_v1  ;;  %v3435_v16 = vpop.f32.mrb[7].mxu0  ;;  %v3437_v17 = vpop.f32.mrb[7].mxu1  ;;  %v1828_v19 = vmul.f32 1.442695, %v1730_v2  ;;  %v1760_v22 = vmul.f32 1.442695, %v1696_v6  ;;  %v3480_v55 = vadd.f32 %v2927_v0, %v3401_v33 }
  0xf7   : > { %3000 = vrcp.f32 %v928_v5  ;;  %v803_v23 = vand.u32 2147483647, %v3432_v14  ;;  %v3452_v26 = vmul.f32 0.70710677, %v557_v15  ;;  %v3455_v27 = vmul.f32 0.70710677, %v3444_v21 }
  0xf8   : > { %3002 = vpow2.f32 %v1764_v10  ;;  %v3463_v35 = vmul.f32 0.5, %v429_v62  ;;  %v3470_v41 = vmul.f32 0.70710677, %v3448_v24  ;;  %v1824_v53 = vmul.f32 1.442695, %v1728_v29 }
  0xf9   : > { %3004 = vrcp.f32 %v960_v12  ;;  %v867_v30 = vmul.f32 0.3275911, %v803_v23  ;;  %v1635_v31 = vsub.f32 0.0, %v803_v23  ;;  %v835_v36 = vand.u32 2147483647, %v3452_v26 }
  0xfa   : > { %v3457_v28 = vpop.f32.mrb[8].mxu0  ;;  %3006 = vpow2.f32 %v1828_v19  ;;  %v801_v37 = vand.u32 2147483647, %v3455_v27  ;;  %v833_v54 = vand.u32 2147483647, %v3470_v41  ;;  %v3490_v10 = vmul.f32 0.5, %v557_v15 }
  0xfb   : > { %v3459_v32 = vpop.f32.mrb[8].mxu1  ;;  %v3461_v34 = vpop.f32.mrb[9].mxu0  ;;  %3008 = vpow2.f32 %v1760_v22  ;;  %v931_v39 = vadd.f32 1.0, %v867_v30  ;;  %v1699_v40 = vmul.f32 %v1635_v31, %v803_v23  ;;  %v899_v45 = vmul.f32 0.3275911, %v835_v36 }
  0xfc   : > { %v3467_v38 = vpop.f32.mrb[9].mxu1  ;;  %v3472_v43 = vpop.f32.mrb[10].mxu0  ;;  %v1667_v48 = vsub.f32 0.0, %v835_v36  ;;  %v865_v50 = vmul.f32 0.3275911, %v801_v37  ;;  %v1633_v51 = vsub.f32 0.0, %v801_v37 }
  0xfd   : > { %4967 = vst [vmem:[#allocation2_spill] sm:$0xff] %v3472_v43  ;;  %v3474_v44 = vpop.f32.mrb[10].mxu1  ;;  %3010 = vrcp.f32 %v931_v39  ;;  %v3482_v56 = vpop.f32.mrb[11].mxu0  ;;  %v963_v59 = vadd.f32 1.0, %v899_v45  ;;  %v1766_v1 = vmul.f32 1.442695, %v1699_v40 }
  0xfe   : > { %4968 = vst [vmem:[#allocation3_spill] sm:$0xff] %v3474_v44  ;;  %4969 = vst [vmem:[#allocation4_spill] sm:$0xff] %v3482_v56  ;;  %v1731_v60 = vmul.f32 %v1667_v48, %v835_v36  ;;  %v929_v61 = vadd.f32 1.0, %v865_v50  ;;  %v3487_v62 = vpop.f32.mrb[11].mxu1  ;;  %v1697_v2 = vmul.f32 %v1633_v51, %v801_v37  ;;  %v897_v5 = vmul.f32 0.3275911, %v833_v54 }
  0xff   : > { %v3476_v52 = vpop.eup %2996  ;;  %4970 = vst [vmem:[#allocation5_spill] sm:$0xff] %v3487_v62  ;;  %3012 = vrcp.f32 %v963_v59  ;;  %v1665_v0 = vsub.f32 0.0, %v833_v54  ;;  %v3508_v48 = vmul.f32 0.70710677, %v3480_v55  ;;  %vm2018_vm1 = vcmp.lt.f32.partialorder %v3406_v42, 0.0 }
 0x100   : > { %v3484_v57 = vpop.eup %2998  ;;  %v1058_v58 = vmul.f32 1.0614054, %v3476_v52  ;;  %v1830_v22 = vmul.f32 1.442695, %v1731_v60  ;;  %3014 = vrcp.f32 %v929_v61  ;;  %v961_v23 = vadd.f32 1.0, %v897_v5 }
 0x101   : > { %v1090_v63 = vmul.f32 1.0614054, %v3484_v57  ;;  %v3494_v13 = vpop.eup %3000  ;;  %3016 = vpow2.f32 %v1824_v53  ;;  %v1762_v15 = vmul.f32 1.442695, %v1697_v2  ;;  %v1729_v45 = vmul.f32 %v1665_v0, %v833_v54 }
 0x102   : > { %v1122_v6 = vadd.f32 -1.4531521, %v1058_v58  ;;  %v3492_v12 = vpop.f32.mrb[12].mxu0  ;;  %v3498_v30 = vpop.eup %3002  ;;  %v1056_v36 = vmul.f32 1.0614054, %v3494_v13  ;;  %3018 = vpow2.f32 %v1766_v1  ;;  %v3516_v61 = vmul.f32 0.5, %v3444_v21 }
 0x103   : > { %4971 = vst [vmem:[#allocation6_spill] sm:$0xff] %v3492_v12  ;;  %v1154_v19 = vadd.f32 -1.4531521, %v1090_v63  ;;  %v3496_v29 = vpop.f32.mrb[12].mxu1  ;;  %v3502_v37 = vpop.f32.mrb[13].mxu0  ;;  %3020 = vrcp.f32 %v961_v23  ;;  %vm2050_vm2 = vcmp.lt.f32.partialorder %v3409_v46, 0.0 }
 0x104   : > { %4972 = vst [vmem:[#allocation7_spill] sm:$0xff] %v3496_v29  ;;  %v1186_v31 = vmul.f32 %v3476_v52, %v1122_v6  ;;  %4973 = vst [vmem:[#allocation8_spill] sm:$0xff] %v3502_v37  ;;  %v3504_v39 = vpop.eup %3004  ;;  %v1120_v58 = vadd.f32 -1.4531521, %v1056_v36  ;;  %3022 = vpow2.f32 %v1830_v22  ;;  %v806_v63 = vand.u32 2147483647, %v3508_v48 }
 0x105   : > { %v1218_v40 = vmul.f32 %v3484_v57, %v1154_v19  ;;  %v3510_v50 = vpop.eup %3006  ;;  %v1088_v59 = vmul.f32 1.0614054, %v3504_v39  ;;  %3024 = vpow2.f32 %v1762_v15  ;;  %v1826_v0 = vmul.f32 1.442695, %v1729_v45 }
 0x106   : > { %v1250_v51 = vadd.f32 1.4214138, %v1186_v31  ;;  %v3513_v53 = vpop.eup %3008  ;;  %v1184_v1 = vmul.f32 %v3494_v13, %v1120_v58  ;;  %v870_v19 = vmul.f32 0.3275911, %v806_v63  ;;  %v1638_v23 = vsub.f32 0.0, %v806_v63 }
 0x107   : > { %v1282_v60 = vadd.f32 1.4214138, %v1218_v40  ;;  %v1152_v2 = vadd.f32 -1.4531521, %v1088_v59  ;;  %v3521_v5 = vpop.eup %3010  ;;  %v3528_v58 = vadd.f32 %v3420_v3, %v3401_v33  ;;  %3026 = vpow2.f32 %v1826_v0 }
 0x108   : > { %v1314_v54 = vmul.f32 %v3476_v52, %v1250_v51  ;;  %v1248_v22 = vadd.f32 1.4214138, %v1184_v1  ;;  %v1059_v36 = vmul.f32 1.0614054, %v3521_v5  ;;  %v934_v37 = vadd.f32 1.0, %v870_v19 }
 0x109   : > { %v1346_v6 = vmul.f32 %v3484_v57, %v1282_v60  ;;  %v1216_v21 = vmul.f32 %v3504_v39, %v1152_v2  ;;  %v1702_v51 = vmul.f32 %v1638_v23, %v806_v63  ;;  %v3530_v15 = vpop.eup %3012  ;;  %vm2016_vm3 = vcmp.lt.f32.partialorder %v3411_v47, 0.0 }
 0x10a   : > { %v1378_v31 = vadd.f32 -0.28449672, %v1314_v54  ;;  %v1312_v45 = vmul.f32 %v3494_v13, %v1248_v22  ;;  %v1123_v54 = vadd.f32 -1.4531521, %v1059_v36  ;;  %v3534_v1 = vpop.eup %3014  ;;  %3028 = vrcp.f32 %v934_v37 }
 0x10b   : > { %v1410_v40 = vadd.f32 -0.28449672, %v1346_v6  ;;  %v1280_v60 = vadd.f32 1.4214138, %v1216_v21  ;;  %v1091_v6 = vmul.f32 1.0614054, %v3530_v15  ;;  %v3017_v19 = vpop.eup %3016 }
 0x10c   : > { %v1442_v59 = vmul.f32 %v3476_v52, %v1378_v31  ;;  %v3538_v63 = vmul.f32 1.442695, %v1702_v51  ;;  %v1376_v23 = vadd.f32 -0.28449672, %v1312_v45  ;;  %v1187_v31 = vmul.f32 %v3521_v5, %v1123_v54  ;;  %v3542_v12 = vpop.eup %3018 }
 0x10d   : > { %v1474_v2 = vmul.f32 %v3484_v57, %v1410_v40  ;;  %v1344_v29 = vmul.f32 %v3504_v39, %v1280_v60  ;;  %v1155_v21 = vadd.f32 -1.4531521, %v1091_v6  ;;  %v1057_v36 = vmul.f32 1.0614054, %v3534_v1  ;;  %v3546_v40 = vpop.eup %3020 }
 0x10e   : > { %v1506_v3 = vadd.f32 0.2548296, %v1442_v59  ;;  %v1440_v51 = vmul.f32 %v3494_v13, %v1376_v23  ;;  %v1251_v45 = vadd.f32 1.4214138, %v1187_v31  ;;  %v3551_v60 = vpop.eup %3022  ;;  %v1089_v62 = vmul.f32 1.0614054, %v3546_v40 }
 0x10f   : > { %v1538_v22 = vadd.f32 0.2548296, %v1474_v2  ;;  %v1408_v59 = vadd.f32 -0.28449672, %v1344_v29  ;;  %v1219_v2 = vmul.f32 %v3530_v15, %v1155_v21  ;;  %v1121_v6 = vadd.f32 -1.4531521, %v1057_v36  ;;  %v3556_v37 = vpop.eup %3024 }
 0x110   : > { %v1570_v0 = vmul.f32 %v3476_v52, %v1506_v3  ;;  %v1504_v52 = vadd.f32 0.2548296, %v1440_v51  ;;  %v1315_v23 = vmul.f32 %v3521_v5, %v1251_v45  ;;  %vm2048_vm5 = vcmp.lt.f32.partialorder %v3414_v49, 0.0 }
 0x111   : > { %v1602_v54 = vmul.f32 %v3484_v57, %v1538_v22  ;;  %v1472_v3 = vmul.f32 %v3504_v39, %v1408_v59  ;;  %v1283_v31 = vadd.f32 1.4214138, %v1219_v2  ;;  %v1185_v57 = vmul.f32 %v3534_v1, %v1121_v6  ;;  %v3568_v59 = vpop.f32.mrb[13].mxu1 }
 0x112   : > { %v1890_v56 = vmul.f32 %v3498_v30, %v1570_v0  ;;  %v1153_v22 = vadd.f32 -1.4531521, %v1089_v62  ;;  %v1568_v36 = vmul.f32 %v3494_v13, %v1504_v52  ;;  %v1379_v43 = vadd.f32 -0.28449672, %v1315_v23 }
 0x113   : > { %v1922_v29 = vmul.f32 %v3510_v50, %v1602_v54  ;;  %v1536_v44 = vadd.f32 0.2548296, %v1472_v3  ;;  %v1347_v0 = vmul.f32 %v3530_v15, %v1283_v31  ;;  %v1249_v51 = vadd.f32 1.4214138, %v1185_v57  ;;  %v3573_v54 = vpop.eup %3026 }
 0x114   : > { %v1954_v21 = vsub.f32 1.0, %v1890_v56  ;;  %v1217_v50 = vmul.f32 %v3546_v40, %v1153_v22  ;;  %v1888_v62 = vmul.f32 %v3513_v53, %v1568_v36  ;;  %v1443_v13 = vmul.f32 %v3521_v5, %v1379_v43  ;;  %v3578_v22 = vpop.eup %3028 }
 0x115   : > { %v1986_v30 = vsub.f32 1.0, %v1922_v29  ;;  %v1600_v56 = vmul.f32 %v3504_v39, %v1536_v44  ;;  %v1411_v6 = vadd.f32 -0.28449672, %v1347_v0  ;;  %v1313_v52 = vmul.f32 %v3534_v1, %v1249_v51 }
 0x116   : > { %v2082_v45 = vsub.f32 0.0, %v1954_v21  ;;  %v1281_v3 = vadd.f32 1.4214138, %v1217_v50  ;;  %v1952_v29 = vsub.f32 1.0, %v1888_v62  ;;  %v1507_v57 = vadd.f32 0.2548296, %v1443_v13 }
 0x117   : > { %v2114_v2 = vsub.f32 0.0, %v1986_v30  ;;  %v1920_v31 = vmul.f32 %v3017_v19, %v1600_v56  ;;  %vm2019_vm6 = vcmp.lt.f32.partialorder %v3432_v14, 0.0  ;;  %v1475_v44 = vmul.f32 %v3530_v15, %v1411_v6  ;;  %v3589_v62 = vpop.f32.mrb[14].mxu0 }
 0x118   : > { %v2146_v23 = vsel %vm2018_vm1, %v2082_v45, %v1954_v21  ;;  %v1377_v39 = vadd.f32 -0.28449672, %v1313_v52  ;;  %v2080_v0 = vsub.f32 0.0, %v1952_v29  ;;  %v1571_v42 = vmul.f32 %v3521_v5, %v1507_v57  ;;  %v3603_v57 = vpop.f32.mrb[14].mxu1 }
 0x119   : > { %v2210_v53 = vadd.f32 1.0, %v2146_v23  ;;  %v2178_v43 = vsel %vm2050_vm2, %v2114_v2, %v1986_v30  ;;  %v1984_v51 = vsub.f32 1.0, %v1920_v31  ;;  %v1539_v21 = vadd.f32 0.2548296, %v1475_v44 }
 0x11a   : > { %v2242_v36 = vadd.f32 1.0, %v2178_v43  ;;  %v1441_v50 = vmul.f32 %v3534_v1, %v1377_v39  ;;  %v1345_v45 = vmul.f32 %v3546_v40, %v1281_v3  ;;  %v2144_v5 = vsel %vm2016_vm3, %v2080_v0, %v1952_v29 }
 0x11b   : > { %v2274_v19 = vmul.f32 %v2210_v53, %v3428_v9  ;;  %v2112_v30 = vsub.f32 0.0, %v1984_v51  ;;  %v1891_v9 = vmul.f32 %v3542_v12, %v1571_v42  ;;  %v2208_v13 = vadd.f32 1.0, %v2144_v5 }
 0x11c   : > { %v2306_v46 = vmul.f32 %v2242_v36, %v3439_v18  ;;  %v1603_v2 = vmul.f32 %v3530_v15, %v1539_v21  ;;  %v1505_v6 = vadd.f32 0.2548296, %v1441_v50  ;;  %v1409_v31 = vadd.f32 -0.28449672, %v1345_v45 }
 0x11d   : > { %v2824_v56 = vpack.c.bf16 %v2274_v19, %v2274_v19  ;;  %v2176_v3 = vsel %vm2048_vm5, %v2112_v30, %v1984_v51  ;;  %v1955_v23 = vsub.f32 1.0, %v1891_v9  ;;  %v2272_v47 = vmul.f32 %v2208_v13, %v3441_v20 }
 0x11e   : > { %v2856_v52 = vpack.c.bf16 %v2306_v46, %v2306_v46  ;;  %v2240_v18 = vadd.f32 1.0, %v2176_v3  ;;  %v1923_v12 = vmul.f32 %v3551_v60, %v1603_v2  ;;  %v1569_v29 = vmul.f32 %v3534_v1, %v1505_v6  ;;  %v3635_v6 = vpop.f32.mrb[15].mxu0 }
 0x11f   : > { %2595 = vst.msk [vmem:[%s3594_s26 + $0x8] sm:$0xf] %vm2592_vm4, %v2824_v56  ;;  %v2083_v15 = vsub.f32 0.0, %v1955_v23  ;;  %v1473_v49 = vmul.f32 %v3546_v40, %v1409_v31  ;;  %v1062_v53 = vmul.f32 1.0614054, %v3578_v22  ;;  %v2822_v44 = vpack.c.bf16 %v2272_v47, %v2272_v47 }
 0x120   : > { %2627 = vst.msk [vmem:[%s3594_s26 + $0x88] sm:$0xf] %vm2592_vm4, %v2856_v52  ;;  %v3615_v43 = vmul.f32 0.70710677, %v3528_v58  ;;  %v2304_v39 = vmul.f32 %v2240_v18, %v3450_v25  ;;  %v1987_v20 = vsub.f32 1.0, %v1923_v12  ;;  %v1889_v36 = vmul.f32 %v3556_v37, %v1569_v29  ;;  %v3644_v18 = vpop.f32.mrb[15].mxu1 }
 0x121   : > { %v2147_v1 = vsel %vm2019_vm6, %v2083_v15, %v1955_v23  ;;  %v1537_v60 = vadd.f32 0.2548296, %v1473_v49  ;;  %v1126_v0 = vadd.f32 -1.4531521, %v1062_v53  ;;  %2593 = vst.msk [vmem:[%s3594_s26] sm:$0xf] %vm2592_vm4, %v2822_v44  ;;  %3030 = vpow2.f32 %v3538_v63 }
 0x122   : > { %v838_v51 = vand.u32 2147483647, %v3615_v43  ;;  %v2854_v42 = vpack.c.bf16 %v2304_v39, %v2304_v39  ;;  %v2211_v19 = vadd.f32 1.0, %v2147_v1  ;;  %v2115_v21 = vsub.f32 0.0, %v1987_v20 }
 0x123   : > { %v1953_v50 = vsub.f32 1.0, %v1889_v36  ;;  %vm2051_vm7 = vcmp.lt.f32.partialorder %v3452_v26, 0.0  ;;  %v1601_v25 = vmul.f32 %v3546_v40, %v1537_v60  ;;  %v1190_v45 = vmul.f32 %v3578_v22, %v1126_v0 }
 0x124   : > { %v902_v37 = vmul.f32 0.3275911, %v838_v51  ;;  %2625 = vst.msk [vmem:[%s3594_s26 + $0x80] sm:$0xf] %vm2592_vm4, %v2854_v42  ;;  %v2275_v14 = vmul.f32 %v2211_v19, %v3463_v35  ;;  %v2179_v46 = vsel %vm2051_vm7, %v2115_v21, %v1987_v20  ;;  %vm2017_vm8 = vcmp.lt.f32.partialorder %v3455_v27, 0.0 }
 0x125   : > { %v2081_v5 = vsub.f32 0.0, %v1953_v50  ;;  %v2243_v30 = vadd.f32 1.0, %v2179_v46  ;;  %v1921_v9 = vmul.f32 %v3573_v54, %v1601_v25  ;;  %v1254_v56 = vadd.f32 1.4214138, %v1190_v45 }
 0x126   : > { %v966_v13 = vadd.f32 1.0, %v902_v37  ;;  %v2825_v26 = vpack.c.bf16 %v2275_v14, %v2275_v14  ;;  %v434_v40 = vadd.f32 %v3401_v33, %v3422_v4  ;;  %v1670_v54 = vsub.f32 0.0, %v838_v51 }
 0x127   : > { %v2145_v2 = vsel %vm2017_vm8, %v2081_v5, %v1953_v50  ;;  %v2307_v35 = vmul.f32 %v2243_v30, %v3490_v10  ;;  %v1985_v27 = vsub.f32 1.0, %v1921_v9  ;;  %v1318_v3 = vmul.f32 %v3578_v22, %v1254_v56 }
 0x128   : > { %v2209_v52 = vadd.f32 1.0, %v2145_v2  ;;  %2596 = vst.msk [vmem:[%s3594_s26 + $0xc] sm:$0xf] %vm2592_vm4, %v2825_v26  ;;  %3032 = vrcp.f32 %v966_v13  ;;  %v3641_v23 = vmul.f32 0.70710677, %v434_v40  ;;  %vm2049_vm9 = vcmp.lt.f32.partialorder %v3470_v41, 0.0 }
 0x129   : > { %v2857_v31 = vpack.c.bf16 %v2307_v35, %v2307_v35  ;;  %v2113_v4 = vsub.f32 0.0, %v1985_v27  ;;  %v1382_v47 = vadd.f32 -0.28449672, %v1318_v3  ;;  %v562_v12 = vadd.f32 %v3401_v33, %v3424_v7  ;;  %v3688_v26 = vpop.f32.mrb[16].mxu0  ;;  %v3690_v2 = vpop.f32.mrb[16].mxu1 }
 0x12a   : > { %v2273_v63 = vmul.f32 %v2209_v52, %v3516_v61  ;;  %v804_v10 = vand.u32 2147483647, %v3641_v23  ;;  %v3655_v61 = vadd.f32 %v3426_v8, %v3401_v33  ;;  %v705_v53 = vmul.f32 0.5, %v3448_v24 }
 0x12b   : > { %2628 = vst.msk [vmem:[%s3594_s26 + $0x8c] sm:$0xf] %vm2592_vm4, %v2857_v31  ;;  %v2177_v15 = vsel %vm2049_vm9, %v2113_v4, %v1985_v27  ;;  %v1446_v49 = vmul.f32 %v3578_v22, %v1382_v47  ;;  %v1734_v20 = vmul.f32 %v1670_v54, %v838_v51  ;;  %v3660_v36 = vmul.f32 0.70710677, %v562_v12  ;;  %v3031_v19 = vpop.eup %3030 }
 0x12c   : > { %v2823_v29 = vpack.c.bf16 %v2273_v63, %v2273_v63  ;;  %v2241_v44 = vadd.f32 1.0, %v2177_v15  ;;  %v868_v39 = vmul.f32 0.3275911, %v804_v10  ;;  %v3663_v60 = vmul.f32 0.70710677, %v3655_v61 }
 0x12d   : > { %v1510_v41 = vadd.f32 0.2548296, %v1446_v49  ;;  %v3667_v8 = vadd.f32 %v3430_v11, %v3401_v33  ;;  %v678_v24 = vmul.f32 0.5, %v3480_v55  ;;  %v836_v42 = vand.u32 2147483647, %v3660_v36 }
 0x12e   : > { %2594 = vst.msk [vmem:[%s3594_s26 + $0x4] sm:$0xf] %vm2592_vm4, %v2823_v29  ;;  %v2305_v7 = vmul.f32 %v2241_v44, %v705_v53  ;;  %v932_v1 = vadd.f32 1.0, %v868_v39  ;;  %vm2022_vm10 = vcmp.lt.f32.partialorder %v3508_v48, 0.0  ;;  %v807_v21 = vand.u32 2147483647, %v3663_v60 }
 0x12f   : > { %v1574_v0 = vmul.f32 %v3578_v22, %v1510_v41  ;;  %v3675_v25 = vmul.f32 0.5, %v3528_v58  ;;  %v1636_v45 = vsub.f32 0.0, %v804_v10  ;;  %v900_v11 = vmul.f32 0.3275911, %v836_v42 }
 0x130   : > { %v2855_v51 = vpack.c.bf16 %v2305_v7, %v2305_v7  ;;  %3034 = vrcp.f32 %v932_v1  ;;  %v1836_v55 = vmul.f32 1.442695, %v1734_v20  ;;  %v871_v22 = vmul.f32 0.3275911, %v807_v21 }
 0x131   : > { %v1894_v50 = vmul.f32 %v3031_v19, %v1574_v0  ;;  %v3682_v14 = vmul.f32 0.70710677, %v3667_v8  ;;  %v3685_v30 = vmul.f32 0.5, %v434_v40  ;;  %v964_v9 = vadd.f32 1.0, %v900_v11 }
 0x132   : > { %v3677_v37 = vpop.eup %3032  ;;  %2626 = vst.msk [vmem:[%s3594_s26 + $0x84] sm:$0xf] %vm2592_vm4, %v2855_v51  ;;  %v1668_v56 = vsub.f32 0.0, %v836_v42  ;;  %v935_v58 = vadd.f32 1.0, %v871_v22  ;;  %v1700_v27 = vmul.f32 %v1636_v45, %v804_v10  ;;  %v1639_v3 = vsub.f32 0.0, %v807_v21  ;;  %v3723_v51 = vpop.f32.mrb[17].mxu0 }
 0x133   : > { %v1958_v46 = vsub.f32 1.0, %v1894_v50  ;;  %v1094_v5 = vmul.f32 1.0614054, %v3677_v37  ;;  %v839_v13 = vand.u32 2147483647, %v3682_v14  ;;  %3036 = vrcp.f32 %v964_v9 }
 0x134   : > { %3038 = vrcp.f32 %v935_v58  ;;  %v3697_v4 = vadd.f32 %v3401_v33, %v3435_v16  ;;  %v3699_v29 = vmul.f32 0.5, %v562_v12  ;;  %v1732_v15 = vmul.f32 %v1668_v56, %v836_v42 }
 0x135   : > { %v2086_v35 = vsub.f32 0.0, %v1958_v46  ;;  %v1158_v52 = vadd.f32 -1.4531521, %v1094_v5  ;;  %v903_v54 = vmul.f32 0.3275911, %v839_v13  ;;  %v1671_v31 = vsub.f32 0.0, %v839_v13 }
 0x136   : > { %3040 = vpow2.f32 %v1836_v55  ;;  %v1768_v53 = vmul.f32 1.442695, %v1700_v27  ;;  %v3702_v44 = vmul.f32 0.70710677, %v3697_v4  ;;  %v3706_v48 = vadd.f32 %v3401_v33, %v3437_v17 }
 0x137   : > { %v2150_v40 = vsel %vm2022_vm10, %v2086_v35, %v1958_v46  ;;  %v1222_v63 = vmul.f32 %v3677_v37, %v1158_v52  ;;  %v967_v10 = vadd.f32 1.0, %v903_v54  ;;  %v1703_v16 = vmul.f32 %v1639_v3, %v807_v21 }
 0x138   : > { %v2214_v47 = vadd.f32 1.0, %v2150_v40  ;;  %v1735_v20 = vmul.f32 %v1671_v31, %v839_v13  ;;  %v805_v1 = vand.u32 2147483647, %v3702_v44  ;;  %v3715_v0 = vadd.f32 %v3457_v28, %v3401_v33 }
 0x139   : > { %v1286_v49 = vadd.f32 1.4214138, %v1222_v63  ;;  %3042 = vrcp.f32 %v967_v10  ;;  %v1832_v17 = vmul.f32 1.442695, %v1732_v15  ;;  %v3718_v19 = vmul.f32 0.5, %v3655_v61 }
 0x13a   : > { %v3708_v39 = vpop.eup %3034  ;;  %v2278_v41 = vmul.f32 %v2214_v47, %v678_v24  ;;  %v3721_v24 = vmul.f32 0.70710677, %v3706_v48  ;;  %v869_v45 = vmul.f32 0.3275911, %v805_v1  ;;  %3044 = vpow2.f32 %v1768_v53  ;;  %v3743_v53 = vpop.f32.mrb[17].mxu1 }
 0x13b   : > { %v1350_v12 = vmul.f32 %v3677_v37, %v1286_v49  ;;  %v1060_v7 = vmul.f32 1.0614054, %v3708_v39  ;;  %v1774_v11 = vmul.f32 1.442695, %v1703_v16  ;;  %v1838_v55 = vmul.f32 1.442695, %v1735_v20 }
 0x13c   : > { %v2828_v42 = vpack.c.bf16 %v2278_v41, %v2278_v41  ;;  %v837_v28 = vand.u32 2147483647, %v3721_v24  ;;  %v933_v5 = vadd.f32 1.0, %v869_v45  ;;  %v3733_v9 = vmul.f32 0.70710677, %v3715_v0 }
 0x13d   : > { %v1414_v21 = vadd.f32 -0.28449672, %v1350_v12  ;;  %v1124_v50 = vadd.f32 -1.4531521, %v1060_v7  ;;  %v3728_v22 = vpop.eup %3036  ;;  %3046 = vpow2.f32 %v1832_v17  ;;  %v1637_v13 = vsub.f32 0.0, %v805_v1 }
 0x13e   : > { %2599 = vst.msk [vmem:[%s3594_s26 + $0x18] sm:$0xf] %vm2592_vm4, %v2828_v42  ;;  %v3735_v56 = vpop.eup %3038  ;;  %v1092_v58 = vmul.f32 1.0614054, %v3728_v22  ;;  %v901_v35 = vmul.f32 0.3275911, %v837_v28  ;;  %3048 = vrcp.f32 %v933_v5 }
 0x13f   : > { %v1478_v61 = vmul.f32 %v3677_v37, %v1414_v21  ;;  %v1188_v46 = vmul.f32 %v3708_v39, %v1124_v50  ;;  %v1063_v54 = vmul.f32 1.0614054, %v3735_v56  ;;  %vm2054_vm11 = vcmp.lt.f32.partialorder %v3615_v43, 0.0 }
 0x140   : > { %v3041_v52 = vpop.eup %3040  ;;  %v1156_v31 = vadd.f32 -1.4531521, %v1092_v58  ;;  %3050 = vpow2.f32 %v1774_v11  ;;  %v965_v40 = vadd.f32 1.0, %v901_v35  ;;  %v1669_v63 = vsub.f32 0.0, %v837_v28 }
 0x141   : > { %v1542_v27 = vadd.f32 0.2548296, %v1478_v61  ;;  %v1252_v3 = vadd.f32 1.4214138, %v1188_v46  ;;  %v1127_v10 = vadd.f32 -1.4531521, %v1063_v54  ;;  %3052 = vpow2.f32 %v1838_v55 }
 0x142   : > { %v810_v49 = vand.u32 2147483647, %v3733_v9  ;;  %v1220_v16 = vmul.f32 %v3728_v22, %v1156_v31  ;;  %v3749_v20 = vmul.f32 0.5, %v3667_v8  ;;  %v1701_v12 = vmul.f32 %v1637_v13, %v805_v1 }
 0x143   : > { %v1606_v47 = vmul.f32 %v3677_v37, %v1542_v27  ;;  %v1316_v15 = vmul.f32 %v3708_v39, %v1252_v3  ;;  %v3745_v41 = vpop.eup %3042  ;;  %v1191_v37 = vmul.f32 %v3735_v56, %v1127_v10  ;;  %3054 = vrcp.f32 %v965_v40 }
 0x144   : > { %v1095_v17 = vmul.f32 1.0614054, %v3745_v41  ;;  %v1284_v21 = vadd.f32 1.4214138, %v1220_v16  ;;  %v1733_v50 = vmul.f32 %v1669_v63, %v837_v28  ;;  %v874_v45 = vmul.f32 0.3275911, %v810_v49  ;;  %v3045_v58 = vpop.eup %3044 }
 0x145   : > { %v1926_v7 = vmul.f32 %v3041_v52, %v1606_v47  ;;  %v1380_v42 = vadd.f32 -0.28449672, %v1316_v15  ;;  %v1255_v46 = vadd.f32 1.4214138, %v1191_v37  ;;  %v1770_v55 = vmul.f32 1.442695, %v1701_v12 }
 0x146   : > { %v1159_v5 = vadd.f32 -1.4531521, %v1095_v17  ;;  %v1348_v8 = vmul.f32 %v3728_v22, %v1284_v21  ;;  %v938_v1 = vadd.f32 1.0, %v874_v45  ;;  %v3757_v13 = vadd.f32 %v3459_v32, %v3401_v33 }
 0x147   : > { %v1990_v11 = vsub.f32 1.0, %v1926_v7  ;;  %v1444_v61 = vmul.f32 %v3708_v39, %v1380_v42  ;;  %v1319_v27 = vmul.f32 %v3735_v56, %v1255_v46  ;;  %v3047_v3 = vpop.eup %3046  ;;  %vm2020_vm12 = vcmp.lt.f32.partialorder %v3641_v23, 0.0  ;;  %v3775_v46 = vpop.f32.mrb[18].mxu0 }
 0x148   : > { %v1223_v28 = vmul.f32 %v3745_v41, %v1159_v5  ;;  %v1412_v54 = vadd.f32 -0.28449672, %v1348_v8  ;;  %v1834_v31 = vmul.f32 1.442695, %v1733_v50  ;;  %3056 = vrcp.f32 %v938_v1  ;;  %v3762_v63 = vpop.eup %3048 }
 0x149   : > { %v2118_v35 = vsub.f32 0.0, %v1990_v11  ;;  %v1508_v52 = vadd.f32 0.2548296, %v1444_v61  ;;  %v1642_v40 = vsub.f32 0.0, %v810_v49  ;;  %v1383_v15 = vadd.f32 -0.28449672, %v1319_v27 }
 0x14a   : > { %v1287_v10 = vadd.f32 1.4214138, %v1223_v28  ;;  %v3051_v16 = vpop.eup %3050  ;;  %v1476_v7 = vmul.f32 %v3728_v22, %v1412_v54  ;;  %v1061_v42 = vmul.f32 1.0614054, %v3762_v63  ;;  %3058 = vpow2.f32 %v1770_v55 }
 0x14b   : > { %v2182_v47 = vsel %vm2054_vm11, %v2118_v35, %v1990_v11  ;;  %v1572_v32 = vmul.f32 %v3708_v39, %v1508_v52  ;;  %v1447_v17 = vmul.f32 %v3735_v56, %v1383_v15  ;;  %v3772_v50 = vmul.f32 0.70710677, %v3757_v13  ;;  %v3053_v43 = vpop.eup %3052 }
 0x14c   : > { %v2246_v12 = vadd.f32 1.0, %v2182_v47  ;;  %v1351_v21 = vmul.f32 %v3745_v41, %v1287_v10  ;;  %v1540_v45 = vadd.f32 0.2548296, %v1476_v7  ;;  %v1125_v11 = vadd.f32 -1.4531521, %v1061_v42 }
 0x14d   : > { %v1892_v37 = vmul.f32 %v3045_v58, %v1572_v32  ;;  %v1706_v61 = vmul.f32 %v1642_v40, %v810_v49  ;;  %vm2052_vm13 = vcmp.lt.f32.partialorder %v3660_v36, 0.0  ;;  %v1511_v58 = vadd.f32 0.2548296, %v1447_v17  ;;  %v3778_v55 = vpop.eup %3054 }
 0x14e   : > { %v2310_v39 = vmul.f32 %v2246_v12, %v3675_v25  ;;  %v1415_v8 = vadd.f32 -0.28449672, %v1351_v21  ;;  %3060 = vpow2.f32 %v1834_v31  ;;  %v1604_v35 = vmul.f32 %v3728_v22, %v1540_v45 }
 0x14f   : > { %v1956_v5 = vsub.f32 1.0, %v1892_v37  ;;  %vm2023_vm14 = vcmp.lt.f32.partialorder %v3663_v60, 0.0  ;;  %v1189_v25 = vmul.f32 %v3762_v63, %v1125_v11  ;;  %v3784_v49 = vand.u32 2147483647, %v3772_v50 }
 0x150   : > { %v2860_v1 = vpack.c.bf16 %v2310_v39, %v2310_v39  ;;  %v1575_v27 = vmul.f32 %v3735_v56, %v1511_v58  ;;  %v1479_v28 = vmul.f32 %v3745_v41, %v1415_v8  ;;  %v1093_v54 = vmul.f32 1.0614054, %v3778_v55 }
 0x151   : > { %v2084_v52 = vsub.f32 0.0, %v1956_v5  ;;  %v1924_v31 = vmul.f32 %v3047_v3, %v1604_v35  ;;  %v1253_v40 = vadd.f32 1.4214138, %v1189_v25  ;;  %v1780_v47 = vmul.f32 1.442695, %v1706_v61 }
 0x152   : > { %2631 = vst.msk [vmem:[%s3594_s26 + $0x98] sm:$0xf] %vm2592_vm4, %v2860_v1  ;;  %v906_v22 = vmul.f32 0.3275911, %v3784_v49  ;;  %v1895_v15 = vmul.f32 %v3051_v16, %v1575_v27  ;;  %v1543_v10 = vadd.f32 0.2548296, %v1479_v28  ;;  %v3794_v7 = vpop.eup %3056 }
 0x153   : > { %v2148_v32 = vsel %vm2020_vm12, %v2084_v52, %v1956_v5  ;;  %v1157_v12 = vadd.f32 -1.4531521, %v1093_v54  ;;  %v1988_v42 = vsub.f32 1.0, %v1924_v31  ;;  %v1317_v37 = vmul.f32 %v3762_v63, %v1253_v40  ;;  %v3808_v27 = vpop.f32.mrb[18].mxu1 }
 0x154   : > { %v2212_v56 = vadd.f32 1.0, %v2148_v32  ;;  %v970_v17 = vadd.f32 1.0, %v906_v22  ;;  %v1959_v21 = vsub.f32 1.0, %v1895_v15  ;;  %v1607_v3 = vmul.f32 %v3745_v41, %v1543_v10  ;;  %v3059_v11 = vpop.eup %3058 }
 0x155   : > { %v1221_v39 = vmul.f32 %v3778_v55, %v1157_v12  ;;  %v1066_v45 = vmul.f32 1.0614054, %v3794_v7  ;;  %v2116_v16 = vsub.f32 0.0, %v1988_v42  ;;  %v1381_v61 = vadd.f32 -0.28449672, %v1317_v37 }
 0x156   : > { %v2276_v23 = vmul.f32 %v2212_v56, %v3685_v30  ;;  %3062 = vrcp.f32 %v970_v17  ;;  %v2087_v5 = vsub.f32 0.0, %v1959_v21  ;;  %v1927_v58 = vmul.f32 %v3053_v43, %v1607_v3  ;;  %v3821_v56 = vpop.f32.mrb[19].mxu0 }
 0x157   : > { %v1285_v8 = vadd.f32 1.4214138, %v1221_v39  ;;  %v1130_v1 = vadd.f32 -1.4531521, %v1066_v45  ;;  %v2180_v25 = vsel %vm2052_vm13, %v2116_v16, %v1988_v42  ;;  %v1445_v41 = vmul.f32 %v3762_v63, %v1381_v61 }
 0x158   : > { %v2826_v35 = vpack.c.bf16 %v2276_v23, %v2276_v23  ;;  %v3806_v52 = vadd.f32 %v3401_v33, %v3461_v34  ;;  %v3061_v30 = vpop.eup %3060  ;;  %v2244_v28 = vadd.f32 1.0, %v2180_v25  ;;  %v2151_v54 = vsel %vm2023_vm14, %v2087_v5, %v1959_v21 }
 0x159   : > { %v1991_v43 = vsub.f32 1.0, %v1927_v58  ;;  %v1349_v31 = vmul.f32 %v3778_v55, %v1285_v8  ;;  %v2215_v36 = vadd.f32 1.0, %v2151_v54  ;;  %vm2055_vm15 = vcmp.lt.f32.partialorder %v3682_v14, 0.0 }
 0x15a   : > { %2597 = vst.msk [vmem:[%s3594_s26 + $0x10] sm:$0xf] %vm2592_vm4, %v2826_v35  ;;  %v1509_v40 = vadd.f32 0.2548296, %v1445_v41  ;;  %v1194_v22 = vmul.f32 %v3794_v7, %v1130_v1  ;;  %v2308_v33 = vmul.f32 %v2244_v28, %v3699_v29  ;;  %v1674_v15 = vsub.f32 0.0, %v3784_v49 }
 0x15b   : > { %v2119_v34 = vsub.f32 0.0, %v1991_v43  ;;  %v1413_v32 = vadd.f32 -0.28449672, %v1349_v31  ;;  %v2279_v60 = vmul.f32 %v2215_v36, %v3718_v19  ;;  %3064 = vpow2.f32 %v1780_v47 }
 0x15c   : > { %v1573_v10 = vmul.f32 %v3762_v63, %v1509_v40  ;;  %v1258_v12 = vadd.f32 1.4214138, %v1194_v22  ;;  %v2858_v14 = vpack.c.bf16 %v2308_v33, %v2308_v33  ;;  %v3825_v29 = vmul.f32 0.70710677, %v3806_v52 }
 0x15d   : > { %v2183_v42 = vsel %vm2055_vm15, %v2119_v34, %v1991_v43  ;;  %v1477_v37 = vmul.f32 %v3778_v55, %v1413_v32  ;;  %v2829_v17 = vpack.c.bf16 %v2279_v60, %v2279_v60  ;;  %v1738_v63 = vmul.f32 %v1674_v15, %v3784_v49  ;;  %v4974_v43 = vld [vmem:[#allocation2_spill] sm:$0xff] }
 0x15e   : > { %v2247_v21 = vadd.f32 1.0, %v2183_v42  ;;  %v1893_v3 = vmul.f32 %v3059_v11, %v1573_v10  ;;  %v1322_v39 = vmul.f32 %v3794_v7, %v1258_v12  ;;  %2629 = vst.msk [vmem:[%s3594_s26 + $0x90] sm:$0xf] %vm2592_vm4, %v2858_v14  ;;  %v808_v47 = vand.u32 2147483647, %v3825_v29 }
 0x15f   : > { %v1541_v19 = vadd.f32 0.2548296, %v1477_v37  ;;  %2600 = vst.msk [vmem:[%s3594_s26 + $0x1c] sm:$0xf] %vm2592_vm4, %v2829_v17  ;;  %v3840_v11 = vld [vmem:[%s4965_s2] ss:$0 sm:$0xff] }
 0x160   : > { %v3832_v45 = vpop.eup %3062  ;;  %v2311_v23 = vmul.f32 %v2247_v21, %v3749_v20  ;;  %v1957_v16 = vsub.f32 1.0, %v1893_v3  ;;  %v1386_v61 = vadd.f32 -0.28449672, %v1322_v39  ;;  %v3844_v5 = vadd.f32 %v3840_v11, %v3467_v38 }
 0x161   : > { %v677_v49 = vmul.f32 0.5, %v3697_v4  ;;  %v1605_v58 = vmul.f32 %v3778_v55, %v1541_v19  ;;  %v1098_v8 = vmul.f32 1.0614054, %v3832_v45  ;;  %v872_v1 = vmul.f32 0.3275911, %v808_v47 }
 0x162   : > { %v2861_v20 = vpack.c.bf16 %v2311_v23, %v2311_v23  ;;  %vm2021_vm0 = vcmp.lt.f32.partialorder %v3702_v44, 0.0  ;;  %v2085_v35 = vsub.f32 0.0, %v1957_v16  ;;  %v1450_v25 = vmul.f32 %v3794_v7, %v1386_v61 }
 0x163   : > { %v1925_v41 = vmul.f32 %v3061_v30, %v1605_v58  ;;  %v1162_v28 = vadd.f32 -1.4531521, %v1098_v8  ;;  %v936_v54 = vadd.f32 1.0, %v872_v1  ;;  %v3853_v38 = vadd.f32 %v3840_v11, %v4974_v43  ;;  %v3861_v30 = vpop.f32.mrb[19].mxu1  ;;  %v3875_v58 = vpop.f32.mrb[20].mxu0 }
 0x164   : > { %2632 = vst.msk [vmem:[%s3594_s26 + $0x9c] sm:$0xf] %vm2592_vm4, %v2861_v20  ;;  %v2149_v4 = vsel %vm2021_vm0, %v2085_v35, %v1957_v16  ;;  %v1514_v55 = vadd.f32 0.2548296, %v1450_v25  ;;  %v1844_v31 = vmul.f32 1.442695, %v1738_v63 }
 0x165   : > { %v3858_v36 = vmul.f32 0.70710677, %v3844_v5  ;;  %v2213_v40 = vadd.f32 1.0, %v2149_v4  ;;  %v1989_v44 = vsub.f32 1.0, %v1925_v41  ;;  %v1226_v22 = vmul.f32 %v3832_v45, %v1162_v28  ;;  %v3065_v33 = vpop.eup %3064 }
 0x166   : > { %3066 = vrcp.f32 %v936_v54  ;;  %vm2053_vm1 = vcmp.lt.f32.partialorder %v3721_v24, 0.0  ;;  %v1578_v34 = vmul.f32 %v3794_v7, %v1514_v55  ;;  %v3867_v12 = vmul.f32 0.70710677, %v3853_v38  ;;  %v4976_v54 = vld [vmem:[#allocation4_spill] sm:$0xff] }
 0x167   : > { %v840_v32 = vand.u32 2147483647, %v3858_v36  ;;  %v2277_v15 = vmul.f32 %v2213_v40, %v677_v49  ;;  %v2117_v60 = vsub.f32 0.0, %v1989_v44  ;;  %v1290_v10 = vadd.f32 1.4214138, %v1226_v22 }
 0x168   : > { %v1898_v14 = vmul.f32 %v3065_v33, %v1578_v34  ;;  %3068 = vpow2.f32 %v1844_v31  ;;  %v1640_v42 = vsub.f32 0.0, %v808_v47  ;;  %v811_v24 = vand.u32 2147483647, %v3867_v12 }
 0x169   : > { %v904_v37 = vmul.f32 0.3275911, %v840_v32  ;;  %v2827_v17 = vpack.c.bf16 %v2277_v15, %v2277_v15  ;;  %v2181_v21 = vsel %vm2053_vm1, %v2117_v60, %v1989_v44  ;;  %v1354_v3 = vmul.f32 %v3832_v45, %v1290_v10 }
 0x16a   : > { %v709_v7 = vmul.f32 0.5, %v3706_v48  ;;  %v2245_v39 = vadd.f32 1.0, %v2181_v21  ;;  %v1962_v19 = vsub.f32 1.0, %v1898_v14  ;;  %v875_v16 = vmul.f32 0.3275911, %v811_v24  ;;  %v4975_v48 = vld [vmem:[#allocation3_spill] sm:$0xff] }
 0x16b   : > { %v968_v63 = vadd.f32 1.0, %v904_v37  ;;  %2598 = vst.msk [vmem:[%s3594_s26 + $0x14] sm:$0xf] %vm2592_vm4, %v2827_v17  ;;  %v1418_v23 = vadd.f32 -0.28449672, %v1354_v3  ;;  %vm2026_vm2 = vcmp.lt.f32.partialorder %v3733_v9, 0.0  ;;  %v1704_v1 = vmul.f32 %v1640_v42, %v808_v47 }
 0x16c   : > { %v2309_v61 = vmul.f32 %v2245_v39, %v709_v7  ;;  %v2090_v49 = vsub.f32 0.0, %v1962_v19  ;;  %v939_v20 = vadd.f32 1.0, %v875_v16  ;;  %v3880_v35 = vadd.f32 %v3840_v11, %v4975_v48  ;;  %v3889_v47 = vpop.f32.mrb[20].mxu1  ;;  %v4977_v42 = vld [vmem:[#allocation5_spill] sm:$0xff] }
 0x16d   : > { %3070 = vrcp.f32 %v968_v63  ;;  %v1482_v8 = vmul.f32 %v3832_v45, %v1418_v23  ;;  %v1672_v28 = vsub.f32 0.0, %v840_v32  ;;  %v3884_v43 = vadd.f32 %v3840_v11, %v4976_v54 }
 0x16e   : > { %v2859_v25 = vpack.c.bf16 %v2309_v61, %v2309_v61  ;;  %v2154_v41 = vsel %vm2026_vm2, %v2090_v49, %v1962_v19  ;;  %v682_v4 = vmul.f32 0.5, %v3715_v0  ;;  %3072 = vrcp.f32 %v939_v20 }
 0x16f   : > { %v2218_v55 = vadd.f32 1.0, %v2154_v41  ;;  %v1546_v31 = vadd.f32 0.2548296, %v1482_v8  ;;  %v714_v40 = vmul.f32 0.5, %v3757_v13  ;;  %vm2058_vm3 = vcmp.lt.f32.partialorder %v3772_v50, 0.0  ;;  %v3927_v41 = vpop.f32.mrb[21].mxu0 }
 0x170   : > { %v3886_v9 = vpop.eup %3066  ;;  %2630 = vst.msk [vmem:[%s3594_s26 + $0x94] sm:$0xf] %vm2592_vm4, %v2859_v25  ;;  %v3897_v22 = vmul.f32 0.70710677, %v3880_v35  ;;  %v1776_v0 = vmul.f32 1.442695, %v1704_v1  ;;  %v1736_v14 = vmul.f32 %v1672_v28, %v840_v32  ;;  %v3906_v37 = vadd.f32 %v3840_v11, %v4977_v42 }
 0x171   : > { %v1064_v44 = vmul.f32 1.0614054, %v3886_v9  ;;  %v2282_v33 = vmul.f32 %v2218_v55, %v682_v4  ;;  %v1610_v34 = vmul.f32 %v3832_v45, %v1546_v31  ;;  %v3901_v15 = vmul.f32 0.70710677, %v3884_v43 }
 0x172   : > { %v3069_v60 = vpop.eup %3068  ;;  %v843_v13 = vand.u32 2147483647, %v3897_v22  ;;  %v1643_v3 = vsub.f32 0.0, %v811_v24  ;;  %v3910_v45 = vmul.f32 0.5, %v3806_v52  ;;  %v3914_v19 = vmul.f32 0.5, %v3844_v5 }
 0x173   : > { %v1128_v10 = vadd.f32 -1.4531521, %v1064_v44  ;;  %v2832_v17 = vpack.c.bf16 %v2282_v33, %v2282_v33  ;;  %v1930_v21 = vmul.f32 %v3069_v60, %v1610_v34  ;;  %v809_v7 = vand.u32 2147483647, %v3901_v15  ;;  %v3935_v33 = vpop.f32.mrb[21].mxu1  ;;  %v4978_v60 = vld [vmem:[#allocation6_spill] sm:$0xff] }
 0x174   : > { %v907_v32 = vmul.f32 0.3275911, %v843_v13  ;;  %v3919_v23 = vmul.f32 0.5, %v3853_v38  ;;  %v3922_v61 = vmul.f32 0.70710677, %v3906_v37  ;;  %3074 = vpow2.f32 %v1776_v0 }
 0x175   : > { %v1192_v39 = vmul.f32 %v3886_v9, %v1128_v10  ;;  %2603 = vst.msk [vmem:[%s3594_s26 + $0x28] sm:$0xf] %vm2592_vm4, %v2832_v17  ;;  %v1994_v63 = vsub.f32 1.0, %v1930_v21  ;;  %v873_v16 = vmul.f32 0.3275911, %v809_v7  ;;  %v1707_v48 = vmul.f32 %v1643_v3, %v811_v24 }
 0x176   : > { %v1840_v8 = vmul.f32 1.442695, %v1736_v14  ;;  %v971_v1 = vadd.f32 1.0, %v907_v32  ;;  %v1675_v28 = vsub.f32 0.0, %v843_v13  ;;  %v841_v54 = vand.u32 2147483647, %v3922_v61 }
 0x177   : > { %v3924_v49 = vpop.eup %3070  ;;  %v1256_v52 = vadd.f32 1.4214138, %v1192_v39  ;;  %v2122_v20 = vsub.f32 0.0, %v1994_v63  ;;  %v937_v25 = vadd.f32 1.0, %v873_v16  ;;  %v1641_v44 = vsub.f32 0.0, %v809_v7 }
 0x178   : > { %v1096_v5 = vmul.f32 1.0614054, %v3924_v49  ;;  %3076 = vrcp.f32 %v971_v1  ;;  %v3931_v4 = vpop.eup %3072  ;;  %v3940_v10 = vadd.f32 %v3840_v11, %v4978_v60  ;;  %v1782_v42 = vmul.f32 1.442695, %v1707_v48 }
 0x179   : > { %v1320_v38 = vmul.f32 %v3886_v9, %v1256_v52  ;;  %v2186_v55 = vsel %vm2058_vm3, %v2122_v20, %v1994_v63  ;;  %3078 = vrcp.f32 %v937_v25  ;;  %v1067_v0 = vmul.f32 1.0614054, %v3931_v4 }
 0x17a   : > { %v1160_v31 = vadd.f32 -1.4531521, %v1096_v5  ;;  %v2250_v24 = vadd.f32 1.0, %v2186_v55  ;;  %3080 = vpow2.f32 %v1840_v8  ;;  %v905_v17 = vmul.f32 0.3275911, %v841_v54 }
 0x17b   : > { %v1384_v34 = vadd.f32 -0.28449672, %v1320_v38  ;;  %v1131_v3 = vadd.f32 -1.4531521, %v1067_v0  ;;  %v1739_v39 = vmul.f32 %v1675_v28, %v843_v13  ;;  %v1705_v63 = vmul.f32 %v1641_v44, %v809_v7  ;;  %v4979_v13 = vld [vmem:[#allocation7_spill] sm:$0xff] }
 0x17c   : > { %v1224_v14 = vmul.f32 %v3924_v49, %v1160_v31  ;;  %v2314_v50 = vmul.f32 %v2250_v24, %v714_v40  ;;  %v969_v16 = vadd.f32 1.0, %v905_v17  ;;  %v1673_v52 = vsub.f32 0.0, %v841_v54 }
 0x17d   : > { %v1448_v21 = vmul.f32 %v3886_v9, %v1384_v34  ;;  %v1195_v5 = vmul.f32 %v3931_v4, %v1131_v3  ;;  %v3946_v25 = vmul.f32 0.70710677, %v3940_v10  ;;  %vm2024_vm5 = vcmp.lt.f32.partialorder %v3825_v29, 0.0 }
 0x17e   : > { %v1288_v32 = vadd.f32 1.4214138, %v1224_v14  ;;  %v2864_v1 = vpack.c.bf16 %v2314_v50, %v2314_v50  ;;  %v3951_v8 = vmul.f32 0.5, %v3880_v35  ;;  %3082 = vrcp.f32 %v969_v16  ;;  %v3075_v48 = vpop.eup %3074 }
 0x17f   : > { %v1512_v20 = vadd.f32 0.2548296, %v1448_v21  ;;  %v3955_v7 = vadd.f32 %v3840_v11, %v4979_v13  ;;  %v1259_v28 = vadd.f32 1.4214138, %v1195_v5  ;;  %v1846_v55 = vmul.f32 1.442695, %v1739_v39 }
 0x180   : > { %v1352_v40 = vmul.f32 %v3924_v49, %v1288_v32  ;;  %2635 = vst.msk [vmem:[%s3594_s26 + $0xa8] sm:$0xf] %vm2592_vm4, %v2864_v1  ;;  %v814_v31 = vand.u32 2147483647, %v3946_v25  ;;  %3084 = vpow2.f32 %v1782_v42  ;;  %v1778_v24 = vmul.f32 1.442695, %v1705_v63 }
 0x181   : > { %v1576_v38 = vmul.f32 %v3886_v9, %v1512_v20  ;;  %v3962_v35 = vmul.f32 0.70710677, %v3955_v7  ;;  %v1323_v60 = vmul.f32 %v3931_v4, %v1259_v28  ;;  %v1737_v14 = vmul.f32 %v1673_v52, %v841_v54 }
 0x182   : > { %v1416_v44 = vadd.f32 -0.28449672, %v1352_v40  ;;  %v3964_v34 = vpop.eup %3076  ;;  %v878_v17 = vmul.f32 0.3275911, %v814_v31  ;;  %v1646_v3 = vsub.f32 0.0, %v814_v31  ;;  %3086 = vpow2.f32 %v1846_v55 }
 0x183   : > { %v1896_v0 = vmul.f32 %v3075_v48, %v1576_v38  ;;  %v3967_v50 = vpop.eup %3078  ;;  %v1099_v21 = vmul.f32 1.0614054, %v3964_v34  ;;  %v846_v42 = vand.u32 2147483647, %v3962_v35  ;;  %v1387_v32 = vadd.f32 -0.28449672, %v1323_v60 }
 0x184   : > { %v1480_v9 = vmul.f32 %v3924_v49, %v1416_v44  ;;  %v1065_v63 = vmul.f32 1.0614054, %v3967_v50  ;;  %v942_v16 = vadd.f32 1.0, %v878_v17  ;;  %v3081_v1 = vpop.eup %3080  ;;  %vm2056_vm6 = vcmp.lt.f32.partialorder %v3858_v36, 0.0  ;;  %v3975_v48 = vpop.f32.mrb[22].mxu0 }
 0x185   : > { %v1960_v39 = vsub.f32 1.0, %v1896_v0  ;;  %v1163_v5 = vadd.f32 -1.4531521, %v1099_v21  ;;  %v910_v54 = vmul.f32 0.3275911, %v846_v42  ;;  %v1451_v40 = vmul.f32 %v3931_v4, %v1387_v32 }
 0x186   : > { %v1544_v20 = vadd.f32 0.2548296, %v1480_v9  ;;  %v1129_v13 = vadd.f32 -1.4531521, %v1065_v63  ;;  %3088 = vrcp.f32 %v942_v16  ;;  %v1842_v17 = vmul.f32 1.442695, %v1737_v14 }
 0x187   : > { %v2088_v52 = vsub.f32 0.0, %v1960_v39  ;;  %v1227_v28 = vmul.f32 %v3964_v34, %v1163_v5  ;;  %3090 = vpow2.f32 %v1778_v24  ;;  %v974_v44 = vadd.f32 1.0, %v910_v54 }
 0x188   : > { %v1608_v38 = vmul.f32 %v3924_v49, %v1544_v20  ;;  %v1515_v55 = vadd.f32 0.2548296, %v1451_v40  ;;  %v1193_v60 = vmul.f32 %v3967_v50, %v1129_v13  ;;  %v3982_v9 = vpop.eup %3082  ;;  %vm2027_vm7 = vcmp.lt.f32.partialorder %v3867_v12, 0.0  ;;  %v4980_v13 = vld [vmem:[#allocation8_spill] sm:$0xff] }
 0x189   : > { %v2152_v0 = vsel %vm2024_vm5, %v2088_v52, %v1960_v39  ;;  %v1291_v63 = vadd.f32 1.4214138, %v1227_v28  ;;  %v1710_v16 = vmul.f32 %v1646_v3, %v814_v31  ;;  %v1097_v24 = vmul.f32 1.0614054, %v3982_v9 }
 0x18a   : > { %v2216_v21 = vadd.f32 1.0, %v2152_v0  ;;  %v1928_v32 = vmul.f32 %v3081_v1, %v1608_v38  ;;  %v1579_v49 = vmul.f32 %v3931_v4, %v1515_v55  ;;  %v1257_v20 = vadd.f32 1.4214138, %v1193_v60  ;;  %v3085_v29 = vpop.eup %3084 }
 0x18b   : > { %3092 = vrcp.f32 %v974_v44  ;;  %v1355_v14 = vmul.f32 %v3964_v34, %v1291_v63  ;;  %v1678_v54 = vsub.f32 0.0, %v846_v42  ;;  %v1161_v40 = vadd.f32 -1.4531521, %v1097_v24  ;;  %v3994_v44 = vpop.f32.mrb[22].mxu1 }
 0x18c   : > { %v2280_v39 = vmul.f32 %v2216_v21, %v3910_v45  ;;  %v1992_v5 = vsub.f32 1.0, %v1928_v32  ;;  %v1899_v52 = vmul.f32 %v3085_v29, %v1579_v49  ;;  %v1321_v1 = vmul.f32 %v3967_v50, %v1257_v20  ;;  %v3087_v60 = vpop.eup %3086 }
 0x18d   : > { %v3992_v31 = vadd.f32 %v3840_v11, %v4980_v13  ;;  %v1419_v38 = vadd.f32 -0.28449672, %v1355_v14  ;;  %v1788_v28 = vmul.f32 1.442695, %v1710_v16  ;;  %v1225_v55 = vmul.f32 %v3982_v9, %v1161_v40 }
 0x18e   : > { %v2830_v4 = vpack.c.bf16 %v2280_v39, %v2280_v39  ;;  %v2120_v3 = vsub.f32 0.0, %v1992_v5  ;;  %v1963_v45 = vsub.f32 1.0, %v1899_v52  ;;  %v1385_v0 = vadd.f32 -0.28449672, %v1321_v1 }
 0x18f   : > { %3094 = vpow2.f32 %v1842_v17  ;;  %v1483_v32 = vmul.f32 %v3964_v34, %v1419_v38  ;;  %v1742_v63 = vmul.f32 %v1678_v54, %v846_v42  ;;  %v4003_v49 = vmul.f32 0.70710677, %v3992_v31 }
 0x190   : > { %2601 = vst.msk [vmem:[%s3594_s26 + $0x20] sm:$0xf] %vm2592_vm4, %v2830_v4  ;;  %v2184_v21 = vsel %vm2056_vm6, %v2120_v3, %v1992_v5  ;;  %v4005_v16 = vpop.eup %3088  ;;  %v2091_v24 = vsub.f32 0.0, %v1963_v45  ;;  %v1449_v29 = vmul.f32 %v3967_v50, %v1385_v0  ;;  %v1289_v39 = vadd.f32 1.4214138, %v1225_v55 }
 0x191   : > { %v2248_v20 = vadd.f32 1.0, %v2184_v21  ;;  %v3091_v17 = vpop.eup %3090  ;;  %v1547_v14 = vadd.f32 0.2548296, %v1483_v32  ;;  %v1070_v52 = vmul.f32 1.0614054, %v4005_v16  ;;  %3096 = vpow2.f32 %v1788_v28 }
 0x192   : > { %v4010_v36 = vand.u32 2147483647, %v4003_v49  ;;  %v2155_v5 = vsel %vm2027_vm7, %v2091_v24, %v1963_v45  ;;  %v1513_v54 = vadd.f32 0.2548296, %v1449_v29  ;;  %v1353_v1 = vmul.f32 %v3982_v9, %v1289_v39 }
 0x193   : > { %v2312_v42 = vmul.f32 %v2248_v20, %v3914_v19  ;;  %v2219_v40 = vadd.f32 1.0, %v2155_v5  ;;  %v1611_v13 = vmul.f32 %v3964_v34, %v1547_v14  ;;  %v1134_v4 = vadd.f32 -1.4531521, %v1070_v52 }
 0x194   : > { %v876_v3 = vmul.f32 0.3275911, %v4010_v36  ;;  %v1577_v0 = vmul.f32 %v3967_v50, %v1513_v54  ;;  %v1417_v55 = vadd.f32 -0.28449672, %v1353_v1  ;;  %v1852_v19 = vmul.f32 1.442695, %v1742_v63 }
 0x195   : > { %v4018_v38 = vpop.eup %3092  ;;  %v2862_v28 = vpack.c.bf16 %v2312_v42, %v2312_v42  ;;  %v2283_v12 = vmul.f32 %v2219_v40, %v3919_v23  ;;  %v1931_v45 = vmul.f32 %v3087_v60, %v1611_v13  ;;  %v1198_v21 = vmul.f32 %v4005_v16, %v1134_v4  ;;  %v4031_v50 = vpop.f32.mrb[23].mxu0 }
 0x196   : > { %v1102_v32 = vmul.f32 1.0614054, %v4018_v38  ;;  %v1897_v34 = vmul.f32 %v3091_v17, %v1577_v0  ;;  %v1481_v20 = vmul.f32 %v3982_v9, %v1417_v55  ;;  %v940_v24 = vadd.f32 1.0, %v876_v3 }
 0x197   : > { %2633 = vst.msk [vmem:[%s3594_s26 + $0xa0] sm:$0xf] %vm2592_vm4, %v2862_v28  ;;  %v4029_v29 = vadd.f32 %v3840_v11, %v3568_v59  ;;  %v2833_v63 = vpack.c.bf16 %v2283_v12, %v2283_v12  ;;  %v1995_v23 = vsub.f32 1.0, %v1931_v45  ;;  %v1262_v60 = vadd.f32 1.4214138, %v1198_v21  ;;  %v4053_v21 = vpop.f32.mrb[23].mxu1 }
 0x198   : > { %v1166_v39 = vadd.f32 -1.4531521, %v1102_v32  ;;  %v681_v52 = vmul.f32 0.5, %v3884_v43  ;;  %v1961_v42 = vsub.f32 1.0, %v1897_v34  ;;  %v1545_v5 = vadd.f32 0.2548296, %v1481_v20 }
 0x199   : > { %v3095_v14 = vpop.eup %3094  ;;  %3098 = vrcp.f32 %v940_v24  ;;  %2604 = vst.msk [vmem:[%s3594_s26 + $0x2c] sm:$0xf] %vm2592_vm4, %v2833_v63  ;;  %vm2059_vm8 = vcmp.lt.f32.partialorder %v3897_v22, 0.0  ;;  %v2123_v17 = vsub.f32 0.0, %v1995_v23  ;;  %v1326_v59 = vmul.f32 %v4005_v16, %v1262_v60 }
 0x19a   : > { %v1230_v54 = vmul.f32 %v4018_v38, %v1166_v39  ;;  %vm2025_vm9 = vcmp.lt.f32.partialorder %v3901_v15, 0.0  ;;  %v2089_v1 = vsub.f32 0.0, %v1961_v42  ;;  %v1609_v40 = vmul.f32 %v3982_v9, %v1545_v5 }
 0x19b   : > { %3100 = vpow2.f32 %v1852_v19  ;;  %v3097_v13 = vpop.eup %3096  ;;  %v2187_v43 = vsel %vm2059_vm8, %v2123_v17, %v1995_v23  ;;  %v1390_v4 = vadd.f32 -0.28449672, %v1326_v59  ;;  %v4042_v28 = vmul.f32 0.70710677, %v4029_v29 }
 0x19c   : > { %v1294_v3 = vadd.f32 1.4214138, %v1230_v54  ;;  %v2251_v0 = vadd.f32 1.0, %v2187_v43  ;;  %v2153_v22 = vsel %vm2025_vm9, %v2089_v1, %v1961_v42  ;;  %v1929_v55 = vmul.f32 %v3095_v14, %v1609_v40 }
 0x19d   : > { %v4046_v12 = vadd.f32 %v3840_v11, %v3589_v62  ;;  %v2217_v45 = vadd.f32 1.0, %v2153_v22  ;;  %v1454_v15 = vmul.f32 %v4005_v16, %v1390_v4  ;;  %v4051_v19 = vand.u32 2147483647, %v4042_v28 }
 0x19e   : > { %v1358_v9 = vmul.f32 %v4018_v38, %v1294_v3  ;;  %v2315_v32 = vmul.f32 %v2251_v0, %v3951_v8  ;;  %v1993_v34 = vsub.f32 1.0, %v1929_v55  ;;  %v1644_v20 = vsub.f32 0.0, %v4010_v36 }
 0x19f   : > { %v2281_v24 = vmul.f32 %v2217_v45, %v681_v52  ;;  %v1518_v63 = vadd.f32 0.2548296, %v1454_v15  ;;  %v908_v23 = vmul.f32 0.3275911, %v4051_v19  ;;  %vm2057_vm10 = vcmp.lt.f32.partialorder %v3922_v61, 0.0 }
 0x1a0   : > { %v1422_v62 = vadd.f32 -0.28449672, %v1358_v9  ;;  %v2865_v60 = vpack.c.bf16 %v2315_v32, %v2315_v32  ;;  %v2121_v39 = vsub.f32 0.0, %v1993_v34  ;;  %v4060_v14 = vmul.f32 0.70710677, %v4046_v12 }
 0x1a1   : > { %v2831_v42 = vpack.c.bf16 %v2281_v24, %v2281_v24  ;;  %v1582_v8 = vmul.f32 %v4005_v16, %v1518_v63  ;;  %v972_v17 = vadd.f32 1.0, %v908_v23  ;;  %v713_v52 = vmul.f32 0.5, %v3906_v37 }
 0x1a2   : > { %v1486_v5 = vmul.f32 %v4018_v38, %v1422_v62  ;;  %2636 = vst.msk [vmem:[%s3594_s26 + $0xac] sm:$0xf] %vm2592_vm4, %v2865_v60  ;;  %v2185_v54 = vsel %vm2057_vm10, %v2121_v39, %v1993_v34  ;;  %v1708_v1 = vmul.f32 %v1644_v20, %v4010_v36  ;;  %v815_v61 = vand.u32 2147483647, %v4060_v14  ;;  %v4091_v60 = vpop.f32.mrb[24].mxu0  ;;  %v4093_v39 = vpop.f32.mrb[24].mxu1 }
 0x1a3   : > { %v4064_v59 = vpop.eup %3098  ;;  %2602 = vst.msk [vmem:[%s3594_s26 + $0x24] sm:$0xf] %vm2592_vm4, %v2831_v42  ;;  %v2249_v40 = vadd.f32 1.0, %v2185_v54  ;;  %v1902_v43 = vmul.f32 %v3097_v13, %v1582_v8  ;;  %3102 = vrcp.f32 %v972_v17  ;;  %v4077_v9 = vadd.f32 %v3840_v11, %v3603_v57 }
 0x1a4   : > { %v1550_v4 = vadd.f32 0.2548296, %v1486_v5  ;;  %v1068_v16 = vmul.f32 1.0614054, %v4064_v59  ;;  %v879_v0 = vmul.f32 0.3275911, %v815_v61  ;;  %v4089_v57 = vadd.f32 %v3840_v11, %v3635_v6 }
 0x1a5   : > { %v3101_v3 = vpop.eup %3100  ;;  %v2313_v22 = vmul.f32 %v2249_v40, %v713_v52  ;;  %v1966_v55 = vsub.f32 1.0, %v1902_v43  ;;  %v1784_v15 = vmul.f32 1.442695, %v1708_v1  ;;  %vm2030_vm11 = vcmp.lt.f32.partialorder %v3946_v25, 0.0 }
 0x1a6   : > { %v1614_v37 = vmul.f32 %v4018_v38, %v1550_v4  ;;  %v1132_v45 = vadd.f32 -1.4531521, %v1068_v16  ;;  %v943_v36 = vadd.f32 1.0, %v879_v0  ;;  %v1676_v24 = vsub.f32 0.0, %v4051_v19 }
 0x1a7   : > { %v2863_v32 = vpack.c.bf16 %v2313_v22, %v2313_v22  ;;  %v2094_v13 = vsub.f32 0.0, %v1966_v55  ;;  %v4083_v63 = vmul.f32 0.70710677, %v4077_v9  ;;  %v686_v25 = vmul.f32 0.5, %v3940_v10 }
 0x1a8   : > { %v1934_v34 = vmul.f32 %v3101_v3, %v1614_v37  ;;  %v1196_v20 = vmul.f32 %v4064_v59, %v1132_v45  ;;  %3104 = vrcp.f32 %v943_v36  ;;  %v718_v5 = vmul.f32 0.5, %v3955_v7 }
 0x1a9   : > { %2634 = vst.msk [vmem:[%s3594_s26 + $0xa4] sm:$0xf] %vm2592_vm4, %v2863_v32  ;;  %v2158_v38 = vsel %vm2030_vm11, %v2094_v13, %v1966_v55  ;;  %3106 = vpow2.f32 %v1784_v15  ;;  %v847_v8 = vand.u32 2147483647, %v4083_v63  ;;  %v4100_v54 = vmul.f32 0.70710677, %v4089_v57 }
 0x1aa   : > { %v1998_v62 = vsub.f32 1.0, %v1934_v34  ;;  %v1260_v23 = vadd.f32 1.4214138, %v1196_v20  ;;  %v2222_v42 = vadd.f32 1.0, %v2158_v38  ;;  %vm2062_vm12 = vcmp.lt.f32.partialorder %v3962_v35, 0.0  ;;  %v4113_v35 = vpop.f32.mrb[25].mxu0 }
 0x1ab   : > { %v1647_v1 = vsub.f32 0.0, %v815_v61  ;;  %v911_v40 = vmul.f32 0.3275911, %v847_v8  ;;  %v1740_v4 = vmul.f32 %v1676_v24, %v4051_v19  ;;  %v4105_v16 = vand.u32 2147483647, %v4100_v54 }
 0x1ac   : > { %v2126_v17 = vsub.f32 0.0, %v1998_v62  ;;  %v1324_v52 = vmul.f32 %v4064_v59, %v1260_v23  ;;  %v2286_v6 = vmul.f32 %v2222_v42, %v686_v25  ;;  %v4111_v55 = vadd.f32 %v3840_v11, %v3644_v18 }
 0x1ad   : > { %v4107_v7 = vpop.eup %3102  ;;  %v975_v22 = vadd.f32 1.0, %v911_v40  ;;  %v877_v19 = vmul.f32 0.3275911, %v4105_v16  ;;  %v1711_v36 = vmul.f32 %v1647_v1, %v815_v61  ;;  %v684_v32 = vmul.f32 0.5, %v3992_v31 }
 0x1ae   : > { %v2190_v43 = vsel %vm2062_vm12, %v2126_v17, %v1998_v62  ;;  %v1388_v10 = vadd.f32 -0.28449672, %v1324_v52  ;;  %v2836_v3 = vpack.c.bf16 %v2286_v6, %v2286_v6  ;;  %v1100_v45 = vmul.f32 1.0614054, %v4107_v7 }
 0x1af   : > { %v2254_v0 = vadd.f32 1.0, %v2190_v43  ;;  %3108 = vrcp.f32 %v975_v22  ;;  %v941_v18 = vadd.f32 1.0, %v877_v19  ;;  %vm2028_vm13 = vcmp.lt.f32.partialorder %v4003_v49, 0.0 }
 0x1b0   : > { %v1452_v37 = vmul.f32 %v4064_v59, %v1388_v10  ;;  %2607 = vst.msk [vmem:[%s3594_s26 + $0x38] sm:$0xf] %vm2592_vm4, %v2836_v3  ;;  %v1164_v34 = vadd.f32 -1.4531521, %v1100_v45  ;;  %v1848_v38 = vmul.f32 1.442695, %v1740_v4  ;;  %v4129_v23 = vadd.f32 %v3840_v11, %v3688_v26 }
 0x1b1   : > { %v2318_v15 = vmul.f32 %v2254_v0, %v718_v5  ;;  %v4125_v62 = vmul.f32 0.70710677, %v4111_v55  ;;  %3110 = vrcp.f32 %v941_v18  ;;  %v4137_v5 = vmul.f32 0.5, %v4029_v29  ;;  %v4150_v29 = vpop.f32.mrb[25].mxu1 }
 0x1b2   : > { %v1516_v13 = vadd.f32 0.2548296, %v1452_v37  ;;  %v4121_v20 = vpop.eup %3104  ;;  %v1228_v31 = vmul.f32 %v4107_v7, %v1164_v34  ;;  %v1790_v17 = vmul.f32 1.442695, %v1711_v36  ;;  %v1679_v52 = vsub.f32 0.0, %v847_v8 }
 0x1b3   : > { %v2868_v24 = vpack.c.bf16 %v2318_v15, %v2318_v15  ;;  %v1071_v25 = vmul.f32 1.0614054, %v4121_v20  ;;  %v3107_v42 = vpop.eup %3106  ;;  %v845_v6 = vand.u32 2147483647, %v4125_v62  ;;  %3112 = vpow2.f32 %v1848_v38 }
 0x1b4   : > { %v1580_v61 = vmul.f32 %v4064_v59, %v1516_v13  ;;  %v1292_v26 = vadd.f32 1.4214138, %v1228_v31  ;;  %v4141_v59 = vmul.f32 0.70710677, %v4129_v23  ;;  %v4144_v43 = vmul.f32 0.5, %v4046_v12 }
 0x1b5   : > { %2639 = vst.msk [vmem:[%s3594_s26 + $0xb8] sm:$0xf] %vm2592_vm4, %v2868_v24  ;;  %v1135_v40 = vadd.f32 -1.4531521, %v1071_v25  ;;  %v909_v10 = vmul.f32 0.3275911, %v845_v6  ;;  %v4148_v4 = vadd.f32 %v3840_v11, %v3690_v2  ;;  %3114 = vpow2.f32 %v1790_v17 }
 0x1b6   : > { %v1900_v1 = vmul.f32 %v3107_v42, %v1580_v61  ;;  %v1356_v0 = vmul.f32 %v4107_v7, %v1292_v26  ;;  %v818_v37 = vand.u32 2147483647, %v4141_v59  ;;  %v1743_v45 = vmul.f32 %v1679_v52, %v847_v8 }
 0x1b7   : > { %v1199_v22 = vmul.f32 %v4121_v20, %v1135_v40  ;;  %v1645_v19 = vsub.f32 0.0, %v4105_v16  ;;  %v973_v12 = vadd.f32 1.0, %v909_v10  ;;  %v1677_v34 = vsub.f32 0.0, %v845_v6 }
 0x1b8   : > { %v1964_v3 = vsub.f32 1.0, %v1900_v1  ;;  %v1420_v36 = vadd.f32 -0.28449672, %v1356_v0  ;;  %v4159_v18 = vmul.f32 0.5, %v4077_v9  ;;  %v882_v24 = vmul.f32 0.3275911, %v818_v37 }
 0x1b9   : > { %v1263_v13 = vadd.f32 1.4214138, %v1199_v22  ;;  %v4156_v2 = vpop.eup %3108  ;;  %3116 = vrcp.f32 %v973_v12  ;;  %v4162_v38 = vmul.f32 0.70710677, %v4148_v4  ;;  %v1854_v17 = vmul.f32 1.442695, %v1743_v45 }
 0x1ba   : > { %v2092_v15 = vsub.f32 0.0, %v1964_v3  ;;  %v1484_v61 = vmul.f32 %v4107_v7, %v1420_v36  ;;  %v1103_v25 = vmul.f32 1.0614054, %v4156_v2  ;;  %v1709_v52 = vmul.f32 %v1645_v19, %v4105_v16  ;;  %v4170_v1 = vpop.f32.mrb[26].mxu0 }
 0x1bb   : > { %v1327_v31 = vmul.f32 %v4121_v20, %v1263_v13  ;;  %v946_v9 = vadd.f32 1.0, %v882_v24  ;;  %v4172_v26 = vpop.eup %3110  ;;  %v1741_v49 = vmul.f32 %v1677_v34, %v845_v6  ;;  %vm2060_vm14 = vcmp.lt.f32.partialorder %v4042_v28, 0.0 }
 0x1bc   : > { %v2156_v8 = vsel %vm2028_vm13, %v2092_v15, %v1964_v3  ;;  %v1548_v40 = vadd.f32 0.2548296, %v1484_v61  ;;  %v1167_v0 = vadd.f32 -1.4531521, %v1103_v25  ;;  %v1069_v22 = vmul.f32 1.0614054, %v4172_v26 }
 0x1bd   : > { %v2220_v42 = vadd.f32 1.0, %v2156_v8  ;;  %v1391_v10 = vadd.f32 -0.28449672, %v1327_v31  ;;  %3118 = vrcp.f32 %v946_v9  ;;  %v4178_v45 = vadd.f32 %v3840_v11, %v3723_v51  ;;  %v3113_v6 = vpop.eup %3112 }
 0x1be   : > { %v1612_v16 = vmul.f32 %v4107_v7, %v1548_v40  ;;  %v1231_v12 = vmul.f32 %v4156_v2, %v1167_v0  ;;  %v850_v15 = vand.u32 2147483647, %v4162_v38  ;;  %v1133_v36 = vadd.f32 -1.4531521, %v1069_v22 }
 0x1bf   : > { %v2284_v3 = vmul.f32 %v2220_v42, %v684_v32  ;;  %v1455_v19 = vmul.f32 %v4121_v20, %v1391_v10  ;;  %v1786_v13 = vmul.f32 1.442695, %v1709_v52  ;;  %v1650_v34 = vsub.f32 0.0, %v818_v37  ;;  %v3115_v25 = vpop.eup %3114 }
 0x1c0   : > { %v1932_v24 = vmul.f32 %v3113_v6, %v1612_v16  ;;  %v1295_v61 = vadd.f32 1.4214138, %v1231_v12  ;;  %v914_v31 = vmul.f32 0.3275911, %v850_v15  ;;  %vm2031_vm15 = vcmp.lt.f32.partialorder %v4060_v14, 0.0 }
 0x1c1   : > { %v2834_v32 = vpack.c.bf16 %v2284_v3, %v2284_v3  ;;  %v1519_v8 = vadd.f32 0.2548296, %v1455_v19  ;;  %3120 = vpow2.f32 %v1854_v17  ;;  %v1197_v51 = vmul.f32 %v4172_v26, %v1133_v36  ;;  %v4198_v17 = vpop.f32.mrb[26].mxu1 }
 0x1c2   : > { %v1850_v7 = vmul.f32 1.442695, %v1741_v49  ;;  %v4189_v42 = vmul.f32 0.70710677, %v4178_v45  ;;  %v1996_v9 = vsub.f32 1.0, %v1932_v24  ;;  %v1359_v40 = vmul.f32 %v4156_v2, %v1295_v61  ;;  %4981 = vst [vmem:[#allocation2_spill] sm:$0xff] %v4198_v17 }
 0x1c3   : > { %2605 = vst.msk [vmem:[%s3594_s26 + $0x30] sm:$0xf] %vm2592_vm4, %v2834_v32  ;;  %v1583_v52 = vmul.f32 %v4121_v20, %v1519_v8  ;;  %v978_v10 = vadd.f32 1.0, %v914_v31  ;;  %v4193_v0 = vpop.eup %3116  ;;  %v1261_v3 = vadd.f32 1.4214138, %v1197_v51  ;;  %3122 = vpow2.f32 %v1786_v13 }
 0x1c4   : > { %v1714_v22 = vmul.f32 %v1650_v34, %v818_v37  ;;  %v4196_v16 = vand.u32 2147483647, %v4189_v42  ;;  %v2124_v49 = vsub.f32 0.0, %v1996_v9  ;;  %v1423_v12 = vadd.f32 -0.28449672, %v1359_v40 }
 0x1c5   : > { %v1903_v19 = vmul.f32 %v3115_v25, %v1583_v52  ;;  %v1101_v6 = vmul.f32 1.0614054, %v4193_v0  ;;  %v1325_v20 = vmul.f32 %v4172_v26, %v1261_v3  ;;  %3124 = vrcp.f32 %v978_v10 }
 0x1c6   : > { %v1682_v32 = vsub.f32 0.0, %v850_v15  ;;  %v880_v36 = vmul.f32 0.3275911, %v4196_v16  ;;  %v2188_v13 = vsel %vm2060_vm14, %v2124_v49, %v1996_v9  ;;  %v1487_v34 = vmul.f32 %v4156_v2, %v1423_v12 }
 0x1c7   : > { %v1967_v37 = vsub.f32 1.0, %v1903_v19  ;;  %v1165_v24 = vadd.f32 -1.4531521, %v1101_v6  ;;  %v4206_v8 = vpop.eup %3118  ;;  %v2252_v61 = vadd.f32 1.0, %v2188_v13  ;;  %v1389_v31 = vadd.f32 -0.28449672, %v1325_v20 }
 0x1c8   : > { %v1796_v25 = vmul.f32 1.442695, %v1714_v22  ;;  %v944_v51 = vadd.f32 1.0, %v880_v36  ;;  %v1551_v40 = vadd.f32 0.2548296, %v1487_v34  ;;  %vm2063_vm0 = vcmp.lt.f32.partialorder %v4083_v63, 0.0 }
 0x1c9   : > { %v2095_v52 = vsub.f32 0.0, %v1967_v37  ;;  %v1229_v10 = vmul.f32 %v4193_v0, %v1165_v24  ;;  %v1074_v3 = vmul.f32 1.0614054, %v4206_v8  ;;  %v2316_v17 = vmul.f32 %v2252_v61, %v4137_v5  ;;  %v4216_v5 = vpop.f32.mrb[27].mxu0 }
 0x1ca   : > { %v1453_v28 = vmul.f32 %v4172_v26, %v1389_v31  ;;  %v1746_v9 = vmul.f32 %v1682_v32, %v850_v15  ;;  %3126 = vrcp.f32 %v944_v51  ;;  %v1615_v22 = vmul.f32 %v4156_v2, %v1551_v40 }
 0x1cb   : > { %v2159_v49 = vsel %vm2031_vm15, %v2095_v52, %v1967_v37  ;;  %v1293_v19 = vadd.f32 1.4214138, %v1229_v10  ;;  %v1138_v12 = vadd.f32 -1.4531521, %v1074_v3  ;;  %v3121_v6 = vpop.eup %3120  ;;  %v2866_v20 = vpack.c.bf16 %v2316_v17, %v2316_v17 }
 0x1cc   : > { %v2223_v36 = vadd.f32 1.0, %v2159_v49  ;;  %v1517_v13 = vadd.f32 0.2548296, %v1453_v28  ;;  %3128 = vpow2.f32 %v1850_v7  ;;  %v1935_v34 = vmul.f32 %v3121_v6, %v1615_v22 }
 0x1cd   : > { %v1357_v24 = vmul.f32 %v4193_v0, %v1293_v19  ;;  %v1202_v15 = vmul.f32 %v4206_v8, %v1138_v12  ;;  %v4222_v14 = vadd.f32 %v3840_v11, %v3743_v53  ;;  %v3123_v32 = vpop.eup %3122  ;;  %2637 = vst.msk [vmem:[%s3594_s26 + $0xb0] sm:$0xf] %vm2592_vm4, %v2866_v20  ;;  %v685_v17 = vmul.f32 0.5, %v4089_v57 }
 0x1ce   : > { %v2287_v2 = vmul.f32 %v2223_v36, %v4144_v43  ;;  %v1581_v7 = vmul.f32 %v4172_v26, %v1517_v13  ;;  %v1860_v37 = vmul.f32 1.442695, %v1746_v9  ;;  %v1999_v61 = vsub.f32 1.0, %v1935_v34  ;;  %v4250_v34 = vpop.f32.mrb[27].mxu1 }
 0x1cf   : > { %v1421_v31 = vadd.f32 -0.28449672, %v1357_v24  ;;  %v1266_v51 = vadd.f32 1.4214138, %v1202_v15  ;;  %3130 = vpow2.f32 %v1796_v25  ;;  %v4229_v52 = vpop.eup %3124  ;;  %v1648_v11 = vsub.f32 0.0, %v4196_v16 }
 0x1d0   : > { %v2837_v40 = vpack.c.bf16 %v2287_v2, %v2287_v2  ;;  %v1901_v53 = vmul.f32 %v3123_v32, %v1581_v7  ;;  %v4233_v10 = vmul.f32 0.70710677, %v4222_v14  ;;  %v2127_v43 = vsub.f32 0.0, %v1999_v61 }
 0x1d1   : > { %v1485_v57 = vmul.f32 %v4193_v0, %v1421_v31  ;;  %v1330_v3 = vmul.f32 %v4206_v8, %v1266_v51  ;;  %v1106_v26 = vmul.f32 1.0614054, %v4229_v52  ;;  %vm2029_vm1 = vcmp.lt.f32.partialorder %v4100_v54, 0.0 }
 0x1d2   : > { %2608 = vst.msk [vmem:[%s3594_s26 + $0x3c] sm:$0xf] %vm2592_vm4, %v2837_v40  ;;  %v1965_v28 = vsub.f32 1.0, %v1901_v53  ;;  %3132 = vpow2.f32 %v1860_v37  ;;  %v4242_v25 = vand.u32 2147483647, %v4233_v10  ;;  %v2191_v9 = vsel %vm2063_vm0, %v2127_v43, %v1999_v61 }
 0x1d3   : > { %v1549_v49 = vadd.f32 0.2548296, %v1485_v57  ;;  %v1394_v22 = vadd.f32 -0.28449672, %v1330_v3  ;;  %v1170_v19 = vadd.f32 -1.4531521, %v1106_v26  ;;  %v1712_v36 = vmul.f32 %v1648_v11, %v4196_v16 }
 0x1d4   : > { %v4246_v12 = vpop.eup %3126  ;;  %v2255_v6 = vadd.f32 1.0, %v2191_v9  ;;  %v2093_v20 = vsub.f32 0.0, %v1965_v28  ;;  %v912_v13 = vmul.f32 0.3275911, %v4242_v25  ;;  %v4262_v16 = vld [vmem:[%s4965_s2] ss:$0 sm:$0xff] }
 0x1d5   : > { %v1613_v24 = vmul.f32 %v4193_v0, %v1549_v49  ;;  %v1458_v15 = vmul.f32 %v4206_v8, %v1394_v22  ;;  %v1234_v63 = vmul.f32 %v4229_v52, %v1170_v19  ;;  %v1072_v32 = vmul.f32 1.0614054, %v4246_v12 }
 0x1d6   : > { %v3129_v2 = vpop.eup %3128  ;;  %v2319_v7 = vmul.f32 %v2255_v6, %v4159_v18  ;;  %v2157_v37 = vsel %vm2029_vm1, %v2093_v20, %v1965_v28  ;;  %v976_v61 = vadd.f32 1.0, %v912_v13  ;;  %v4266_v0 = vadd.f32 %v4262_v16, %v3775_v46 }
 0x1d7   : > { %v2221_v31 = vadd.f32 1.0, %v2157_v37  ;;  %v1933_v51 = vmul.f32 %v3129_v2, %v1613_v24  ;;  %v1522_v40 = vadd.f32 0.2548296, %v1458_v15  ;;  %v1298_v53 = vadd.f32 1.4214138, %v1234_v63  ;;  %v4291_v63 = vpop.f32.mrb[28].mxu0 }
 0x1d8   : > { %v2869_v11 = vpack.c.bf16 %v2319_v7, %v2319_v7  ;;  %v1136_v18 = vadd.f32 -1.4531521, %v1072_v32  ;;  %v1792_v43 = vmul.f32 1.442695, %v1712_v36  ;;  %3134 = vrcp.f32 %v976_v61 }
 0x1d9   : > { %v3131_v54 = vpop.eup %3130  ;;  %v2285_v57 = vmul.f32 %v2221_v31, %v685_v17  ;;  %v1997_v3 = vsub.f32 1.0, %v1933_v51  ;;  %v1586_v26 = vmul.f32 %v4206_v8, %v1522_v40  ;;  %v1362_v28 = vmul.f32 %v4229_v52, %v1298_v53 }
 0x1da   : > { %2640 = vst.msk [vmem:[%s3594_s26 + $0xbc] sm:$0xf] %vm2592_vm4, %v2869_v11  ;;  %vm2061_vm2 = vcmp.lt.f32.partialorder %v4125_v62, 0.0  ;;  %v1200_v46 = vmul.f32 %v4246_v12, %v1136_v18  ;;  %v4275_v9 = vmul.f32 0.70710677, %v4266_v0  ;;  %v4279_v49 = vadd.f32 %v4262_v16, %v3808_v27 }
 0x1db   : > { %v2835_v17 = vpack.c.bf16 %v2285_v57, %v2285_v57  ;;  %v2125_v22 = vsub.f32 0.0, %v1997_v3  ;;  %v1906_v19 = vmul.f32 %v3131_v54, %v1586_v26  ;;  %v1426_v8 = vadd.f32 -0.28449672, %v1362_v28 }
 0x1dc   : > { %v3133_v6 = vpop.eup %3132  ;;  %v1264_v20 = vadd.f32 1.4214138, %v1200_v46  ;;  %3136 = vpow2.f32 %v1792_v43  ;;  %v1680_v36 = vsub.f32 0.0, %v4242_v25  ;;  %v4283_v62 = vand.u32 2147483647, %v4275_v9  ;;  %v4299_v43 = vpop.f32.mrb[28].mxu1 }
 0x1dd   : > { %2606 = vst.msk [vmem:[%s3594_s26 + $0x34] sm:$0xf] %vm2592_vm4, %v2835_v17  ;;  %v2189_v13 = vsel %vm2061_vm2, %v2125_v22, %v1997_v3  ;;  %v1970_v24 = vsub.f32 1.0, %v1906_v19  ;;  %v1490_v15 = vmul.f32 %v4229_v52, %v1426_v8  ;;  %v4289_v27 = vmul.f32 0.70710677, %v4279_v49 }
 0x1de   : > { %v717_v32 = vmul.f32 0.5, %v4111_v55  ;;  %v2253_v2 = vadd.f32 1.0, %v2189_v13  ;;  %v1328_v7 = vmul.f32 %v4246_v12, %v1264_v20  ;;  %v883_v37 = vmul.f32 0.3275911, %v4283_v62 }
 0x1df   : > { %v690_v61 = vmul.f32 0.5, %v4129_v23  ;;  %v2098_v31 = vsub.f32 0.0, %v1970_v24  ;;  %v1554_v51 = vadd.f32 0.2548296, %v1490_v15  ;;  %v851_v40 = vand.u32 2147483647, %v4289_v27 }
 0x1e0   : > { %v2317_v53 = vmul.f32 %v2253_v2, %v717_v32  ;;  %vm2034_vm3 = vcmp.lt.f32.partialorder %v4141_v59, 0.0  ;;  %v1392_v11 = vadd.f32 -0.28449672, %v1328_v7  ;;  %v947_v18 = vadd.f32 1.0, %v883_v37  ;;  %v4319_v2 = vpop.f32.mrb[29].mxu0 }
 0x1e1   : > { %v2162_v55 = vsel %vm2034_vm3, %v2098_v31, %v1970_v24  ;;  %v1618_v54 = vmul.f32 %v4229_v52, %v1554_v51  ;;  %v1744_v57 = vmul.f32 %v1680_v36, %v4242_v25  ;;  %v915_v3 = vmul.f32 0.3275911, %v851_v40 }
 0x1e2   : > { %v4303_v26 = vpop.eup %3134  ;;  %v2867_v23 = vpack.c.bf16 %v2317_v53, %v2317_v53  ;;  %v2226_v28 = vadd.f32 1.0, %v2162_v55  ;;  %v1456_v46 = vmul.f32 %v4246_v12, %v1392_v11  ;;  %3138 = vrcp.f32 %v947_v18 }
 0x1e3   : > { %v1938_v17 = vmul.f32 %v3133_v6, %v1618_v54  ;;  %v1104_v59 = vmul.f32 1.0614054, %v4303_v26  ;;  %v979_v22 = vadd.f32 1.0, %v915_v3  ;;  %v4311_v52 = vadd.f32 %v4262_v16, %v3821_v56 }
 0x1e4   : > { %2638 = vst.msk [vmem:[%s3594_s26 + $0xb4] sm:$0xf] %vm2592_vm4, %v2867_v23  ;;  %v2290_v19 = vmul.f32 %v2226_v28, %v690_v61  ;;  %v1520_v8 = vadd.f32 0.2548296, %v1456_v46  ;;  %v722_v25 = vmul.f32 0.5, %v4148_v4  ;;  %v4316_v13 = vadd.f32 %v4262_v16, %v3861_v30 }
 0x1e5   : > { %v2002_v20 = vsub.f32 1.0, %v1938_v17  ;;  %v1168_v36 = vadd.f32 -1.4531521, %v1104_v59  ;;  %v1856_v32 = vmul.f32 1.442695, %v1744_v57  ;;  %3140 = vrcp.f32 %v979_v22 }
 0x1e6   : > { %v3137_v6 = vpop.eup %3136  ;;  %v2840_v24 = vpack.c.bf16 %v2290_v19, %v2290_v19  ;;  %v1584_v15 = vmul.f32 %v4246_v12, %v1520_v8  ;;  %vm2066_vm5 = vcmp.lt.f32.partialorder %v4162_v38, 0.0  ;;  %v4324_v4 = vmul.f32 0.70710677, %v4311_v52 }
 0x1e7   : > { %v2130_v56 = vsub.f32 0.0, %v2002_v20  ;;  %v1232_v7 = vmul.f32 %v4303_v26, %v1168_v36  ;;  %v688_v30 = vmul.f32 0.5, %v4178_v45  ;;  %v1651_v61 = vsub.f32 0.0, %v4283_v62 }
 0x1e8   : > { %2611 = vst.msk [vmem:[%s3594_s26 + $0x48] sm:$0xf] %vm2592_vm4, %v2840_v24  ;;  %v1904_v37 = vmul.f32 %v3137_v6, %v1584_v15  ;;  %v4331_v12 = vmul.f32 0.70710677, %v4316_v13  ;;  %v1683_v53 = vsub.f32 0.0, %v851_v40  ;;  %3142 = vpow2.f32 %v1856_v32  ;;  %v4348_v6 = vpop.f32.mrb[29].mxu1 }
 0x1e9   : > { %v2194_v31 = vsel %vm2066_vm5, %v2130_v56, %v2002_v20  ;;  %v1296_v51 = vadd.f32 1.4214138, %v1232_v7  ;;  %v817_v38 = vand.u32 2147483647, %v4324_v4  ;;  %vm2032_vm6 = vcmp.lt.f32.partialorder %v4189_v42, 0.0 }
 0x1ea   : > { %v2258_v11 = vadd.f32 1.0, %v2194_v31  ;;  %v1968_v18 = vsub.f32 1.0, %v1904_v37  ;;  %v849_v55 = vand.u32 2147483647, %v4331_v12  ;;  %v4337_v45 = vmul.f32 0.5, %v4222_v14 }
 0x1eb   : > { %v1360_v54 = vmul.f32 %v4303_v26, %v1296_v51  ;;  %v881_v57 = vmul.f32 0.3275911, %v817_v38  ;;  %v1715_v46 = vmul.f32 %v1651_v61, %v4283_v62  ;;  %v1747_v19 = vmul.f32 %v1683_v53, %v851_v40 }
 0x1ec   : > { %v4340_v3 = vpop.eup %3138  ;;  %v2322_v23 = vmul.f32 %v2258_v11, %v722_v25  ;;  %v2096_v28 = vsub.f32 0.0, %v1968_v18  ;;  %v913_v17 = vmul.f32 0.3275911, %v849_v55  ;;  %v4346_v36 = vadd.f32 %v4262_v16, %v3875_v58 }
 0x1ed   : > { %v1424_v59 = vadd.f32 -0.28449672, %v1360_v54  ;;  %v1075_v22 = vmul.f32 1.0614054, %v4340_v3  ;;  %v945_v8 = vadd.f32 1.0, %v881_v57  ;;  %v1649_v32 = vsub.f32 0.0, %v817_v38 }
 0x1ee   : > { %v2872_v42 = vpack.c.bf16 %v2322_v23, %v2322_v23  ;;  %v2160_v20 = vsel %vm2032_vm6, %v2096_v28, %v1968_v18  ;;  %v977_v14 = vadd.f32 1.0, %v913_v17  ;;  %v1798_v40 = vmul.f32 1.442695, %v1715_v46  ;;  %v4370_v23 = vpop.f32.mrb[30].mxu0 }
 0x1ef   : > { %v2224_v25 = vadd.f32 1.0, %v2160_v20  ;;  %v1488_v24 = vmul.f32 %v4303_v26, %v1424_v59  ;;  %v1139_v62 = vadd.f32 -1.4531521, %v1075_v22  ;;  %3144 = vrcp.f32 %v945_v8  ;;  %v4351_v15 = vpop.eup %3140 }
 0x1f0   : > { %2643 = vst.msk [vmem:[%s3594_s26 + $0xc8] sm:$0xf] %vm2592_vm4, %v2872_v42  ;;  %3146 = vrcp.f32 %v977_v14  ;;  %v1681_v56 = vsub.f32 0.0, %v849_v55  ;;  %v1107_v61 = vmul.f32 1.0614054, %v4351_v15  ;;  %vm2064_vm7 = vcmp.lt.f32.partialorder %v4233_v10, 0.0 }
 0x1f1   : > { %v2288_v7 = vmul.f32 %v2224_v25, %v688_v30  ;;  %v1552_v37 = vadd.f32 0.2548296, %v1488_v24  ;;  %v1203_v58 = vmul.f32 %v4340_v3, %v1139_v62  ;;  %v1862_v31 = vmul.f32 1.442695, %v1747_v19 }
 0x1f2   : > { %v4359_v51 = vmul.f32 0.70710677, %v4346_v36  ;;  %v4363_v53 = vadd.f32 %v4262_v16, %v3889_v47  ;;  %v4367_v11 = vadd.f32 %v4262_v16, %v3927_v41  ;;  %v1171_v57 = vadd.f32 -1.4531521, %v1107_v61  ;;  %v3143_v28 = vpop.eup %3142 }
 0x1f3   : > { %v2838_v30 = vpack.c.bf16 %v2288_v7, %v2288_v7  ;;  %v1616_v18 = vmul.f32 %v4303_v26, %v1552_v37  ;;  %v1267_v54 = vadd.f32 1.4214138, %v1203_v58  ;;  %3148 = vpow2.f32 %v1798_v40 }
 0x1f4   : > { %v1713_v46 = vmul.f32 %v1649_v32, %v817_v38  ;;  %v1745_v17 = vmul.f32 %v1681_v56, %v849_v55  ;;  %v822_v59 = vand.u32 2147483647, %v4359_v51  ;;  %v1235_v41 = vmul.f32 %v4351_v15, %v1171_v57 }
 0x1f5   : > { %2609 = vst.msk [vmem:[%s3594_s26 + $0x40] sm:$0xf] %vm2592_vm4, %v2838_v30  ;;  %v1936_v47 = vmul.f32 %v3143_v28, %v1616_v18  ;;  %v1331_v22 = vmul.f32 %v4340_v3, %v1267_v54  ;;  %v4378_v19 = vmul.f32 0.70710677, %v4363_v53  ;;  %v4381_v26 = vmul.f32 0.5, %v4266_v0 }
 0x1f6   : > { %v4384_v8 = vmul.f32 0.5, %v4279_v49  ;;  %v886_v38 = vmul.f32 0.3275911, %v822_v59  ;;  %v4387_v55 = vmul.f32 0.70710677, %v4367_v11  ;;  %3150 = vpow2.f32 %v1862_v31 }
 0x1f7   : > { %v2000_v42 = vsub.f32 1.0, %v1936_v47  ;;  %v1395_v20 = vadd.f32 -0.28449672, %v1331_v22  ;;  %v1299_v14 = vadd.f32 1.4214138, %v1235_v41  ;;  %v1654_v62 = vsub.f32 0.0, %v822_v59 }
 0x1f8   : > { %v1794_v25 = vmul.f32 1.442695, %v1713_v46  ;;  %v950_v24 = vadd.f32 1.0, %v886_v38  ;;  %v854_v40 = vand.u32 2147483647, %v4378_v19  ;;  %vm2035_vm8 = vcmp.lt.f32.partialorder %v4275_v9, 0.0 }
 0x1f9   : > { %v4390_v32 = vpop.eup %3144  ;;  %v2128_v0 = vsub.f32 0.0, %v2000_v42  ;;  %v1459_v56 = vmul.f32 %v4340_v3, %v1395_v20  ;;  %v1363_v49 = vmul.f32 %v4351_v15, %v1299_v14  ;;  %v1858_v7 = vmul.f32 1.442695, %v1745_v17  ;;  %v4404_v22 = vpop.f32.mrb[30].mxu1 }
 0x1fa   : > { %v4394_v37 = vpop.eup %3146  ;;  %v1073_v58 = vmul.f32 1.0614054, %v4390_v32  ;;  %3152 = vrcp.f32 %v950_v24  ;;  %v918_v61 = vmul.f32 0.3275911, %v854_v40  ;;  %v4398_v31 = vand.u32 2147483647, %v4387_v55 }
 0x1fb   : > { %v2192_v30 = vsel %vm2064_vm7, %v2128_v0, %v2000_v42  ;;  %v1523_v18 = vadd.f32 0.2548296, %v1459_v56  ;;  %v1427_v54 = vadd.f32 -0.28449672, %v1363_v49  ;;  %v1105_v57 = vmul.f32 1.0614054, %v4394_v37 }
 0x1fc   : > { %v2256_v28 = vadd.f32 1.0, %v2192_v30  ;;  %v1137_v46 = vadd.f32 -1.4531521, %v1073_v58  ;;  %v1718_v17 = vmul.f32 %v1654_v62, %v822_v59  ;;  %v982_v47 = vadd.f32 1.0, %v918_v61 }
 0x1fd   : > { %v1587_v41 = vmul.f32 %v4340_v3, %v1523_v18  ;;  %v1491_v38 = vmul.f32 %v4351_v15, %v1427_v54  ;;  %3154 = vpow2.f32 %v1794_v25  ;;  %v1169_v20 = vadd.f32 -1.4531521, %v1105_v57  ;;  %v3149_v10 = vpop.eup %3148 }
 0x1fe   : > { %v2320_v42 = vmul.f32 %v2256_v28, %v4337_v45  ;;  %v1201_v14 = vmul.f32 %v4390_v32, %v1137_v46  ;;  %3156 = vrcp.f32 %v982_v47  ;;  %v884_v24 = vmul.f32 0.3275911, %v4398_v31 }
 0x1ff   : > { %v1907_v0 = vmul.f32 %v3149_v10, %v1587_v41  ;;  %v1555_v59 = vadd.f32 0.2548296, %v1491_v38  ;;  %v1233_v62 = vmul.f32 %v4394_v37, %v1169_v20  ;;  %v1686_v56 = vsub.f32 0.0, %v854_v40 }
 0x200   : > { %v2870_v49 = vpack.c.bf16 %v2320_v42, %v2320_v42  ;;  %v1265_v3 = vadd.f32 1.4214138, %v1201_v14  ;;  %v1804_v58 = vmul.f32 1.442695, %v1718_v17  ;;  %v948_v61 = vadd.f32 1.0, %v884_v24  ;;  %v3151_v25 = vpop.eup %3150  ;;  %v4433_v14 = vpop.f32.mrb[31].mxu0 }
 0x201   : > { %v1971_v30 = vsub.f32 1.0, %v1907_v0  ;;  %v1619_v18 = vmul.f32 %v4351_v15, %v1555_v59  ;;  %v1297_v45 = vadd.f32 1.4214138, %v1233_v62  ;;  %3158 = vpow2.f32 %v1858_v7 }
 0x202   : > { %2641 = vst.msk [vmem:[%s3594_s26 + $0xc0] sm:$0xf] %vm2592_vm4, %v2870_v49  ;;  %vm2067_vm9 = vcmp.lt.f32.partialorder %v4289_v27, 0.0  ;;  %v1329_v54 = vmul.f32 %v4390_v32, %v1265_v3  ;;  %3160 = vrcp.f32 %v948_v61  ;;  %v4419_v57 = vadd.f32 %v4262_v16, %v3935_v33 }
 0x203   : > { %v2099_v28 = vsub.f32 0.0, %v1971_v30  ;;  %v1939_v46 = vmul.f32 %v3151_v25, %v1619_v18  ;;  %v1361_v17 = vmul.f32 %v4394_v37, %v1297_v45  ;;  %v1750_v47 = vmul.f32 %v1686_v56, %v854_v40 }
 0x204   : > { %v4422_v41 = vpop.eup %3152  ;;  %v4425_v15 = vmul.f32 0.5, %v4311_v52  ;;  %v1393_v7 = vadd.f32 -0.28449672, %v1329_v54  ;;  %v4428_v38 = vmul.f32 0.5, %v4316_v13  ;;  %3162 = vpow2.f32 %v1804_v58 }
 0x205   : > { %v2163_v20 = vsel %vm2035_vm8, %v2099_v28, %v1971_v30  ;;  %v2003_v33 = vsub.f32 1.0, %v1939_v46  ;;  %v1425_v10 = vadd.f32 -0.28449672, %v1361_v17  ;;  %v1078_v42 = vmul.f32 1.0614054, %v4422_v41  ;;  %v4451_v30 = vpop.f32.mrb[31].mxu1 }
 0x206   : > { %v2227_v40 = vadd.f32 1.0, %v2163_v20  ;;  %v1457_v24 = vmul.f32 %v4390_v32, %v1393_v7  ;;  %v1652_v52 = vsub.f32 0.0, %v4398_v31  ;;  %v4438_v0 = vmul.f32 0.70710677, %v4419_v57 }
 0x207   : > { %v3155_v13 = vpop.eup %3154  ;;  %v2131_v59 = vsub.f32 0.0, %v2003_v33  ;;  %v1489_v62 = vmul.f32 %v4394_v37, %v1425_v10  ;;  %v1142_v9 = vadd.f32 -1.4531521, %v1078_v42  ;;  %v1868_v56 = vmul.f32 1.442695, %v1750_v47 }
 0x208   : > { %v4441_v49 = vpop.eup %3156  ;;  %v2291_v3 = vmul.f32 %v2227_v40, %v4381_v26  ;;  %v1521_v58 = vadd.f32 0.2548296, %v1457_v24  ;;  %v4445_v61 = vand.u32 2147483647, %v4438_v0  ;;  %v4449_v25 = vadd.f32 %v4262_v16, %v3975_v48 }
 0x209   : > { %v2195_v18 = vsel %vm2067_vm9, %v2131_v59, %v2003_v33  ;;  %vm2033_vm10 = vcmp.lt.f32.partialorder %v4324_v4, 0.0  ;;  %v1553_v45 = vadd.f32 0.2548296, %v1489_v62  ;;  %v1206_v54 = vmul.f32 %v4422_v41, %v1142_v9 }
 0x20a   : > { %v1110_v26 = vmul.f32 1.0614054, %v4441_v49  ;;  %v2841_v28 = vpack.c.bf16 %v2291_v3, %v2291_v3  ;;  %v2259_v46 = vadd.f32 1.0, %v2195_v18  ;;  %v1585_v17 = vmul.f32 %v4390_v32, %v1521_v58 }
 0x20b   : > { %v916_v48 = vmul.f32 0.3275911, %v4445_v61  ;;  %v3159_v47 = vpop.eup %3158  ;;  %v1617_v7 = vmul.f32 %v4394_v37, %v1553_v45  ;;  %v1270_v20 = vadd.f32 1.4214138, %v1206_v54  ;;  %v1716_v33 = vmul.f32 %v1652_v52, %v4398_v31 }
 0x20c   : > { %v1174_v27 = vadd.f32 -1.4531521, %v1110_v26  ;;  %v4462_v10 = vpop.eup %3160  ;;  %2612 = vst.msk [vmem:[%s3594_s26 + $0x4c] sm:$0xf] %vm2592_vm4, %v2841_v28  ;;  %v2323_v42 = vmul.f32 %v2259_v46, %v4384_v8  ;;  %v1905_v40 = vmul.f32 %v3155_v13, %v1585_v17  ;;  %v4468_v32 = vmul.f32 0.70710677, %v4449_v25 }
 0x20d   : > { %v980_v24 = vadd.f32 1.0, %v916_v48  ;;  %v1937_v59 = vmul.f32 %v3159_v47, %v1617_v7  ;;  %v1334_v62 = vmul.f32 %v4422_v41, %v1270_v20  ;;  %v1076_v9 = vmul.f32 1.0614054, %v4462_v10 }
 0x20e   : > { %v1238_v37 = vmul.f32 %v4441_v49, %v1174_v27  ;;  %v3163_v31 = vpop.eup %3162  ;;  %v2873_v52 = vpack.c.bf16 %v2323_v42, %v2323_v42  ;;  %v1969_v3 = vsub.f32 1.0, %v1905_v40  ;;  %vm2065_vm11 = vcmp.lt.f32.partialorder %v4331_v12, 0.0 }
 0x20f   : > { %3164 = vrcp.f32 %v980_v24  ;;  %v2001_v8 = vsub.f32 1.0, %v1937_v59  ;;  %v1398_v13 = vadd.f32 -0.28449672, %v1334_v62  ;;  %v1140_v45 = vadd.f32 -1.4531521, %v1076_v9 }
 0x210   : > { %v1302_v58 = vadd.f32 1.4214138, %v1238_v37  ;;  %3166 = vpow2.f32 %v1868_v56  ;;  %2644 = vst.msk [vmem:[%s3594_s26 + $0xcc] sm:$0xf] %vm2592_vm4, %v2873_v52  ;;  %v2097_v18 = vsub.f32 0.0, %v1969_v3  ;;  %v4478_v26 = vadd.f32 %v4262_v16, %v3994_v44 }
 0x211   : > { %v1800_v54 = vmul.f32 1.442695, %v1716_v33  ;;  %v2129_v28 = vsub.f32 0.0, %v2001_v8  ;;  %v1462_v46 = vmul.f32 %v4422_v41, %v1398_v13  ;;  %v4483_v48 = vand.u32 2147483647, %v4468_v32 }
 0x212   : > { %v1366_v17 = vmul.f32 %v4441_v49, %v1302_v58  ;;  %v2161_v56 = vsel %vm2033_vm10, %v2097_v18, %v1969_v3  ;;  %v694_v47 = vmul.f32 0.5, %v4346_v36  ;;  %v1204_v7 = vmul.f32 %v4462_v10, %v1140_v45 }
 0x213   : > { %v1684_v20 = vsub.f32 0.0, %v4445_v61  ;;  %v2225_v27 = vadd.f32 1.0, %v2161_v56  ;;  %v2193_v44 = vsel %vm2065_vm11, %v2129_v28, %v2001_v8  ;;  %v1526_v33 = vadd.f32 0.2548296, %v1462_v46 }
 0x214   : > { %v1430_v42 = vadd.f32 -0.28449672, %v1366_v17  ;;  %v2257_v40 = vadd.f32 1.0, %v2193_v44  ;;  %v1268_v24 = vadd.f32 1.4214138, %v1204_v7  ;;  %3168 = vpow2.f32 %v1800_v54 }
 0x215   : > { %v887_v59 = vmul.f32 0.3275911, %v4483_v48  ;;  %v2289_v4 = vmul.f32 %v2225_v27, %v4425_v15  ;;  %v1590_v62 = vmul.f32 %v4422_v41, %v1526_v33  ;;  %v4497_v37 = vmul.f32 0.70710677, %v4478_v26 }
 0x216   : > { %v1494_v36 = vmul.f32 %v4441_v49, %v1430_v42  ;;  %v2321_v12 = vmul.f32 %v2257_v40, %v4428_v38  ;;  %v1332_v9 = vmul.f32 %v4462_v10, %v1268_v24  ;;  %v1748_v52 = vmul.f32 %v1684_v20, %v4445_v61 }
 0x217   : > { %v951_v3 = vadd.f32 1.0, %v887_v59  ;;  %v2839_v8 = vpack.c.bf16 %v2289_v4, %v2289_v4  ;;  %v1910_v13 = vmul.f32 %v3163_v31, %v1590_v62  ;;  %v855_v15 = vand.u32 2147483647, %v4497_v37 }
 0x218   : > { %v1558_v58 = vadd.f32 0.2548296, %v1494_v36  ;;  %v2871_v18 = vpack.c.bf16 %v2321_v12, %v2321_v12  ;;  %vm2038_vm12 = vcmp.lt.f32.partialorder %v4359_v51, 0.0  ;;  %v1396_v45 = vadd.f32 -0.28449672, %v1332_v9 }
 0x219   : > { %v4503_v41 = vpop.eup %3164  ;;  %3170 = vrcp.f32 %v951_v3  ;;  %2610 = vst.msk [vmem:[%s3594_s26 + $0x44] sm:$0xf] %vm2592_vm4, %v2839_v8  ;;  %v1974_v38 = vsub.f32 1.0, %v1910_v13  ;;  %v919_v46 = vmul.f32 0.3275911, %v855_v15  ;;  %v726_v31 = vmul.f32 0.5, %v4363_v53 }
 0x21a   : > { %v3167_v54 = vpop.eup %3166  ;;  %v1622_v61 = vmul.f32 %v4441_v49, %v1558_v58  ;;  %v1108_v28 = vmul.f32 1.0614054, %v4503_v41  ;;  %2642 = vst.msk [vmem:[%s3594_s26 + $0xc4] sm:$0xf] %vm2592_vm4, %v2871_v18  ;;  %v692_v17 = vmul.f32 0.5, %v4367_v11  ;;  %v1460_v56 = vmul.f32 %v4462_v10, %v1396_v45 }
 0x21b   : > { %v1864_v7 = vmul.f32 1.442695, %v1748_v52  ;;  %v2102_v20 = vsub.f32 0.0, %v1974_v38  ;;  %v983_v33 = vadd.f32 1.0, %v919_v46  ;;  %v1655_v40 = vsub.f32 0.0, %v4483_v48 }
 0x21c   : > { %v1942_v27 = vmul.f32 %v3167_v54, %v1622_v61  ;;  %v1172_v44 = vadd.f32 -1.4531521, %v1108_v28  ;;  %v1524_v42 = vadd.f32 0.2548296, %v1460_v56  ;;  %v4518_v49 = vadd.f32 %v4262_v16, %v4031_v50 }
 0x21d   : > { %v4522_v24 = vadd.f32 %v4262_v16, %v4053_v21  ;;  %v2166_v53 = vsel %vm2038_vm12, %v2102_v20, %v1974_v38  ;;  %3172 = vrcp.f32 %v983_v33  ;;  %vm2070_vm13 = vcmp.lt.f32.partialorder %v4378_v19, 0.0 }
 0x21e   : > { %v2006_v11 = vsub.f32 1.0, %v1942_v27  ;;  %v1236_v59 = vmul.f32 %v4503_v41, %v1172_v44  ;;  %v3169_v4 = vpop.eup %3168  ;;  %v2230_v62 = vadd.f32 1.0, %v2166_v53  ;;  %v1588_v36 = vmul.f32 %v4462_v10, %v1524_v42 }
 0x21f   : > { %vm2036_vm14 = vcmp.lt.f32.partialorder %v4387_v55, 0.0  ;;  %3174 = vpow2.f32 %v1864_v7  ;;  %v4531_v21 = vmul.f32 0.70710677, %v4518_v49  ;;  %v1719_v52 = vmul.f32 %v1655_v40, %v4483_v48 }
 0x220   : > { %v2134_v50 = vsub.f32 0.0, %v2006_v11  ;;  %v1300_v12 = vadd.f32 1.4214138, %v1236_v59  ;;  %v2294_v51 = vmul.f32 %v2230_v62, %v694_v47  ;;  %v1908_v9 = vmul.f32 %v3169_v4, %v1588_v36 }
 0x221   : > { %v4535_v3 = vmul.f32 0.70710677, %v4522_v24  ;;  %v1687_v10 = vsub.f32 0.0, %v855_v15  ;;  %v821_v13 = vand.u32 2147483647, %v4531_v21  ;;  %vm2068_vm15 = vcmp.lt.f32.partialorder %v4438_v0, 0.0 }
 0x222   : > { %v2198_v8 = vsel %vm2070_vm13, %v2134_v50, %v2006_v11  ;;  %v1364_v19 = vmul.f32 %v4503_v41, %v1300_v12  ;;  %v2844_v18 = vpack.c.bf16 %v2294_v51, %v2294_v51  ;;  %v1972_v54 = vsub.f32 1.0, %v1908_v9 }
 0x223   : > { %v4539_v58 = vpop.eup %3170  ;;  %v2262_v45 = vadd.f32 1.0, %v2198_v8  ;;  %v853_v47 = vand.u32 2147483647, %v4535_v3  ;;  %v885_v48 = vmul.f32 0.3275911, %v821_v13  ;;  %v1751_v44 = vmul.f32 %v1687_v10, %v855_v15 }
 0x224   : > { %v1428_v38 = vadd.f32 -0.28449672, %v1364_v19  ;;  %v1079_v61 = vmul.f32 1.0614054, %v4539_v58  ;;  %2615 = vst.msk [vmem:[%s3594_s26 + $0x58] sm:$0xf] %vm2592_vm4, %v2844_v18  ;;  %v4550_v11 = vadd.f32 %v4262_v16, %v4091_v60 }
 0x225   : > { %v2326_v28 = vmul.f32 %v2262_v45, %v726_v31  ;;  %v2100_v46 = vsub.f32 0.0, %v1972_v54  ;;  %v1806_v56 = vmul.f32 1.442695, %v1719_v52  ;;  %v917_v7 = vmul.f32 0.3275911, %v853_v47 }
 0x226   : > { %v1492_v20 = vmul.f32 %v4503_v41, %v1428_v38  ;;  %v1143_v27 = vadd.f32 -1.4531521, %v1079_v61  ;;  %v949_v33 = vadd.f32 1.0, %v885_v48  ;;  %v724_v60 = vmul.f32 0.5, %v4419_v57 }
 0x227   : > { %v2876_v42 = vpack.c.bf16 %v2326_v28, %v2326_v28  ;;  %v2164_v40 = vsel %vm2036_vm14, %v2100_v46, %v1972_v54  ;;  %v981_v53 = vadd.f32 1.0, %v917_v7  ;;  %v4552_v59 = vpop.eup %3172  ;;  %v1870_v9 = vmul.f32 1.442695, %v1751_v44 }
 0x228   : > { %v2228_v31 = vadd.f32 1.0, %v2164_v40  ;;  %v1556_v4 = vadd.f32 0.2548296, %v1492_v20  ;;  %v1207_v62 = vmul.f32 %v4539_v58, %v1143_v27  ;;  %3176 = vrcp.f32 %v949_v33 }
 0x229   : > { %2647 = vst.msk [vmem:[%s3594_s26 + $0xd8] sm:$0xf] %vm2592_vm4, %v2876_v42  ;;  %v1111_v15 = vmul.f32 1.0614054, %v4552_v59  ;;  %3178 = vrcp.f32 %v981_v53  ;;  %v3175_v36 = vpop.eup %3174  ;;  %v4562_v10 = vmul.f32 0.70710677, %v4550_v11 }
 0x22a   : > { %v2292_v55 = vmul.f32 %v2228_v31, %v692_v17  ;;  %v1620_v50 = vmul.f32 %v4503_v41, %v1556_v4  ;;  %v1271_v12 = vadd.f32 1.4214138, %v1207_v62  ;;  %3180 = vpow2.f32 %v1806_v56 }
 0x22b   : > { %v1175_v51 = vadd.f32 -1.4531521, %v1111_v15  ;;  %v4565_v18 = vmul.f32 0.5, %v4449_v25  ;;  %v1653_v45 = vsub.f32 0.0, %v821_v13  ;;  %v4570_v41 = vadd.f32 %v4262_v16, %v4093_v39 }
 0x22c   : > { %v2842_v52 = vpack.c.bf16 %v2292_v55, %v2292_v55  ;;  %v1940_v8 = vmul.f32 %v3175_v36, %v1620_v50  ;;  %v1335_v19 = vmul.f32 %v4539_v58, %v1271_v12  ;;  %v1685_v38 = vsub.f32 0.0, %v853_v47 }
 0x22d   : > { %v1239_v17 = vmul.f32 %v4552_v59, %v1175_v51  ;;  %v826_v61 = vand.u32 2147483647, %v4562_v10  ;;  %3182 = vpow2.f32 %v1870_v9  ;;  %v4577_v25 = vmul.f32 0.70710677, %v4570_v41 }
 0x22e   : > { %2613 = vst.msk [vmem:[%s3594_s26 + $0x50] sm:$0xf] %vm2592_vm4, %v2842_v52  ;;  %v2004_v57 = vsub.f32 1.0, %v1940_v8  ;;  %v1399_v54 = vadd.f32 -0.28449672, %v1335_v19  ;;  %v4582_v39 = vadd.f32 %v4262_v16, %v4113_v35  ;;  %v4585_v7 = vmul.f32 0.5, %v4478_v26 }
 0x22f   : > { %v1303_v48 = vadd.f32 1.4214138, %v1239_v17  ;;  %v890_v56 = vmul.f32 0.3275911, %v826_v61  ;;  %v1717_v27 = vmul.f32 %v1653_v45, %v821_v13  ;;  %v4589_v0 = vand.u32 2147483647, %v4577_v25 }
 0x230   : > { %v2132_v28 = vsub.f32 0.0, %v2004_v57  ;;  %v1463_v46 = vmul.f32 %v4539_v58, %v1399_v54  ;;  %v1749_v40 = vmul.f32 %v1685_v38, %v853_v47  ;;  %vm2039_vm0 = vcmp.lt.f32.partialorder %v4468_v32, 0.0 }
 0x231   : > { %v1367_v20 = vmul.f32 %v4552_v59, %v1303_v48  ;;  %v954_v53 = vadd.f32 1.0, %v890_v56  ;;  %v1658_v62 = vsub.f32 0.0, %v826_v61  ;;  %v4600_v36 = vmul.f32 0.70710677, %v4582_v39 }
 0x232   : > { %v4591_v44 = vpop.eup %3176  ;;  %v2196_v33 = vsel %vm2068_vm15, %v2132_v28, %v2004_v57  ;;  %v1527_v42 = vadd.f32 0.2548296, %v1463_v46  ;;  %v922_v51 = vmul.f32 0.3275911, %v4589_v0  ;;  %v1802_v52 = vmul.f32 1.442695, %v1717_v27 }
 0x233   : > { %v4593_v31 = vpop.eup %3178  ;;  %v2260_v4 = vadd.f32 1.0, %v2196_v33  ;;  %v1431_v35 = vadd.f32 -0.28449672, %v1367_v20  ;;  %v1077_v26 = vmul.f32 1.0614054, %v4591_v44  ;;  %3184 = vrcp.f32 %v954_v53 }
 0x234   : > { %v1591_v13 = vmul.f32 %v4539_v58, %v1527_v42  ;;  %v1109_v15 = vmul.f32 1.0614054, %v4593_v31  ;;  %v3181_v55 = vpop.eup %3180  ;;  %v1866_v19 = vmul.f32 1.442695, %v1749_v40  ;;  %v986_v57 = vadd.f32 1.0, %v922_v51 }
 0x235   : > { %v2324_v47 = vmul.f32 %v2260_v4, %v724_v60  ;;  %v1495_v50 = vmul.f32 %v4552_v59, %v1431_v35  ;;  %v1141_v12 = vadd.f32 -1.4531521, %v1077_v26  ;;  %vm2071_vm1 = vcmp.lt.f32.partialorder %v4497_v37, 0.0 }
 0x236   : > { %v1911_v9 = vmul.f32 %v3181_v55, %v1591_v13  ;;  %v1173_v8 = vadd.f32 -1.4531521, %v1109_v15  ;;  %v824_v38 = vand.u32 2147483647, %v4600_v36  ;;  %v1722_v56 = vmul.f32 %v1658_v62, %v826_v61 }
 0x237   : > { %v2874_v17 = vpack.c.bf16 %v2324_v47, %v2324_v47  ;;  %v1559_v58 = vadd.f32 0.2548296, %v1495_v50  ;;  %v1205_v45 = vmul.f32 %v4591_v44, %v1141_v12  ;;  %v3183_v48 = vpop.eup %3182  ;;  %3186 = vrcp.f32 %v986_v57 }
 0x238   : > { %v1975_v54 = vsub.f32 1.0, %v1911_v9  ;;  %v1237_v60 = vmul.f32 %v4593_v31, %v1173_v8  ;;  %3188 = vpow2.f32 %v1802_v52  ;;  %v888_v33 = vmul.f32 0.3275911, %v824_v38 }
 0x239   : > { %2645 = vst.msk [vmem:[%s3594_s26 + $0xd0] sm:$0xf] %vm2592_vm4, %v2874_v17  ;;  %v1623_v28 = vmul.f32 %v4552_v59, %v1559_v58  ;;  %v1269_v46 = vadd.f32 1.4214138, %v1205_v45  ;;  %3190 = vpow2.f32 %v1866_v19  ;;  %v4614_v53 = vadd.f32 %v4262_v16, %v4150_v29 }
 0x23a   : > { %v2103_v20 = vsub.f32 0.0, %v1975_v54  ;;  %v1301_v27 = vadd.f32 1.4214138, %v1237_v60  ;;  %v1690_v61 = vsub.f32 0.0, %v4589_v0  ;;  %v952_v35 = vadd.f32 1.0, %v888_v33 }
 0x23b   : > { %v1943_v42 = vmul.f32 %v3183_v48, %v1623_v28  ;;  %v1333_v40 = vmul.f32 %v4591_v44, %v1269_v46  ;;  %v1812_v15 = vmul.f32 1.442695, %v1722_v56  ;;  %v1656_v50 = vsub.f32 0.0, %v824_v38 }
 0x23c   : > { %v2167_v4 = vsel %vm2039_vm0, %v2103_v20, %v1975_v54  ;;  %v1365_v59 = vmul.f32 %v4593_v31, %v1301_v27  ;;  %3192 = vrcp.f32 %v952_v35  ;;  %v4623_v29 = vmul.f32 0.70710677, %v4614_v53 }
 0x23d   : > { %v2231_v26 = vadd.f32 1.0, %v2167_v4  ;;  %v2007_v62 = vsub.f32 1.0, %v1943_v42  ;;  %v1397_v13 = vadd.f32 -0.28449672, %v1333_v40  ;;  %v4620_v55 = vpop.eup %3184  ;;  %v1754_v8 = vmul.f32 %v1690_v61, %v4589_v0 }
 0x23e   : > { %v1429_v47 = vadd.f32 -0.28449672, %v1365_v59  ;;  %v1082_v9 = vmul.f32 1.0614054, %v4620_v55  ;;  %v4631_v19 = vand.u32 2147483647, %v4623_v29  ;;  %v4635_v17 = vadd.f32 %v4262_v16, %v4170_v1 }
 0x23f   : > { %v2295_v32 = vmul.f32 %v2231_v26, %v4565_v18  ;;  %v2135_v12 = vsub.f32 0.0, %v2007_v62  ;;  %v1461_v51 = vmul.f32 %v4591_v44, %v1397_v13  ;;  %v693_v60 = vmul.f32 0.5, %v4518_v49 }
 0x240   : > { %v1493_v52 = vmul.f32 %v4593_v31, %v1429_v47  ;;  %v1146_v57 = vadd.f32 -1.4531521, %v1082_v9  ;;  %v920_v28 = vmul.f32 0.3275911, %v4631_v19  ;;  %3194 = vpow2.f32 %v1812_v15 }
 0x241   : > { %v2845_v58 = vpack.c.bf16 %v2295_v32, %v2295_v32  ;;  %v2199_v18 = vsel %vm2071_vm1, %v2135_v12, %v2007_v62  ;;  %v1525_v45 = vadd.f32 0.2548296, %v1461_v51  ;;  %v4641_v0 = vpop.eup %3186  ;;  %v1720_v16 = vmul.f32 %v1656_v50, %v824_v38 }
 0x242   : > { %v2263_v54 = vadd.f32 1.0, %v2199_v18  ;;  %v1557_v48 = vadd.f32 0.2548296, %v1493_v52  ;;  %v1210_v1 = vmul.f32 %v4620_v55, %v1146_v57  ;;  %v3189_v37 = vpop.eup %3188  ;;  %v1114_v49 = vmul.f32 1.0614054, %v4641_v0 }
 0x243   : > { %2616 = vst.msk [vmem:[%s3594_s26 + $0x5c] sm:$0xf] %vm2592_vm4, %v2845_v58  ;;  %v1589_v46 = vmul.f32 %v4591_v44, %v1525_v45  ;;  %v984_v27 = vadd.f32 1.0, %v920_v28  ;;  %v3191_v33 = vpop.eup %3190  ;;  %v1876_v4 = vmul.f32 1.442695, %v1754_v8  ;;  %vm2037_vm2 = vcmp.lt.f32.partialorder %v4531_v21, 0.0 }
 0x244   : > { %v2327_v56 = vmul.f32 %v2263_v54, %v4585_v7  ;;  %v1621_v20 = vmul.f32 %v4593_v31, %v1557_v48  ;;  %v1274_v40 = vadd.f32 1.4214138, %v1210_v1  ;;  %v4651_v59 = vmul.f32 0.70710677, %v4635_v17  ;;  %v4669_v52 = vld [vmem:[%s4965_s2] ss:$0 sm:$0xff] }
 0x245   : > { %v1909_v42 = vmul.f32 %v3189_v37, %v1589_v46  ;;  %v1178_v35 = vadd.f32 -1.4531521, %v1114_v49  ;;  %3196 = vrcp.f32 %v984_v27  ;;  %vm2069_vm3 = vcmp.lt.f32.partialorder %v4535_v3, 0.0  ;;  %v4982_v8 = vld [vmem:[#allocation2_spill] sm:$0xff] }
 0x246   : > { %v2877_v44 = vpack.c.bf16 %v2327_v56, %v2327_v56  ;;  %v1941_v61 = vmul.f32 %v3191_v33, %v1621_v20  ;;  %v1338_v7 = vmul.f32 %v4620_v55, %v1274_v40  ;;  %v4656_v31 = vand.u32 2147483647, %v4651_v59  ;;  %v4658_v26 = vpop.eup %3192 }
 0x247   : > { %v1973_v38 = vsub.f32 1.0, %v1909_v42  ;;  %v1242_v13 = vmul.f32 %v4641_v0, %v1178_v35  ;;  %v1808_v15 = vmul.f32 1.442695, %v1720_v16  ;;  %3198 = vpow2.f32 %v1876_v4 }
 0x248   : > { %2648 = vst.msk [vmem:[%s3594_s26 + $0xdc] sm:$0xf] %vm2592_vm4, %v2877_v44  ;;  %v2005_v62 = vsub.f32 1.0, %v1941_v61  ;;  %v1402_v50 = vadd.f32 -0.28449672, %v1338_v7  ;;  %v4673_v58 = vadd.f32 %v4669_v52, %v4982_v8  ;;  %v1688_v54 = vsub.f32 0.0, %v4631_v19 }
 0x249   : > { %v2101_v47 = vsub.f32 0.0, %v1973_v38  ;;  %v1080_v32 = vmul.f32 1.0614054, %v4658_v26  ;;  %v1306_v51 = vadd.f32 1.4214138, %v1242_v13  ;;  %v725_v37 = vmul.f32 0.5, %v4522_v24 }
 0x24a   : > { %v2133_v12 = vsub.f32 0.0, %v2005_v62  ;;  %v891_v9 = vmul.f32 0.3275911, %v4656_v31  ;;  %v1466_v45 = vmul.f32 %v4620_v55, %v1402_v50  ;;  %v3195_v16 = vpop.eup %3194  ;;  %v4685_v33 = vmul.f32 0.70710677, %v4673_v58 }
 0x24b   : > { %v2165_v18 = vsel %vm2037_vm2, %v2101_v47, %v1973_v38  ;;  %v1144_v57 = vadd.f32 -1.4531521, %v1080_v32  ;;  %v1370_v46 = vmul.f32 %v4641_v0, %v1306_v51  ;;  %v1752_v61 = vmul.f32 %v1688_v54, %v4631_v19 }
 0x24c   : > { %v2229_v48 = vadd.f32 1.0, %v2165_v18  ;;  %v2197_v28 = vsel %vm2069_vm3, %v2133_v12, %v2005_v62  ;;  %v955_v1 = vadd.f32 1.0, %v891_v9  ;;  %v1530_v20 = vadd.f32 0.2548296, %v1466_v45 }
 0x24d   : > { %v2261_v56 = vadd.f32 1.0, %v2197_v28  ;;  %v1208_v21 = vmul.f32 %v4658_v26, %v1144_v57  ;;  %v1434_v27 = vadd.f32 -0.28449672, %v1370_v46  ;;  %v4706_v51 = vadd.f32 %v4669_v52, %v4216_v5 }
 0x24e   : > { %v2293_v49 = vmul.f32 %v2229_v48, %v693_v60  ;;  %3200 = vrcp.f32 %v955_v1  ;;  %v1594_v3 = vmul.f32 %v4620_v55, %v1530_v20  ;;  %v4693_v60 = vand.u32 2147483647, %v4685_v33 }
 0x24f   : > { %v2325_v42 = vmul.f32 %v2261_v56, %v725_v37  ;;  %v1272_v40 = vadd.f32 1.4214138, %v1208_v21  ;;  %3202 = vpow2.f32 %v1808_v15  ;;  %v4688_v4 = vpop.eup %3196  ;;  %v1498_v44 = vmul.f32 %v4641_v0, %v1434_v27 }
 0x250   : > { %v2843_v24 = vpack.c.bf16 %v2293_v49, %v2293_v49  ;;  %v1914_v38 = vmul.f32 %v3195_v16, %v1594_v3  ;;  %v1112_v62 = vmul.f32 1.0614054, %v4688_v4  ;;  %v698_v55 = vmul.f32 0.5, %v4550_v11 }
 0x251   : > { %v2875_v35 = vpack.c.bf16 %v2325_v42, %v2325_v42  ;;  %v1336_v7 = vmul.f32 %v4658_v26, %v1272_v40  ;;  %v1562_v13 = vadd.f32 0.2548296, %v1498_v44  ;;  %v1659_v15 = vsub.f32 0.0, %v4656_v31  ;;  %v3199_v50 = vpop.eup %3198 }
 0x252   : > { %2614 = vst.msk [vmem:[%s3594_s26 + $0x54] sm:$0xf] %vm2592_vm4, %v2843_v24  ;;  %v923_v47 = vmul.f32 0.3275911, %v4693_v60  ;;  %v1978_v19 = vsub.f32 1.0, %v1914_v38  ;;  %vm2042_vm5 = vcmp.lt.f32.partialorder %v4562_v10, 0.0 }
 0x253   : > { %2646 = vst.msk [vmem:[%s3594_s26 + $0xd4] sm:$0xf] %vm2592_vm4, %v2875_v35  ;;  %v1400_v32 = vadd.f32 -0.28449672, %v1336_v7  ;;  %v1176_v12 = vadd.f32 -1.4531521, %v1112_v62  ;;  %v1626_v9 = vmul.f32 %v4641_v0, %v1562_v13  ;;  %v1723_v28 = vmul.f32 %v1659_v15, %v4656_v31 }
 0x254   : > { %v1872_v11 = vmul.f32 1.442695, %v1752_v61  ;;  %v987_v8 = vadd.f32 1.0, %v923_v47  ;;  %v2106_v18 = vsub.f32 0.0, %v1978_v19  ;;  %v730_v45 = vmul.f32 0.5, %v4570_v41 }
 0x255   : > { %v1464_v57 = vmul.f32 %v4658_v26, %v1400_v32  ;;  %v1240_v54 = vmul.f32 %v4688_v4, %v1176_v12  ;;  %v1946_v48 = vmul.f32 %v3199_v50, %v1626_v9  ;;  %v4715_v5 = vmul.f32 0.70710677, %v4706_v51 }
 0x256   : > { %3204 = vrcp.f32 %v987_v8  ;;  %v2170_v46 = vsel %vm2042_vm5, %v2106_v18, %v1978_v19  ;;  %v4719_v0 = vadd.f32 %v4669_v52, %v4250_v34  ;;  %vm2074_vm6 = vcmp.lt.f32.partialorder %v4577_v25, 0.0 }
 0x257   : > { %v1528_v10 = vadd.f32 0.2548296, %v1464_v57  ;;  %v1304_v1 = vadd.f32 1.4214138, %v1240_v54  ;;  %v2234_v41 = vadd.f32 1.0, %v2170_v46  ;;  %v2010_v37 = vsub.f32 1.0, %v1946_v48 }
 0x258   : > { %v4721_v16 = vpop.eup %3200  ;;  %3206 = vpow2.f32 %v1872_v11  ;;  %v4724_v56 = vand.u32 2147483647, %v4715_v5  ;;  %v1814_v42 = vmul.f32 1.442695, %v1723_v28  ;;  %v4732_v61 = vmul.f32 0.70710677, %v4719_v0 }
 0x259   : > { %v3203_v31 = vpop.eup %3202  ;;  %v1592_v20 = vmul.f32 %v4658_v26, %v1528_v10  ;;  %v1368_v21 = vmul.f32 %v4688_v4, %v1304_v1  ;;  %v1083_v49 = vmul.f32 1.0614054, %v4721_v16  ;;  %v2298_v27 = vmul.f32 %v2234_v41, %v698_v55 }
 0x25a   : > { %v2138_v34 = vsub.f32 0.0, %v2010_v37  ;;  %v889_v3 = vmul.f32 0.3275911, %v4724_v56  ;;  %v1691_v26 = vsub.f32 0.0, %v4693_v60  ;;  %vm2040_vm7 = vcmp.lt.f32.partialorder %v4600_v36, 0.0 }
 0x25b   : > { %v1912_v40 = vmul.f32 %v3203_v31, %v1592_v20  ;;  %v1432_v24 = vadd.f32 -0.28449672, %v1368_v21  ;;  %v1147_v44 = vadd.f32 -1.4531521, %v1083_v49  ;;  %v2848_v35 = vpack.c.bf16 %v2298_v27, %v2298_v27 }
 0x25c   : > { %v2202_v25 = vsel %vm2074_vm6, %v2138_v34, %v2010_v37  ;;  %v953_v38 = vadd.f32 1.0, %v889_v3  ;;  %v857_v15 = vand.u32 2147483647, %v4732_v61  ;;  %v1755_v9 = vmul.f32 %v1691_v26, %v4693_v60 }
 0x25d   : > { %v2266_v7 = vadd.f32 1.0, %v2202_v25  ;;  %v1976_v62 = vsub.f32 1.0, %v1912_v40  ;;  %v1496_v55 = vmul.f32 %v4688_v4, %v1432_v24  ;;  %v1211_v13 = vmul.f32 %v4721_v16, %v1147_v44  ;;  %2619 = vst.msk [vmem:[%s3594_s26 + $0x68] sm:$0xf] %vm2592_vm4, %v2848_v35 }
 0x25e   : > { %3208 = vrcp.f32 %v953_v38  ;;  %v921_v11 = vmul.f32 0.3275911, %v857_v15  ;;  %v4746_v8 = vadd.f32 %v4669_v52, %v4291_v63  ;;  %v696_v48 = vmul.f32 0.5, %v4582_v39 }
 0x25f   : > { %v2330_v47 = vmul.f32 %v2266_v7, %v730_v45  ;;  %v2104_v50 = vsub.f32 0.0, %v1976_v62  ;;  %v1560_v19 = vadd.f32 0.2548296, %v1496_v55  ;;  %v1275_v32 = vadd.f32 1.4214138, %v1211_v13 }
 0x260   : > { %v4741_v12 = vpop.eup %3204  ;;  %3210 = vpow2.f32 %v1814_v42  ;;  %v985_v10 = vadd.f32 1.0, %v921_v11  ;;  %v1657_v63 = vsub.f32 0.0, %v4724_v56  ;;  %v4756_v41 = vmul.f32 0.70710677, %v4746_v8 }
 0x261   : > { %v2880_v18 = vpack.c.bf16 %v2330_v47, %v2330_v47  ;;  %v2168_v36 = vsel %vm2040_vm7, %v2104_v50, %v1976_v62  ;;  %v1624_v57 = vmul.f32 %v4688_v4, %v1560_v19  ;;  %v1339_v45 = vmul.f32 %v4721_v16, %v1275_v32 }
 0x262   : > { %v3207_v54 = vpop.eup %3206  ;;  %v2232_v28 = vadd.f32 1.0, %v2168_v36  ;;  %v1115_v46 = vmul.f32 1.0614054, %v4741_v12  ;;  %v1878_v31 = vmul.f32 1.442695, %v1755_v9  ;;  %3212 = vrcp.f32 %v985_v10 }
 0x263   : > { %2651 = vst.msk [vmem:[%s3594_s26 + $0xe8] sm:$0xf] %vm2592_vm4, %v2880_v18  ;;  %v1944_v60 = vmul.f32 %v3207_v54, %v1624_v57  ;;  %v1403_v1 = vadd.f32 -0.28449672, %v1339_v45  ;;  %v728_v39 = vmul.f32 0.5, %v4614_v53  ;;  %v1689_v42 = vsub.f32 0.0, %v857_v15 }
 0x264   : > { %v2296_v37 = vmul.f32 %v2232_v28, %v696_v48  ;;  %v1179_v4 = vadd.f32 -1.4531521, %v1115_v46  ;;  %v4761_v49 = vand.u32 2147483647, %v4756_v41  ;;  %v4766_v3 = vadd.f32 %v4669_v52, %v4299_v43 }
 0x265   : > { %v2008_v20 = vsub.f32 1.0, %v1944_v60  ;;  %v1467_v21 = vmul.f32 %v4721_v16, %v1403_v1  ;;  %v1721_v44 = vmul.f32 %v1657_v63, %v4724_v56  ;;  %vm2072_vm8 = vcmp.lt.f32.partialorder %v4623_v29, 0.0 }
 0x266   : > { %v2846_v27 = vpack.c.bf16 %v2296_v37, %v2296_v37  ;;  %v1243_v34 = vmul.f32 %v4741_v12, %v1179_v4  ;;  %v894_v53 = vmul.f32 0.3275911, %v4761_v49  ;;  %3214 = vpow2.f32 %v1878_v31 }
 0x267   : > { %v2136_v40 = vsub.f32 0.0, %v2008_v20  ;;  %v1531_v24 = vadd.f32 0.2548296, %v1467_v21  ;;  %v4776_v26 = vmul.f32 0.70710677, %v4766_v3  ;;  %v1753_v47 = vmul.f32 %v1689_v42, %v857_v15 }
 0x268   : > { %v4770_v35 = vpop.eup %3208  ;;  %2617 = vst.msk [vmem:[%s3594_s26 + $0x60] sm:$0xf] %vm2592_vm4, %v2846_v27  ;;  %v1307_v25 = vadd.f32 1.4214138, %v1243_v34  ;;  %v958_v62 = vadd.f32 1.0, %v894_v53  ;;  %v4787_v18 = vadd.f32 %v4669_v52, %v4319_v2  ;;  %v699_v36 = vmul.f32 0.5, %v4635_v17 }
 0x269   : > { %v2200_v38 = vsel %vm2072_vm8, %v2136_v40, %v2008_v20  ;;  %v1595_v43 = vmul.f32 %v4721_v16, %v1531_v24  ;;  %v1081_v7 = vmul.f32 1.0614054, %v4770_v35  ;;  %v4782_v50 = vand.u32 2147483647, %v4776_v26 }
 0x26a   : > { %v3211_v56 = vpop.eup %3210  ;;  %v2264_v55 = vadd.f32 1.0, %v2200_v38  ;;  %v1371_v13 = vmul.f32 %v4741_v12, %v1307_v25  ;;  %v1810_v32 = vmul.f32 1.442695, %v1721_v44  ;;  %3216 = vrcp.f32 %v958_v62 }
 0x26b   : > { %v1915_v29 = vmul.f32 %v3211_v56, %v1595_v43  ;;  %v1145_v19 = vadd.f32 -1.4531521, %v1081_v7  ;;  %v926_v16 = vmul.f32 0.3275911, %v4782_v50  ;;  %vm2043_vm9 = vcmp.lt.f32.partialorder %v4651_v59, 0.0 }
 0x26c   : > { %v2328_v9 = vmul.f32 %v2264_v55, %v728_v39  ;;  %v1435_v11 = vadd.f32 -0.28449672, %v1371_v13  ;;  %v4792_v45 = vpop.eup %3212  ;;  %v1874_v28 = vmul.f32 1.442695, %v1753_v47  ;;  %3218 = vpow2.f32 %v1810_v32 }
 0x26d   : > { %v1979_v57 = vsub.f32 1.0, %v1915_v29  ;;  %v1209_v15 = vmul.f32 %v4770_v35, %v1145_v19  ;;  %v990_v46 = vadd.f32 1.0, %v926_v16  ;;  %v1113_v2 = vmul.f32 1.0614054, %v4792_v45 }
 0x26e   : > { %v2878_v54 = vpack.c.bf16 %v2328_v9, %v2328_v9  ;;  %v1499_v48 = vmul.f32 %v4741_v12, %v1435_v11  ;;  %v1662_v1 = vsub.f32 0.0, %v4761_v49  ;;  %v4800_v63 = vmul.f32 0.70710677, %v4787_v18 }
 0x26f   : > { %v2107_v10 = vsub.f32 0.0, %v1979_v57  ;;  %v1273_v60 = vadd.f32 1.4214138, %v1209_v15  ;;  %3220 = vrcp.f32 %v990_v46  ;;  %v1177_v31 = vadd.f32 -1.4531521, %v1113_v2 }
 0x270   : > { %2649 = vst.msk [vmem:[%s3594_s26 + $0xe0] sm:$0xf] %vm2592_vm4, %v2878_v54  ;;  %v1563_v17 = vadd.f32 0.2548296, %v1499_v48  ;;  %v4807_v39 = vadd.f32 %v4669_v52, %v4348_v6  ;;  %v3215_v20 = vpop.eup %3214  ;;  %v731_v27 = vmul.f32 0.5, %v4673_v58  ;;  %vm2075_vm10 = vcmp.lt.f32.partialorder %v4685_v33, 0.0 }
 0x271   : > { %v2171_v37 = vsel %vm2043_vm9, %v2107_v10, %v1979_v57  ;;  %v1337_v4 = vmul.f32 %v4770_v35, %v1273_v60  ;;  %v828_v42 = vand.u32 2147483647, %v4800_v63  ;;  %v1241_v59 = vmul.f32 %v4792_v45, %v1177_v31 }
 0x272   : > { %v2235_v21 = vadd.f32 1.0, %v2171_v37  ;;  %v1627_v34 = vmul.f32 %v4741_v12, %v1563_v17  ;;  %3222 = vpow2.f32 %v1874_v28  ;;  %v1726_v6 = vmul.f32 %v1662_v1, %v4761_v49 }
 0x273   : > { %v1401_v40 = vadd.f32 -0.28449672, %v1337_v4  ;;  %v892_v53 = vmul.f32 0.3275911, %v828_v42  ;;  %v1305_v38 = vadd.f32 1.4214138, %v1241_v59  ;;  %v4838_v28 = vadd.f32 %v4669_v52, %v4370_v23 }
 0x274   : > { %v2299_v24 = vmul.f32 %v2235_v21, %v699_v36  ;;  %v1947_v44 = vmul.f32 %v3215_v20, %v1627_v34  ;;  %v4815_v25 = vpop.eup %3216  ;;  %v1694_v12 = vsub.f32 0.0, %v4782_v50  ;;  %v4820_v43 = vmul.f32 0.70710677, %v4807_v39 }
 0x275   : > { %v1465_v58 = vmul.f32 %v4770_v35, %v1401_v40  ;;  %v1086_v56 = vmul.f32 1.0614054, %v4815_v25  ;;  %v956_v55 = vadd.f32 1.0, %v892_v53  ;;  %v697_v13 = vmul.f32 0.5, %v4706_v51 }
 0x276   : > { %v2849_v7 = vpack.c.bf16 %v2299_v24, %v2299_v24  ;;  %v2011_v62 = vsub.f32 1.0, %v1947_v44  ;;  %v1369_v49 = vmul.f32 %v4792_v45, %v1305_v38  ;;  %v860_v29 = vand.u32 2147483647, %v4820_v43  ;;  %v3219_v11 = vpop.eup %3218 }
 0x277   : > { %v1529_v47 = vadd.f32 0.2548296, %v1465_v58  ;;  %v1150_v32 = vadd.f32 -1.4531521, %v1086_v56  ;;  %v1820_v9 = vmul.f32 1.442695, %v1726_v6  ;;  %3224 = vrcp.f32 %v956_v55 }
 0x278   : > { %2620 = vst.msk [vmem:[%s3594_s26 + $0x6c] sm:$0xf] %vm2592_vm4, %v2849_v7  ;;  %v2139_v19 = vsub.f32 0.0, %v2011_v62  ;;  %vm2041_vm11 = vcmp.lt.f32.partialorder %v4715_v5, 0.0  ;;  %v1433_v36 = vadd.f32 -0.28449672, %v1369_v49  ;;  %v1758_v48 = vmul.f32 %v1694_v12, %v4782_v50 }
 0x279   : > { %v1593_v16 = vmul.f32 %v4770_v35, %v1529_v47  ;;  %v924_v57 = vmul.f32 0.3275911, %v860_v29  ;;  %v4830_v15 = vpop.eup %3220  ;;  %v1214_v54 = vmul.f32 %v4815_v25, %v1150_v32  ;;  %3226 = vpow2.f32 %v1820_v9 }
 0x27a   : > { %v2203_v51 = vsel %vm2075_vm10, %v2139_v19, %v2011_v62  ;;  %v1497_v35 = vmul.f32 %v4792_v45, %v1433_v36  ;;  %v1118_v60 = vmul.f32 1.0614054, %v4830_v15  ;;  %v1660_v17 = vsub.f32 0.0, %v828_v42 }
 0x27b   : > { %v2267_v46 = vadd.f32 1.0, %v2203_v51  ;;  %v1913_v10 = vmul.f32 %v3219_v11, %v1593_v16  ;;  %v1278_v2 = vadd.f32 1.4214138, %v1214_v54  ;;  %v988_v1 = vadd.f32 1.0, %v924_v57 }
 0x27c   : > { %v3223_v33 = vpop.eup %3222  ;;  %v1561_v31 = vadd.f32 0.2548296, %v1497_v35  ;;  %v1182_v50 = vadd.f32 -1.4531521, %v1118_v60  ;;  %v1884_v23 = vmul.f32 1.442695, %v1758_v48  ;;  %v1724_v44 = vmul.f32 %v1660_v17, %v828_v42 }
 0x27d   : > { %v2331_v37 = vmul.f32 %v2267_v46, %v731_v27  ;;  %v1977_v4 = vsub.f32 1.0, %v1913_v10  ;;  %v1342_v20 = vmul.f32 %v4815_v25, %v1278_v2  ;;  %3228 = vrcp.f32 %v988_v1 }
 0x27e   : > { %v4844_v21 = vmul.f32 0.70710677, %v4838_v28  ;;  %v1625_v59 = vmul.f32 %v4792_v45, %v1561_v31  ;;  %v1246_v24 = vmul.f32 %v4830_v15, %v1182_v50  ;;  %vm2073_vm12 = vcmp.lt.f32.partialorder %v4732_v61, 0.0 }
 0x27f   : > { %v2881_v34 = vpack.c.bf16 %v2331_v37, %v2331_v37  ;;  %v2105_v40 = vsub.f32 0.0, %v1977_v4  ;;  %v1406_v27 = vadd.f32 -0.28449672, %v1342_v20  ;;  %v1692_v12 = vsub.f32 0.0, %v860_v29 }
 0x280   : > { %v4850_v6 = vand.u32 2147483647, %v4844_v21  ;;  %v1945_v58 = vmul.f32 %v3223_v33, %v1625_v59  ;;  %v1310_v38 = vadd.f32 1.4214138, %v1246_v24  ;;  %3230 = vpow2.f32 %v1884_v23 }
 0x281   : > { %2652 = vst.msk [vmem:[%s3594_s26 + $0xec] sm:$0xf] %vm2592_vm4, %v2881_v34  ;;  %v2169_v53 = vsel %vm2041_vm11, %v2105_v40, %v1977_v4  ;;  %v4856_v7 = vpop.eup %3224  ;;  %v1470_v62 = vmul.f32 %v4815_v25, %v1406_v27  ;;  %v4864_v5 = vadd.f32 %v4669_v52, %v4404_v22  ;;  %v1816_v32 = vmul.f32 1.442695, %v1724_v44 }
 0x282   : > { %v2233_v45 = vadd.f32 1.0, %v2169_v53  ;;  %v895_v56 = vmul.f32 0.3275911, %v4850_v6  ;;  %v2009_v42 = vsub.f32 1.0, %v1945_v58  ;;  %v1374_v55 = vmul.f32 %v4830_v15, %v1310_v38 }
 0x283   : > { %v1084_v47 = vmul.f32 1.0614054, %v4856_v7  ;;  %v1534_v19 = vadd.f32 0.2548296, %v1470_v62  ;;  %v1756_v57 = vmul.f32 %v1692_v12, %v860_v29  ;;  %v3227_v51 = vpop.eup %3226  ;;  %v4869_v46 = vadd.f32 %v4669_v52, %v4433_v14 }
 0x284   : > { %v2297_v49 = vmul.f32 %v2233_v45, %v697_v13  ;;  %v959_v9 = vadd.f32 1.0, %v895_v56  ;;  %v2137_v11 = vsub.f32 0.0, %v2009_v42  ;;  %v1438_v16 = vadd.f32 -0.28449672, %v1374_v55 }
 0x285   : > { %v1148_v36 = vadd.f32 -1.4531521, %v1084_v47  ;;  %v1598_v48 = vmul.f32 %v4815_v25, %v1534_v19  ;;  %v4876_v35 = vmul.f32 0.70710677, %v4864_v5  ;;  %v729_v25 = vmul.f32 0.5, %v4719_v0 }
 0x286   : > { %v2847_v54 = vpack.c.bf16 %v2297_v49, %v2297_v49  ;;  %3232 = vrcp.f32 %v959_v9  ;;  %v2201_v22 = vsel %vm2073_vm12, %v2137_v11, %v2009_v42  ;;  %v1502_v13 = vmul.f32 %v4830_v15, %v1438_v16 }
 0x287   : > { %v1212_v10 = vmul.f32 %v4856_v7, %v1148_v36  ;;  %v4878_v29 = vpop.eup %3228  ;;  %v2265_v60 = vadd.f32 1.0, %v2201_v22  ;;  %v1918_v2 = vmul.f32 %v3227_v51, %v1598_v48  ;;  %vm2046_vm13 = vcmp.lt.f32.partialorder %v4756_v41, 0.0 }
 0x288   : > { %2618 = vst.msk [vmem:[%s3594_s26 + $0x64] sm:$0xf] %vm2592_vm4, %v2847_v54  ;;  %v1566_v14 = vadd.f32 0.2548296, %v1502_v13  ;;  %3234 = vpow2.f32 %v1816_v32  ;;  %v1116_v17 = vmul.f32 1.0614054, %v4878_v29 }
 0x289   : > { %v1276_v61 = vadd.f32 1.4214138, %v1212_v10  ;;  %v2329_v1 = vmul.f32 %v2265_v60, %v729_v25  ;;  %v1982_v33 = vsub.f32 1.0, %v1918_v2  ;;  %v1880_v37 = vmul.f32 1.442695, %v1756_v57 }
 0x28a   : > { %v4886_v4 = vand.u32 2147483647, %v4876_v35  ;;  %v1630_v31 = vmul.f32 %v4830_v15, %v1566_v14  ;;  %v1180_v50 = vadd.f32 -1.4531521, %v1116_v17  ;;  %v4891_v20 = vmul.f32 0.70710677, %v4869_v46  ;;  %v3231_v23 = vpop.eup %3230 }
 0x28b   : > { %v1340_v0 = vmul.f32 %v4856_v7, %v1276_v61  ;;  %v2879_v34 = vpack.c.bf16 %v2329_v1, %v2329_v1  ;;  %v2110_v40 = vsub.f32 0.0, %v1982_v33  ;;  %v1663_v59 = vsub.f32 0.0, %v4850_v6 }
 0x28c   : > { %v927_v24 = vmul.f32 0.3275911, %v4886_v4  ;;  %v1950_v27 = vmul.f32 %v3231_v23, %v1630_v31  ;;  %v1244_v53 = vmul.f32 %v4878_v29, %v1180_v50  ;;  %v4897_v58 = vand.u32 2147483647, %v4891_v20 }
 0x28d   : > { %v1404_v44 = vadd.f32 -0.28449672, %v1340_v0  ;;  %2650 = vst.msk [vmem:[%s3594_s26 + $0xe4] sm:$0xf] %vm2592_vm4, %v2879_v34  ;;  %v702_v15 = vmul.f32 0.5, %v4746_v8  ;;  %v2174_v38 = vsel %vm2046_vm13, %v2110_v40, %v1982_v33  ;;  %3236 = vpow2.f32 %v1880_v37 }
 0x28e   : > { %v991_v12 = vadd.f32 1.0, %v927_v24  ;;  %v2238_v45 = vadd.f32 1.0, %v2174_v38  ;;  %v2014_v62 = vsub.f32 1.0, %v1950_v27  ;;  %v1308_v42 = vadd.f32 1.4214138, %v1244_v53 }
 0x28f   : > { %v1468_v56 = vmul.f32 %v4856_v7, %v1404_v44  ;;  %v1727_v47 = vmul.f32 %v1663_v59, %v4850_v6  ;;  %v893_v49 = vmul.f32 0.3275911, %v4897_v58  ;;  %v4911_v8 = vadd.f32 %v4669_v52, %v4451_v30 }
 0x290   : > { %v4905_v55 = vpop.eup %3232  ;;  %3238 = vrcp.f32 %v991_v12  ;;  %v2302_v41 = vmul.f32 %v2238_v45, %v702_v15  ;;  %v2142_v19 = vsub.f32 0.0, %v2014_v62  ;;  %v1372_v9 = vmul.f32 %v4878_v29, %v1308_v42 }
 0x291   : > { %v1532_v32 = vadd.f32 0.2548296, %v1468_v56  ;;  %vm2078_vm14 = vcmp.lt.f32.partialorder %v4776_v26, 0.0  ;;  %v1087_v11 = vmul.f32 1.0614054, %v4905_v55  ;;  %v957_v16 = vadd.f32 1.0, %v893_v49 }
 0x292   : > { %v3235_v36 = vpop.eup %3234  ;;  %v2852_v6 = vpack.c.bf16 %v2302_v41, %v2302_v41  ;;  %v2206_v57 = vsel %vm2078_vm14, %v2142_v19, %v2014_v62  ;;  %v1436_v54 = vadd.f32 -0.28449672, %v1372_v9  ;;  %v734_v30 = vmul.f32 0.5, %v4766_v3 }
 0x293   : > { %v1596_v51 = vmul.f32 %v4856_v7, %v1532_v32  ;;  %v2270_v52 = vadd.f32 1.0, %v2206_v57  ;;  %v1151_v48 = vadd.f32 -1.4531521, %v1087_v11  ;;  %3240 = vrcp.f32 %v957_v16 }
 0x294   : > { %2623 = vst.msk [vmem:[%s3594_s26 + $0x78] sm:$0xf] %vm2592_vm4, %v2852_v6  ;;  %v1500_v13 = vmul.f32 %v4878_v29, %v1436_v54  ;;  %v1822_v26 = vmul.f32 1.442695, %v1727_v47  ;;  %v4922_v10 = vmul.f32 0.70710677, %v4911_v8 }
 0x295   : > { %v1916_v22 = vmul.f32 %v3235_v36, %v1596_v51  ;;  %v2334_v25 = vmul.f32 %v2270_v52, %v734_v30  ;;  %v1215_v60 = vmul.f32 %v4905_v55, %v1151_v48  ;;  %v1695_v7 = vsub.f32 0.0, %v4886_v4 }
 0x296   : > { %v1564_v3 = vadd.f32 0.2548296, %v1500_v13  ;;  %v861_v14 = vand.u32 2147483647, %v4922_v10  ;;  %3242 = vpow2.f32 %v1822_v26  ;;  %vm2044_vm15 = vcmp.lt.f32.partialorder %v4800_v63, 0.0 }
 0x297   : > { %v1980_v2 = vsub.f32 1.0, %v1916_v22  ;;  %v3237_v61 = vpop.eup %3236  ;;  %v2884_v17 = vpack.c.bf16 %v2334_v25, %v2334_v25  ;;  %v1279_v1 = vadd.f32 1.4214138, %v1215_v60  ;;  %v1759_v23 = vmul.f32 %v1695_v7, %v4886_v4 }
 0x298   : > { %v1628_v37 = vmul.f32 %v4878_v29, %v1564_v3  ;;  %v925_v31 = vmul.f32 0.3275911, %v861_v14  ;;  %v1661_v34 = vsub.f32 0.0, %v4897_v58  ;;  %v700_v44 = vmul.f32 0.5, %v4787_v18 }
 0x299   : > { %v2108_v33 = vsub.f32 0.0, %v1980_v2  ;;  %2655 = vst.msk [vmem:[%s3594_s26 + $0xf8] sm:$0xf] %vm2592_vm4, %v2884_v17  ;;  %v1343_v50 = vmul.f32 %v4905_v55, %v1279_v1  ;;  %v1886_v62 = vmul.f32 1.442695, %v1759_v23  ;;  %vm2076_vm0 = vcmp.lt.f32.partialorder %v4820_v43, 0.0 }
 0x29a   : > { %v3239_v0 = vpop.eup %3238  ;;  %v1948_v59 = vmul.f32 %v3237_v61, %v1628_v37  ;;  %v989_v27 = vadd.f32 1.0, %v925_v31  ;;  %v1725_v4 = vmul.f32 %v1661_v34, %v4897_v58  ;;  %v732_v41 = vmul.f32 0.5, %v4807_v39 }
 0x29b   : > { %v2172_v40 = vsel %vm2044_vm15, %v2108_v33, %v1980_v2  ;;  %v1119_v24 = vmul.f32 1.0614054, %v3239_v0  ;;  %v1407_v53 = vadd.f32 -0.28449672, %v1343_v50  ;;  %v1693_v51 = vsub.f32 0.0, %v861_v14 }
 0x29c   : > { %v2236_v29 = vadd.f32 1.0, %v2172_v40  ;;  %v2012_v15 = vsub.f32 1.0, %v1948_v59  ;;  %3244 = vrcp.f32 %v989_v27  ;;  %v1818_v36 = vmul.f32 1.442695, %v1725_v4 }
 0x29d   : > { %v1183_v38 = vadd.f32 -1.4531521, %v1119_v24  ;;  %v3241_v12 = vpop.eup %3240  ;;  %v1471_v45 = vmul.f32 %v4905_v55, %v1407_v53  ;;  %3246 = vpow2.f32 %v1886_v62  ;;  %v1757_v25 = vmul.f32 %v1693_v51, %v861_v14 }
 0x29e   : > { %v2300_v63 = vmul.f32 %v2236_v29, %v700_v44  ;;  %v2140_v56 = vsub.f32 0.0, %v2012_v15  ;;  %v1085_v47 = vmul.f32 1.0614054, %v3241_v12  ;;  %3248 = vpow2.f32 %v1818_v36 }
 0x29f   : > { %v1247_v42 = vmul.f32 %v3239_v0, %v1183_v38  ;;  %v1535_v18 = vadd.f32 0.2548296, %v1471_v45  ;;  %vm2047_vm1 = vcmp.lt.f32.partialorder %v4844_v21, 0.0  ;;  %v703_v3 = vmul.f32 0.5, %v4838_v28 }
 0x2a0   : > { %v2850_v49 = vpack.c.bf16 %v2300_v63, %v2300_v63  ;;  %v2204_v19 = vsel %vm2076_vm0, %v2140_v56, %v2012_v15  ;;  %v1149_v9 = vadd.f32 -1.4531521, %v1085_v47  ;;  %v3243_v58 = vpop.eup %3242  ;;  %v1882_v31 = vmul.f32 1.442695, %v1757_v25 }
 0x2a1   : > { %v1311_v32 = vadd.f32 1.4214138, %v1247_v42  ;;  %v2268_v11 = vadd.f32 1.0, %v2204_v19  ;;  %v1599_v16 = vmul.f32 %v4905_v55, %v1535_v18  ;;  %vm2079_vm2 = vcmp.lt.f32.partialorder %v4876_v35, 0.0 }
 0x2a2   : > { %2621 = vst.msk [vmem:[%s3594_s26 + $0x70] sm:$0xf] %vm2592_vm4, %v2850_v49  ;;  %v1213_v57 = vmul.f32 %v3241_v12, %v1149_v9  ;;  %3250 = vpow2.f32 %v1882_v31  ;;  %v735_v63 = vmul.f32 0.5, %v4864_v5  ;;  %vm2045_vm3 = vcmp.lt.f32.partialorder %v4891_v20, 0.0 }
 0x2a3   : > { %v1375_v6 = vmul.f32 %v3239_v0, %v1311_v32  ;;  %v2332_v54 = vmul.f32 %v2268_v11, %v732_v41  ;;  %v1919_v43 = vmul.f32 %v3243_v58, %v1599_v16  ;;  %v701_v49 = vmul.f32 0.5, %v4869_v46 }
 0x2a4   : > { %v1277_v52 = vadd.f32 1.4214138, %v1213_v57  ;;  %vm2077_vm5 = vcmp.lt.f32.partialorder %v4922_v10, 0.0  ;;  %v733_v16 = vmul.f32 0.5, %v4911_v8 }
 0x2a5   : > { %v1439_v30 = vadd.f32 -0.28449672, %v1375_v6  ;;  %v2882_v39 = vpack.c.bf16 %v2332_v54, %v2332_v54  ;;  %v1983_v48 = vsub.f32 1.0, %v1919_v43 }
 0x2a6   : > { %v3245_v22 = vpop.eup %3244  ;;  %v1341_v26 = vmul.f32 %v3241_v12, %v1277_v52 }
 0x2a7   : > { %v1503_v13 = vmul.f32 %v3239_v0, %v1439_v30  ;;  %2653 = vst.msk [vmem:[%s3594_s26 + $0xf0] sm:$0xf] %vm2592_vm4, %v2882_v39  ;;  %v2111_v55 = vsub.f32 0.0, %v1983_v48  ;;  %v1117_v60 = vmul.f32 1.0614054, %v3245_v22  ;;  %v3247_v50 = vpop.eup %3246 }
 0x2a8   : > { %v1405_v2 = vadd.f32 -0.28449672, %v1341_v26  ;;  %v3249_v44 = vpop.eup %3248 }
 0x2a9   : > { %v1567_v7 = vadd.f32 0.2548296, %v1503_v13  ;;  %v2175_v61 = vsel %vm2047_vm1, %v2111_v55, %v1983_v48  ;;  %v1181_v17 = vadd.f32 -1.4531521, %v1117_v60 }
 0x2aa   : > { %v2239_v1 = vadd.f32 1.0, %v2175_v61  ;;  %v1469_v37 = vmul.f32 %v3241_v12, %v1405_v2 }
 0x2ab   : > { %v1631_v33 = vmul.f32 %v3239_v0, %v1567_v7  ;;  %v1245_v23 = vmul.f32 %v3245_v22, %v1181_v17 }
 0x2ac   : > { %v2303_v14 = vmul.f32 %v2239_v1, %v703_v3  ;;  %v1533_v40 = vadd.f32 0.2548296, %v1469_v37  ;;  %v3251_v41 = vpop.eup %3250 }
 0x2ad   : > { %v1951_v34 = vmul.f32 %v3247_v50, %v1631_v33  ;;  %v1309_v59 = vadd.f32 1.4214138, %v1245_v23 }
 0x2ae   : > { %v2853_v24 = vpack.c.bf16 %v2303_v14, %v2303_v14  ;;  %v1597_v21 = vmul.f32 %v3241_v12, %v1533_v40 }
 0x2af   : > { %v2015_v27 = vsub.f32 1.0, %v1951_v34  ;;  %v1373_v29 = vmul.f32 %v3245_v22, %v1309_v59 }
 0x2b0   : > { %2624 = vst.msk [vmem:[%s3594_s26 + $0x7c] sm:$0xf] %vm2592_vm4, %v2853_v24  ;;  %v1917_v53 = vmul.f32 %v3249_v44, %v1597_v21 }
 0x2b1   : > { %v2143_v28 = vsub.f32 0.0, %v2015_v27  ;;  %v1437_v0 = vadd.f32 -0.28449672, %v1373_v29 }
 0x2b2   : > { %v1981_v38 = vsub.f32 1.0, %v1917_v53 }
 0x2b3   : > { %v2207_v15 = vsel %vm2079_vm2, %v2143_v28, %v2015_v27  ;;  %v1501_v62 = vmul.f32 %v3245_v22, %v1437_v0 }
 0x2b4   : > { %v2271_v45 = vadd.f32 1.0, %v2207_v15  ;;  %v2109_v4 = vsub.f32 0.0, %v1981_v38 }
 0x2b5   : > { %v1565_v56 = vadd.f32 0.2548296, %v1501_v62 }
 0x2b6   : > { %v2335_v12 = vmul.f32 %v2271_v45, %v735_v63  ;;  %v2173_v42 = vsel %vm2045_vm3, %v2109_v4, %v1981_v38 }
 0x2b7   : > { %v2237_v18 = vadd.f32 1.0, %v2173_v42  ;;  %v1629_v35 = vmul.f32 %v3245_v22, %v1565_v56 }
 0x2b8   : > { %v2885_v47 = vpack.c.bf16 %v2335_v12, %v2335_v12 }
 0x2b9   : > { %v2301_v19 = vmul.f32 %v2237_v18, %v701_v49  ;;  %v1949_v5 = vmul.f32 %v3251_v41, %v1629_v35 }
 0x2ba   : > { %2656 = vst.msk [vmem:[%s3594_s26 + $0xfc] sm:$0xf] %vm2592_vm4, %v2885_v47 }
 0x2bb   : > { %v2851_v32 = vpack.c.bf16 %v2301_v19, %v2301_v19  ;;  %v2013_v9 = vsub.f32 1.0, %v1949_v5 }
 0x2bd   : > { %2622 = vst.msk [vmem:[%s3594_s26 + $0x74] sm:$0xf] %vm2592_vm4, %v2851_v32  ;;  %v2141_v11 = vsub.f32 0.0, %v2013_v9 }
 0x2bf   : > { %v2205_v20 = vsel %vm2077_vm5, %v2141_v11, %v2013_v9 }
 0x2c0   : > { %v2269_v36 = vadd.f32 1.0, %v2205_v20 }
 0x2c2   : > { %v2333_v46 = vmul.f32 %v2269_v36, %v733_v16 }
 0x2c4   : > { %v2883_v58 = vpack.c.bf16 %v2333_v46, %v2333_v46 }
 0x2c6   : > { %2654 = vst.msk [vmem:[%s3594_s26 + $0xf4] sm:$0xf] %vm2592_vm4, %v2883_v58 }
 0x2c7 PF: > { %s13_s12 = sadd.s32 1, %s3261_s12  }
 0x2c8   : > { %p10_p4 = scmp.ge.s32.totalorder %s13_s12, 4  }
 0x2ca   :  { %12 = sbr.rel (!%p10_p4) target bundleno = 1 (0x1), region = 62 }

</bundles_post_ra>
